<compile_context>
chip_gen: v5e
topology: v5e:2x2
jax: 0.10.0
libtpu: 0.0.40
codegen_flags: <defaults>
</compile_context>

<pallas_src>
import functools

import jax
import jax.numpy as jnp
from jax.experimental import pallas as pl
from jax.experimental.pallas import tpu as pltpu


_LANE = 128
_VMEM_LIMIT = 48 * 1024 * 1024          # <= v7x's 64 MiB per-TensorCore VMEM
_LAYER_STRIDES = (1, 2, 2)


def _round_up(x, m):
    return ((x + m - 1) // m) * m


# ---------------------------------------------------------------------------
# Pallas kernels
# ---------------------------------------------------------------------------

def _conv_bn_kernel(*refs, taps, cs, relu, has_res):
    """One (batch, cout-tile) step of Conv1d + BN(eval) [+ residual] [+ ReLU].

    The K-tap gather happens here: each tap is a contiguous (sublane, lane)
    slice of the padded input strip, fed to the MXU and accumulated in f32.
    No im2col, no reduction grid axis, no accumulator scratch.
    """
    if has_res:
        x_ref, w_ref, b_ref, r_ref, o_ref = refs
    else:
        x_ref, w_ref, b_ref, o_ref = refs
        r_ref = None
    lout, _ = o_ref.shape[1], o_ref.shape[2]

    acc = None
    for k, (ro, lo) in enumerate(taps):
        xk = x_ref[0, ro:ro + lout, lo:lo + cs]            # (lout, cs) bf16
        part = jnp.dot(xk, w_ref[k], preferred_element_type=jnp.float32)
        acc = part if acc is None else acc + part

    out = acc + b_ref[...]                                 # fused BN shift (f32)
    if has_res:
        out = out + r_ref[0].astype(jnp.float32)
    if relu:
        out = jnp.maximum(out, 0.0)
    o_ref[0] = out.astype(o_ref.dtype)


def _maxpool_kernel(x_ref, o_ref, *, taps, c):
    """MaxPool1d(3, stride 2, pad 1): elementwise max of 3 in-kernel slices."""
    lout = o_ref.shape[1]
    m = None
    for ro, lo in taps:
        v = x_ref[0, ro:ro + lout, lo:lo + c]
        m = v if m is None else jnp.maximum(m, v)
    o_ref[0] = m


def _head_kernel(x_ref, w_ref, b_ref, o_ref):
    """AdaptiveAvgPool1d(1) + Linear + Softmax for one batch element."""
    pooled = jnp.mean(x_ref[0].astype(jnp.float32), axis=0, keepdims=True)
    logits = jnp.dot(pooled, w_ref[...],
                     preferred_element_type=jnp.float32) + b_ref[...]
    m = jnp.max(logits, axis=-1, keepdims=True)
    e = jnp.exp(logits - m)
    o_ref[0] = e / jnp.sum(e, axis=-1, keepdims=True)


# ---------------------------------------------------------------------------
# Wrappers (only cheap pads / free reshapes remain as XLA glue)
# ---------------------------------------------------------------------------

def _fold_bn_into_weights(w, conv_b, bn, cin_stored, cout_pad):
    """PyTorch (Cout, Cin, K) conv weight -> (K, Cs, cout_pad) bf16 weight with
    the BN scale folded in, plus folded f32 (1, cout_pad) bias. Pad ch = 0."""
    cout, cin, k = w.shape
    gamma, beta, mean, var = bn
    scale = gamma / jnp.sqrt(var + 1e-5)
    bias = beta + scale * (conv_b - mean)
    wk = jnp.transpose(w, (2, 1, 0)) * scale[None, None, :]      # (K, Cin, Cout)
    wk = jnp.pad(wk, ((0, 0), (0, cin_stored - cin), (0, cout_pad - cout)))
    bias = jnp.pad(bias, (0, cout_pad - cout)).reshape(1, cout_pad)
    return wk.astype(jnp.bfloat16), bias.astype(jnp.float32)


def conv1d_bn(x, w, conv_b, bn, *, stride, padding, relu=True, residual=None):
    """Fused Conv1d + BatchNorm1d (eval) [+ residual add] [+ ReLU].

    x:        (B, L, Cs) bf16 channels-last, Cs = round_up(Cin, 128), pad ch 0.
    w/conv_b: PyTorch layout (Cout, Cin, K) / (Cout,), f32.
    residual: (B, Lout, cout_pad) bf16 or None.
    Returns   (B, Lout, cout_pad) bf16, cout_pad = round_up(Cout, 128),
              pad channels exactly 0.
    """
    B, L, Cs = x.shape
    Cout, _, K = w.shape
    cout_pad = _round_up(Cout, _LANE)
    wm, bias = _fold_bn_into_weights(w, conv_b, bn, Cs, cout_pad)

    x = x.astype(jnp.bfloat16)
    Lp = L + 2 * padding
    Lout = (Lp - K) // stride + 1

    if stride == 1:
        if padding > 0:
            x = jnp.pad(x, ((0, 0), (padding, padding), (0, 0)))
        x_in, rows, lanes = x, Lp, Cs
        taps = tuple((k, 0) for k in range(K))
    elif stride == 2:
        extra = Lp % 2
        if padding > 0 or extra:
            x = jnp.pad(x, ((0, 0), (padding, padding + extra), (0, 0)))
        rows = (Lp + extra) // 2
        lanes = 2 * Cs
        # Free reshape: padded row 2p -> lanes [0,Cs), row 2p+1 -> lanes [Cs,2Cs).
        x_in = x.reshape(B, rows, lanes)
        taps = tuple((k // 2, (k % 2) * Cs) for k in range(K))
    else:
        raise NotImplementedError("stride must be 1 or 2")

    TN = min(cout_pad, 256)
    grid = (B, cout_pad // TN)
    in_specs = [
        pl.BlockSpec((1, rows, lanes), lambda b, j: (b, 0, 0)),
        pl.BlockSpec((K, Cs, TN), lambda b, j: (0, 0, j)),
        pl.BlockSpec((1, TN), lambda b, j: (0, j)),
    ]
    args = [x_in, wm, bias]
    bytes_accessed = (x_in.size * 2 + wm.size * 2 + bias.size * 4
                      + B * Lout * cout_pad * 2)
    if residual is not None:
        in_specs.append(pl.BlockSpec((1, Lout, TN), lambda b, j: (b, 0, j)))
        args.append(residual.astype(jnp.bfloat16))
        bytes_accessed += B * Lout * cout_pad * 2

    kernel = functools.partial(_conv_bn_kernel, taps=taps, cs=Cs,
                               relu=relu, has_res=residual is not None)
    return pl.pallas_call(
        kernel,
        out_shape=jax.ShapeDtypeStruct((B, Lout, cout_pad), jnp.bfloat16),
        grid=grid,
        in_specs=in_specs,
        out_specs=pl.BlockSpec((1, Lout, TN), lambda b, j: (b, 0, j)),
        compiler_params=pltpu.CompilerParams(
            dimension_semantics=("parallel", "parallel"),
            vmem_limit_bytes=_VMEM_LIMIT),
        cost_estimate=pl.CostEstimate(
            flops=2 * B * Lout * K * Cs * cout_pad,
            transcendentals=0, bytes_accessed=bytes_accessed),
    )(*args)


def maxpool1d(x, *, kernel=3, stride=2, padding=1):
    """MaxPool1d(3, 2, 1) on (B, L, C) bf16 using the pairing trick (no 3x stack)."""
    assert stride == 2
    B, L, C = x.shape
    Lp = L + 2 * padding
    extra = Lp % 2
    xp = jnp.pad(x, ((0, 0), (padding, padding + extra), (0, 0)),
                 constant_values=-jnp.inf)
    rows = (Lp + extra) // 2
    xpair = xp.reshape(B, rows, 2 * C)                     # free reshape
    Lout = (Lp - kernel) // stride + 1
    taps = tuple((k // 2, (k % 2) * C) for k in range(kernel))
    return pl.pallas_call(
        functools.partial(_maxpool_kernel, taps=taps, c=C),
        out_shape=jax.ShapeDtypeStruct((B, Lout, C), x.dtype),
        grid=(B,),
        in_specs=[pl.BlockSpec((1, rows, 2 * C), lambda b: (b, 0, 0))],
        out_specs=pl.BlockSpec((1, Lout, C), lambda b: (b, 0, 0)),
        compiler_params=pltpu.CompilerParams(
            dimension_semantics=("parallel",),
            vmem_limit_bytes=_VMEM_LIMIT),
    )(xpair)


def avgpool_fc_softmax(x, fc_w, fc_b):
    """Fused AdaptiveAvgPool1d(1) + flatten + Linear + Softmax, tiled over batch.
    x: (B, Lf, C) bf16 (pad channels zero); fc_w: (ncls, Din); fc_b: (ncls,)."""
    B, Lf, C = x.shape
    ncls, din = fc_w.shape
    ncls_pad = _round_up(ncls, _LANE)
    w_t = jnp.transpose(fc_w).astype(jnp.float32)                  # (Din, ncls)
    w_t = jnp.pad(w_t, ((0, C - din), (0, ncls_pad - ncls)))
    # Pad-class logits get -1e30 bias so softmax ignores them exactly.
    bvec = jnp.pad(fc_b.astype(jnp.float32), (0, ncls_pad - ncls),
                   constant_values=-1e30).reshape(1, ncls_pad)
    out = pl.pallas_call(
        _head_kernel,
        out_shape=jax.ShapeDtypeStruct((B, 1, ncls_pad), jnp.float32),
        grid=(B,),
        in_specs=[pl.BlockSpec((1, Lf, C), lambda b: (b, 0, 0)),
                  pl.BlockSpec((C, ncls_pad), lambda b: (0, 0)),
                  pl.BlockSpec((1, ncls_pad), lambda b: (0, 0))],
        out_specs=pl.BlockSpec((1, 1, ncls_pad), lambda b: (b, 0, 0)),
        compiler_params=pltpu.CompilerParams(
            dimension_semantics=("parallel",),
            vmem_limit_bytes=_VMEM_LIMIT),
    )(x, w_t, bvec)
    return out[:, 0, :ncls]


def basic_block(x, blk, *, stride):
    """1-D BasicBlock: conv3-bn-relu, conv3-bn, (+downsample), add, relu."""
    residual = x
    out = conv1d_bn(x, blk['conv1_w'], blk['conv1_b'], blk['bn1'],
                    stride=stride, padding=1, relu=True)
    if blk['downsample'] is not None:
        ds = blk['downsample']
        residual = conv1d_bn(x, ds['w'], ds['b'], ds['bn'],
                             stride=stride, padding=0, relu=False)
    # conv2 + bn2 + residual add + ReLU fused in one kernel epilogue.
    return conv1d_bn(out, blk['conv2_w'], blk['conv2_b'], blk['bn2'],
                     stride=1, padding=1, relu=True, residual=residual)


def resnet1d_forward(params, x_ncl):
    """x_ncl: PyTorch-layout input (B, C_in, L)."""
    B, cin, L = x_ncl.shape
    cs = _round_up(cin, _LANE)
    # One-time glue: channels-last, bf16, channel-pad to 128 lanes.
    x = jnp.transpose(x_ncl, (0, 2, 1)).astype(jnp.bfloat16)
    x = jnp.pad(x, ((0, 0), (0, 0), (0, cs - cin)))
    x = conv1d_bn(x, params['conv1_w'], params['conv1_b'], params['bn1'],
                  stride=1, padding=1, relu=True)                 # (B, L, 128)
    x = maxpool1d(x)
    for li, blocks in enumerate(params['layers']):
        for bi, blk in enumerate(blocks):
            s = _LAYER_STRIDES[li] if bi == 0 else 1
            x = basic_block(x, blk, stride=s)
    return avgpool_fc_softmax(x, params['fc_w'], params['fc_b'])


# ---------------------------------------------------------------------------
# Pure-JAX f32 reference (mirrors the PyTorch module, eval mode)
# ---------------------------------------------------------------------------

def _ref_conv_bn(x, w, b, bn, stride, padding, relu):
    y = jax.lax.conv_general_dilated(
        x, w, window_strides=(stride,), padding=[(padding, padding)],
        dimension_numbers=('NCH', 'OIH', 'NCH'))
    y = y + b[None, :, None]
    gamma, beta, mean, var = bn
    y = ((y - mean[None, :, None]) * (gamma / jnp.sqrt(var + 1e-5))[None, :, None]
         + beta[None, :, None])
    if relu:
        y = jnp.maximum(y, 0.0)
    return y


def resnet1d_reference(params, x_ncl):
    x = x_ncl.astype(jnp.float32)
    x = _ref_conv_bn(x, params['conv1_w'], params['conv1_b'], params['bn1'], 1, 1, True)
    x = jax.lax.reduce_window(x, -jnp.inf, jax.lax.max,
                              (1, 1, 3), (1, 1, 2), [(0, 0), (0, 0), (1, 1)])
    for li, blocks in enumerate(params['layers']):
        for bi, blk in enumerate(blocks):
            s = _LAYER_STRIDES[li] if bi == 0 else 1
            residual = x
            out = _ref_conv_bn(x, blk['conv1_w'], blk['conv1_b'], blk['bn1'], s, 1, True)
            if blk['downsample'] is not None:
                ds = blk['downsample']
                residual = _ref_conv_bn(x, ds['w'], ds['b'], ds['bn'], s, 0, False)
            out = _ref_conv_bn(out, blk['conv2_w'], blk['conv2_b'], blk['bn2'], 1, 1, False)
            x = jnp.maximum(out + residual, 0.0)
    pooled = jnp.mean(x, axis=-1)
    logits = pooled @ params['fc_w'].T + params['fc_b']
    return jax.nn.softmax(logits, axis=-1)


# ---------------------------------------------------------------------------
# Deterministic parameter initialization (shapes follow the PyTorch module)
# ---------------------------------------------------------------------------

def _init_conv(key, cout, cin, k):
    k1, k2 = jax.random.split(key)
    bound = 1.0 / (cin * k) ** 0.5
    w = jax.random.uniform(k1, (cout, cin, k), jnp.float32, -bound, bound)
    b = jax.random.uniform(k2, (cout,), jnp.float32, -bound, bound)
    return w, b


def _init_bn(key, c):
    k1, k2, k3, k4 = jax.random.split(key, 4)
    gamma = 1.0 + 0.1 * jax.random.normal(k1, (c,), jnp.float32)
    beta = 0.1 * jax.random.normal(k2, (c,), jnp.float32)
    mean = 0.1 * jax.random.normal(k3, (c,), jnp.float32)
    var = 1.0 + 0.1 * jnp.abs(jax.random.normal(k4, (c,), jnp.float32))
    return (gamma, beta, mean, var)


def init_resnet1d_params(key, layers, num_classes=2, input_channels=1):
    keys = iter(jax.random.split(key, 64))
    p = {}
    p['conv1_w'], p['conv1_b'] = _init_conv(next(keys), 64, input_channels, 3)
    p['bn1'] = _init_bn(next(keys), 64)
    in_ch = 64
    p['layers'] = []
    for out_ch, nblocks, layer_stride in zip((64, 128, 256), layers, _LAYER_STRIDES):
        blocks = []
        for bi in range(nblocks):
            s = layer_stride if bi == 0 else 1
            blk = {}
            blk['conv1_w'], blk['conv1_b'] = _init_conv(next(keys), out_ch, in_ch, 3)
            blk['bn1'] = _init_bn(next(keys), out_ch)
            blk['conv2_w'], blk['conv2_b'] = _init_conv(next(keys), out_ch, out_ch, 3)
            blk['bn2'] = _init_bn(next(keys), out_ch)
            if s != 1 or in_ch != out_ch:
                ds = {}
                ds['w'], ds['b'] = _init_conv(next(keys), out_ch, in_ch, 1)
                ds['bn'] = _init_bn(next(keys), out_ch)
                blk['downsample'] = ds
            else:
                blk['downsample'] = None
            blocks.append(blk)
            in_ch = out_ch
        p['layers'].append(blocks)
    kw, kb = jax.random.split(next(keys))
    bound = 1.0 / 256.0 ** 0.5
    p['fc_w'] = jax.random.uniform(kw, (num_classes, 256), jnp.float32, -bound, bound)
    p['fc_b'] = jax.random.uniform(kb, (num_classes,), jnp.float32, -bound, bound)
    return p


# ---------------------------------------------------------------------------

if __name__ == "__main__":
    B, C_in, L = 2, 1, 16
    num_classes = 2
    x = jax.random.normal(jax.random.PRNGKey(0), (B, C_in, L), jnp.float32)
    params = init_resnet1d_params(jax.random.PRNGKey(1), layers=[2, 2, 2],
                                  num_classes=num_classes, input_channels=C_in)
    fwd = jax.jit(resnet1d_forward)
    out = jax.block_until_ready(fwd(params, x))
    assert out.shape == (B, num_classes)
    # softmax rows sum to 1
    assert bool(jnp.all(jnp.abs(jnp.sum(out, axis=1) - 1.0) < 1e-5))
    # loose check vs f32 reference (activations/weights are bf16 in the kernels)
    ref = resnet1d_reference(params, x)
    err = float(jnp.max(jnp.abs(out - ref)))
    assert err < 5e-2, f"mismatch vs f32 reference: max|diff|={err}"
    print("KERNEL_OK")
</pallas_src>

<mosaic_0001>
module attributes {stable_mosaic.version = 11 : i64} {
  func.func @_conv_bn_kernel(%arg0: i32, %arg1: i32, %arg2: memref<1x18x128xbf16, #tpu.memory_space<vmem>>, %arg3: memref<3x128x128xbf16, #tpu.memory_space<vmem>>, %arg4: memref<1x128xf32, #tpu.memory_space<vmem>>, %arg5: memref<1x16x128xbf16, #tpu.memory_space<vmem>>) attributes {dimension_semantics = [#tpu.dimension_semantics<parallel>, #tpu.dimension_semantics<parallel>], iteration_bounds = array<i64: 2, 1>, scalar_prefetch = 0 : i64, scratch_operands = 0 : i64, tpu.core_type = #tpu.core_type<tc>, window_params = [{transform_indices = @transform_0, window_bounds = array<i64: 1, 18, 128>}, {transform_indices = @transform_1, window_bounds = array<i64: 3, 128, 128>}, {transform_indices = @transform_2, window_bounds = array<i64: 1, 128>}, {transform_indices = @transform_3, window_bounds = array<i64: 1, 16, 128>}]} {
    %c0 = arith.constant 0 : index
    %c0_0 = arith.constant 0 : index
    %c0_1 = arith.constant 0 : index
    %0 = vector.load %arg2[%c0, %c0_0, %c0_1] : memref<1x18x128xbf16, #tpu.memory_space<vmem>>, vector<1x16x128xbf16>
    %1 = vector.shape_cast %0 : vector<1x16x128xbf16> to vector<16x128xbf16>
    %c0_2 = arith.constant 0 : index
    %c0_3 = arith.constant 0 : index
    %c0_4 = arith.constant 0 : index
    %2 = vector.load %arg3[%c0_2, %c0_3, %c0_4] : memref<3x128x128xbf16, #tpu.memory_space<vmem>>, vector<1x128x128xbf16>
    %3 = vector.shape_cast %2 : vector<1x128x128xbf16> to vector<128x128xbf16>
    %cst = arith.constant dense<0.000000e+00> : vector<16x128xf32>
    %4 = tpu.matmul %1, %3, %cst {dimension_numbers = #tpu.dot_dimension_numbers<[1], [0], [0], [1], [0, 0, 1, 1], [], []>} : vector<16x128xbf16>, vector<128x128xbf16>, vector<16x128xf32> -> vector<16x128xf32>
    %c0_5 = arith.constant 0 : index
    %c1 = arith.constant 1 : index
    %c0_6 = arith.constant 0 : index
    %5 = vector.load %arg2[%c0_5, %c1, %c0_6] : memref<1x18x128xbf16, #tpu.memory_space<vmem>>, vector<1x16x128xbf16>
    %6 = vector.shape_cast %5 : vector<1x16x128xbf16> to vector<16x128xbf16>
    %c1_7 = arith.constant 1 : index
    %c0_8 = arith.constant 0 : index
    %c0_9 = arith.constant 0 : index
    %7 = vector.load %arg3[%c1_7, %c0_8, %c0_9] : memref<3x128x128xbf16, #tpu.memory_space<vmem>>, vector<1x128x128xbf16>
    %8 = vector.shape_cast %7 : vector<1x128x128xbf16> to vector<128x128xbf16>
    %cst_10 = arith.constant dense<0.000000e+00> : vector<16x128xf32>
    %9 = tpu.matmul %6, %8, %cst_10 {dimension_numbers = #tpu.dot_dimension_numbers<[1], [0], [0], [1], [0, 0, 1, 1], [], []>} : vector<16x128xbf16>, vector<128x128xbf16>, vector<16x128xf32> -> vector<16x128xf32>
    %10 = arith.addf %4, %9 : vector<16x128xf32>
    %c0_11 = arith.constant 0 : index
    %c2 = arith.constant 2 : index
    %c0_12 = arith.constant 0 : index
    %11 = vector.load %arg2[%c0_11, %c2, %c0_12] : memref<1x18x128xbf16, #tpu.memory_space<vmem>>, vector<1x16x128xbf16>
    %12 = vector.shape_cast %11 : vector<1x16x128xbf16> to vector<16x128xbf16>
    %c2_13 = arith.constant 2 : index
    %c0_14 = arith.constant 0 : index
    %c0_15 = arith.constant 0 : index
    %13 = vector.load %arg3[%c2_13, %c0_14, %c0_15] : memref<3x128x128xbf16, #tpu.memory_space<vmem>>, vector<1x128x128xbf16>
    %14 = vector.shape_cast %13 : vector<1x128x128xbf16> to vector<128x128xbf16>
    %cst_16 = arith.constant dense<0.000000e+00> : vector<16x128xf32>
    %15 = tpu.matmul %12, %14, %cst_16 {dimension_numbers = #tpu.dot_dimension_numbers<[1], [0], [0], [1], [0, 0, 1, 1], [], []>} : vector<16x128xbf16>, vector<128x128xbf16>, vector<16x128xf32> -> vector<16x128xf32>
    %16 = arith.addf %10, %15 : vector<16x128xf32>
    %c0_17 = arith.constant 0 : index
    %c0_18 = arith.constant 0 : index
    %17 = vector.load %arg4[%c0_17, %c0_18] : memref<1x128xf32, #tpu.memory_space<vmem>>, vector<1x128xf32>
    %18 = vector.broadcast %17 : vector<1x128xf32> to vector<16x128xf32>
    %19 = arith.addf %16, %18 : vector<16x128xf32>
    %cst_19 = arith.constant 0.000000e+00 : f32
    %20 = vector.broadcast %cst_19 : f32 to vector<16x128xf32>
    %21 = arith.maximumf %19, %20 : vector<16x128xf32>
    %22 = arith.truncf %21 : vector<16x128xf32> to vector<16x128xbf16>
    %c0_20 = arith.constant 0 : index
    %c0_21 = arith.constant 0 : index
    %c0_22 = arith.constant 0 : index
    %23 = vector.load %arg5[%c0_20, %c0_21, %c0_22] : memref<1x16x128xbf16, #tpu.memory_space<vmem>>, vector<1x16x128xbf16>
    %24 = vector.shape_cast %23 : vector<1x16x128xbf16> to vector<16x128xbf16>
    %25 = vector.shape_cast %22 : vector<16x128xbf16> to vector<1x16x128xbf16>
    tpu.vector_store %arg5[%c0_20, %c0_21, %c0_22], %25 {strides = array<i32>} : memref<1x16x128xbf16, #tpu.memory_space<vmem>>, vector<1x16x128xbf16>,
    return
  }
  func.func @transform_0(%arg0: i32, %arg1: i32) -> (i32, i32, i32) {
    %c0_i32 = arith.constant 0 : i32
    %c0_i32_0 = arith.constant 0 : i32
    %c0_i32_1 = arith.constant 0 : i32
    return %arg0, %c0_i32, %c0_i32_0 : i32, i32, i32
  }
  func.func @transform_1(%arg0: i32, %arg1: i32) -> (i32, i32, i32) {
    %c0_i32 = arith.constant 0 : i32
    %c0_i32_0 = arith.constant 0 : i32
    %c0_i32_1 = arith.constant 0 : i32
    return %c0_i32, %c0_i32_0, %arg1 : i32, i32, i32
  }
  func.func @transform_2(%arg0: i32, %arg1: i32) -> (i32, i32) {
    %c0_i32 = arith.constant 0 : i32
    %c0_i32_0 = arith.constant 0 : i32
    return %c0_i32, %arg1 : i32, i32
  }
  func.func @transform_3(%arg0: i32, %arg1: i32) -> (i32, i32, i32) {
    %c0_i32 = arith.constant 0 : i32
    %c0_i32_0 = arith.constant 0 : i32
    return %arg0, %c0_i32, %arg1 : i32, i32, i32
  }
}

module attributes {stable_mosaic.version = 11 : i64} {
  func.func @_maxpool_kernel(%arg0: i32, %arg1: memref<1x9x256xbf16, #tpu.memory_space<vmem>>, %arg2: memref<1x8x128xbf16, #tpu.memory_space<vmem>>) attributes {dimension_semantics = [#tpu.dimension_semantics<parallel>], iteration_bounds = array<i64: 2>, scalar_prefetch = 0 : i64, scratch_operands = 0 : i64, tpu.core_type = #tpu.core_type<tc>, window_params = [{transform_indices = @transform_0, window_bounds = array<i64: 1, 9, 256>}, {transform_indices = @transform_1, window_bounds = array<i64: 1, 8, 128>}]} {
    %c0 = arith.constant 0 : index
    %c0_0 = arith.constant 0 : index
    %c0_1 = arith.constant 0 : index
    %0 = vector.load %arg1[%c0, %c0_0, %c0_1] : memref<1x9x256xbf16, #tpu.memory_space<vmem>>, vector<1x8x128xbf16>
    %1 = vector.shape_cast %0 : vector<1x8x128xbf16> to vector<8x128xbf16>
    %c0_2 = arith.constant 0 : index
    %c0_3 = arith.constant 0 : index
    %c128 = arith.constant 128 : index
    %2 = vector.load %arg1[%c0_2, %c0_3, %c128] : memref<1x9x256xbf16, #tpu.memory_space<vmem>>, vector<1x8x128xbf16>
    %3 = vector.shape_cast %2 : vector<1x8x128xbf16> to vector<8x128xbf16>
    %4 = arith.maximumf %1, %3 : vector<8x128xbf16>
    %c0_4 = arith.constant 0 : index
    %c1 = arith.constant 1 : index
    %c0_5 = arith.constant 0 : index
    %5 = vector.load %arg1[%c0_4, %c1, %c0_5] : memref<1x9x256xbf16, #tpu.memory_space<vmem>>, vector<1x8x128xbf16>
    %6 = vector.shape_cast %5 : vector<1x8x128xbf16> to vector<8x128xbf16>
    %7 = arith.maximumf %4, %6 : vector<8x128xbf16>
    %c0_6 = arith.constant 0 : index
    %c0_7 = arith.constant 0 : index
    %c0_8 = arith.constant 0 : index
    %8 = vector.load %arg2[%c0_6, %c0_7, %c0_8] : memref<1x8x128xbf16, #tpu.memory_space<vmem>>, vector<1x8x128xbf16>
    %9 = vector.shape_cast %8 : vector<1x8x128xbf16> to vector<8x128xbf16>
    %10 = vector.shape_cast %7 : vector<8x128xbf16> to vector<1x8x128xbf16>
    tpu.vector_store %arg2[%c0_6, %c0_7, %c0_8], %10 {strides = array<i32>} : memref<1x8x128xbf16, #tpu.memory_space<vmem>>, vector<1x8x128xbf16>,
    return
  }
  func.func @transform_0(%arg0: i32) -> (i32, i32, i32) {
    %c0_i32 = arith.constant 0 : i32
    %c0_i32_0 = arith.constant 0 : i32
    %c0_i32_1 = arith.constant 0 : i32
    return %arg0, %c0_i32, %c0_i32_0 : i32, i32, i32
  }
  func.func @transform_1(%arg0: i32) -> (i32, i32, i32) {
    %c0_i32 = arith.constant 0 : i32
    %c0_i32_0 = arith.constant 0 : i32
    %c0_i32_1 = arith.constant 0 : i32
    return %arg0, %c0_i32, %c0_i32_0 : i32, i32, i32
  }
}

module attributes {stable_mosaic.version = 11 : i64} {
  func.func @_conv_bn_kernel(%arg0: i32, %arg1: i32, %arg2: memref<1x10x128xbf16, #tpu.memory_space<vmem>>, %arg3: memref<3x128x128xbf16, #tpu.memory_space<vmem>>, %arg4: memref<1x128xf32, #tpu.memory_space<vmem>>, %arg5: memref<1x8x128xbf16, #tpu.memory_space<vmem>>) attributes {dimension_semantics = [#tpu.dimension_semantics<parallel>, #tpu.dimension_semantics<parallel>], iteration_bounds = array<i64: 2, 1>, scalar_prefetch = 0 : i64, scratch_operands = 0 : i64, tpu.core_type = #tpu.core_type<tc>, window_params = [{transform_indices = @transform_0, window_bounds = array<i64: 1, 10, 128>}, {transform_indices = @transform_1, window_bounds = array<i64: 3, 128, 128>}, {transform_indices = @transform_2, window_bounds = array<i64: 1, 128>}, {transform_indices = @transform_3, window_bounds = array<i64: 1, 8, 128>}]} {
    %c0 = arith.constant 0 : index
    %c0_0 = arith.constant 0 : index
    %c0_1 = arith.constant 0 : index
    %0 = vector.load %arg2[%c0, %c0_0, %c0_1] : memref<1x10x128xbf16, #tpu.memory_space<vmem>>, vector<1x8x128xbf16>
    %1 = vector.shape_cast %0 : vector<1x8x128xbf16> to vector<8x128xbf16>
    %c0_2 = arith.constant 0 : index
    %c0_3 = arith.constant 0 : index
    %c0_4 = arith.constant 0 : index
    %2 = vector.load %arg3[%c0_2, %c0_3, %c0_4] : memref<3x128x128xbf16, #tpu.memory_space<vmem>>, vector<1x128x128xbf16>
    %3 = vector.shape_cast %2 : vector<1x128x128xbf16> to vector<128x128xbf16>
    %cst = arith.constant dense<0.000000e+00> : vector<8x128xf32>
    %4 = tpu.matmul %1, %3, %cst {dimension_numbers = #tpu.dot_dimension_numbers<[1], [0], [0], [1], [0, 0, 1, 1], [], []>} : vector<8x128xbf16>, vector<128x128xbf16>, vector<8x128xf32> -> vector<8x128xf32>
    %c0_5 = arith.constant 0 : index
    %c1 = arith.constant 1 : index
    %c0_6 = arith.constant 0 : index
    %5 = vector.load %arg2[%c0_5, %c1, %c0_6] : memref<1x10x128xbf16, #tpu.memory_space<vmem>>, vector<1x8x128xbf16>
    %6 = vector.shape_cast %5 : vector<1x8x128xbf16> to vector<8x128xbf16>
    %c1_7 = arith.constant 1 : index
    %c0_8 = arith.constant 0 : index
    %c0_9 = arith.constant 0 : index
    %7 = vector.load %arg3[%c1_7, %c0_8, %c0_9] : memref<3x128x128xbf16, #tpu.memory_space<vmem>>, vector<1x128x128xbf16>
    %8 = vector.shape_cast %7 : vector<1x128x128xbf16> to vector<128x128xbf16>
    %cst_10 = arith.constant dense<0.000000e+00> : vector<8x128xf32>
    %9 = tpu.matmul %6, %8, %cst_10 {dimension_numbers = #tpu.dot_dimension_numbers<[1], [0], [0], [1], [0, 0, 1, 1], [], []>} : vector<8x128xbf16>, vector<128x128xbf16>, vector<8x128xf32> -> vector<8x128xf32>
    %10 = arith.addf %4, %9 : vector<8x128xf32>
    %c0_11 = arith.constant 0 : index
    %c2 = arith.constant 2 : index
    %c0_12 = arith.constant 0 : index
    %11 = vector.load %arg2[%c0_11, %c2, %c0_12] : memref<1x10x128xbf16, #tpu.memory_space<vmem>>, vector<1x8x128xbf16>
    %12 = vector.shape_cast %11 : vector<1x8x128xbf16> to vector<8x128xbf16>
    %c2_13 = arith.constant 2 : index
    %c0_14 = arith.constant 0 : index
    %c0_15 = arith.constant 0 : index
    %13 = vector.load %arg3[%c2_13, %c0_14, %c0_15] : memref<3x128x128xbf16, #tpu.memory_space<vmem>>, vector<1x128x128xbf16>
    %14 = vector.shape_cast %13 : vector<1x128x128xbf16> to vector<128x128xbf16>
    %cst_16 = arith.constant dense<0.000000e+00> : vector<8x128xf32>
    %15 = tpu.matmul %12, %14, %cst_16 {dimension_numbers = #tpu.dot_dimension_numbers<[1], [0], [0], [1], [0, 0, 1, 1], [], []>} : vector<8x128xbf16>, vector<128x128xbf16>, vector<8x128xf32> -> vector<8x128xf32>
    %16 = arith.addf %10, %15 : vector<8x128xf32>
    %c0_17 = arith.constant 0 : index
    %c0_18 = arith.constant 0 : index
    %17 = vector.load %arg4[%c0_17, %c0_18] : memref<1x128xf32, #tpu.memory_space<vmem>>, vector<1x128xf32>
    %18 = vector.broadcast %17 : vector<1x128xf32> to vector<8x128xf32>
    %19 = arith.addf %16, %18 : vector<8x128xf32>
    %cst_19 = arith.constant 0.000000e+00 : f32
    %20 = vector.broadcast %cst_19 : f32 to vector<8x128xf32>
    %21 = arith.maximumf %19, %20 : vector<8x128xf32>
    %22 = arith.truncf %21 : vector<8x128xf32> to vector<8x128xbf16>
    %c0_20 = arith.constant 0 : index
    %c0_21 = arith.constant 0 : index
    %c0_22 = arith.constant 0 : index
    %23 = vector.load %arg5[%c0_20, %c0_21, %c0_22] : memref<1x8x128xbf16, #tpu.memory_space<vmem>>, vector<1x8x128xbf16>
    %24 = vector.shape_cast %23 : vector<1x8x128xbf16> to vector<8x128xbf16>
    %25 = vector.shape_cast %22 : vector<8x128xbf16> to vector<1x8x128xbf16>
    tpu.vector_store %arg5[%c0_20, %c0_21, %c0_22], %25 {strides = array<i32>} : memref<1x8x128xbf16, #tpu.memory_space<vmem>>, vector<1x8x128xbf16>,
    return
  }
  func.func @transform_0(%arg0: i32, %arg1: i32) -> (i32, i32, i32) {
    %c0_i32 = arith.constant 0 : i32
    %c0_i32_0 = arith.constant 0 : i32
    %c0_i32_1 = arith.constant 0 : i32
    return %arg0, %c0_i32, %c0_i32_0 : i32, i32, i32
  }
  func.func @transform_1(%arg0: i32, %arg1: i32) -> (i32, i32, i32) {
    %c0_i32 = arith.constant 0 : i32
    %c0_i32_0 = arith.constant 0 : i32
    %c0_i32_1 = arith.constant 0 : i32
    return %c0_i32, %c0_i32_0, %arg1 : i32, i32, i32
  }
  func.func @transform_2(%arg0: i32, %arg1: i32) -> (i32, i32) {
    %c0_i32 = arith.constant 0 : i32
    %c0_i32_0 = arith.constant 0 : i32
    return %c0_i32, %arg1 : i32, i32
  }
  func.func @transform_3(%arg0: i32, %arg1: i32) -> (i32, i32, i32) {
    %c0_i32 = arith.constant 0 : i32
    %c0_i32_0 = arith.constant 0 : i32
    return %arg0, %c0_i32, %arg1 : i32, i32, i32
  }
}

module attributes {stable_mosaic.version = 11 : i64} {
  func.func @_conv_bn_kernel(%arg0: i32, %arg1: i32, %arg2: memref<1x10x128xbf16, #tpu.memory_space<vmem>>, %arg3: memref<3x128x128xbf16, #tpu.memory_space<vmem>>, %arg4: memref<1x128xf32, #tpu.memory_space<vmem>>, %arg5: memref<1x8x128xbf16, #tpu.memory_space<vmem>>, %arg6: memref<1x8x128xbf16, #tpu.memory_space<vmem>>) attributes {dimension_semantics = [#tpu.dimension_semantics<parallel>, #tpu.dimension_semantics<parallel>], iteration_bounds = array<i64: 2, 1>, scalar_prefetch = 0 : i64, scratch_operands = 0 : i64, tpu.core_type = #tpu.core_type<tc>, window_params = [{transform_indices = @transform_0, window_bounds = array<i64: 1, 10, 128>}, {transform_indices = @transform_1, window_bounds = array<i64: 3, 128, 128>}, {transform_indices = @transform_2, window_bounds = array<i64: 1, 128>}, {transform_indices = @transform_3, window_bounds = array<i64: 1, 8, 128>}, {transform_indices = @transform_4, window_bounds = array<i64: 1, 8, 128>}]} {
    %c0 = arith.constant 0 : index
    %c0_0 = arith.constant 0 : index
    %c0_1 = arith.constant 0 : index
    %0 = vector.load %arg2[%c0, %c0_0, %c0_1] : memref<1x10x128xbf16, #tpu.memory_space<vmem>>, vector<1x8x128xbf16>
    %1 = vector.shape_cast %0 : vector<1x8x128xbf16> to vector<8x128xbf16>
    %c0_2 = arith.constant 0 : index
    %c0_3 = arith.constant 0 : index
    %c0_4 = arith.constant 0 : index
    %2 = vector.load %arg3[%c0_2, %c0_3, %c0_4] : memref<3x128x128xbf16, #tpu.memory_space<vmem>>, vector<1x128x128xbf16>
    %3 = vector.shape_cast %2 : vector<1x128x128xbf16> to vector<128x128xbf16>
    %cst = arith.constant dense<0.000000e+00> : vector<8x128xf32>
    %4 = tpu.matmul %1, %3, %cst {dimension_numbers = #tpu.dot_dimension_numbers<[1], [0], [0], [1], [0, 0, 1, 1], [], []>} : vector<8x128xbf16>, vector<128x128xbf16>, vector<8x128xf32> -> vector<8x128xf32>
    %c0_5 = arith.constant 0 : index
    %c1 = arith.constant 1 : index
    %c0_6 = arith.constant 0 : index
    %5 = vector.load %arg2[%c0_5, %c1, %c0_6] : memref<1x10x128xbf16, #tpu.memory_space<vmem>>, vector<1x8x128xbf16>
    %6 = vector.shape_cast %5 : vector<1x8x128xbf16> to vector<8x128xbf16>
    %c1_7 = arith.constant 1 : index
    %c0_8 = arith.constant 0 : index
    %c0_9 = arith.constant 0 : index
    %7 = vector.load %arg3[%c1_7, %c0_8, %c0_9] : memref<3x128x128xbf16, #tpu.memory_space<vmem>>, vector<1x128x128xbf16>
    %8 = vector.shape_cast %7 : vector<1x128x128xbf16> to vector<128x128xbf16>
    %cst_10 = arith.constant dense<0.000000e+00> : vector<8x128xf32>
    %9 = tpu.matmul %6, %8, %cst_10 {dimension_numbers = #tpu.dot_dimension_numbers<[1], [0], [0], [1], [0, 0, 1, 1], [], []>} : vector<8x128xbf16>, vector<128x128xbf16>, vector<8x128xf32> -> vector<8x128xf32>
    %10 = arith.addf %4, %9 : vector<8x128xf32>
    %c0_11 = arith.constant 0 : index
    %c2 = arith.constant 2 : index
    %c0_12 = arith.constant 0 : index
    %11 = vector.load %arg2[%c0_11, %c2, %c0_12] : memref<1x10x128xbf16, #tpu.memory_space<vmem>>, vector<1x8x128xbf16>
    %12 = vector.shape_cast %11 : vector<1x8x128xbf16> to vector<8x128xbf16>
    %c2_13 = arith.constant 2 : index
    %c0_14 = arith.constant 0 : index
    %c0_15 = arith.constant 0 : index
    %13 = vector.load %arg3[%c2_13, %c0_14, %c0_15] : memref<3x128x128xbf16, #tpu.memory_space<vmem>>, vector<1x128x128xbf16>
    %14 = vector.shape_cast %13 : vector<1x128x128xbf16> to vector<128x128xbf16>
    %cst_16 = arith.constant dense<0.000000e+00> : vector<8x128xf32>
    %15 = tpu.matmul %12, %14, %cst_16 {dimension_numbers = #tpu.dot_dimension_numbers<[1], [0], [0], [1], [0, 0, 1, 1], [], []>} : vector<8x128xbf16>, vector<128x128xbf16>, vector<8x128xf32> -> vector<8x128xf32>
    %16 = arith.addf %10, %15 : vector<8x128xf32>
    %c0_17 = arith.constant 0 : index
    %c0_18 = arith.constant 0 : index
    %17 = vector.load %arg4[%c0_17, %c0_18] : memref<1x128xf32, #tpu.memory_space<vmem>>, vector<1x128xf32>
    %18 = vector.broadcast %17 : vector<1x128xf32> to vector<8x128xf32>
    %19 = arith.addf %16, %18 : vector<8x128xf32>
    %c0_19 = arith.constant 0 : index
    %c0_20 = arith.constant 0 : index
    %c0_21 = arith.constant 0 : index
    %20 = vector.load %arg5[%c0_19, %c0_20, %c0_21] : memref<1x8x128xbf16, #tpu.memory_space<vmem>>, vector<1x8x128xbf16>
    %21 = vector.shape_cast %20 : vector<1x8x128xbf16> to vector<8x128xbf16>
    %22 = arith.extf %21 : vector<8x128xbf16> to vector<8x128xf32>
    %23 = arith.addf %19, %22 : vector<8x128xf32>
    %cst_22 = arith.constant 0.000000e+00 : f32
    %24 = vector.broadcast %cst_22 : f32 to vector<8x128xf32>
    %25 = arith.maximumf %23, %24 : vector<8x128xf32>
    %26 = arith.truncf %25 : vector<8x128xf32> to vector<8x128xbf16>
    %c0_23 = arith.constant 0 : index
    %c0_24 = arith.constant 0 : index
    %c0_25 = arith.constant 0 : index
    %27 = vector.load %arg6[%c0_23, %c0_24, %c0_25] : memref<1x8x128xbf16, #tpu.memory_space<vmem>>, vector<1x8x128xbf16>
    %28 = vector.shape_cast %27 : vector<1x8x128xbf16> to vector<8x128xbf16>
    %29 = vector.shape_cast %26 : vector<8x128xbf16> to vector<1x8x128xbf16>
    tpu.vector_store %arg6[%c0_23, %c0_24, %c0_25], %29 {strides = array<i32>} : memref<1x8x128xbf16, #tpu.memory_space<vmem>>, vector<1x8x128xbf16>,
    return
  }
  func.func @transform_0(%arg0: i32, %arg1: i32) -> (i32, i32, i32) {
    %c0_i32 = arith.constant 0 : i32
    %c0_i32_0 = arith.constant 0 : i32
    %c0_i32_1 = arith.constant 0 : i32
    return %arg0, %c0_i32, %c0_i32_0 : i32, i32, i32
  }
  func.func @transform_1(%arg0: i32, %arg1: i32) -> (i32, i32, i32) {
    %c0_i32 = arith.constant 0 : i32
    %c0_i32_0 = arith.constant 0 : i32
    %c0_i32_1 = arith.constant 0 : i32
    return %c0_i32, %c0_i32_0, %arg1 : i32, i32, i32
  }
  func.func @transform_2(%arg0: i32, %arg1: i32) -> (i32, i32) {
    %c0_i32 = arith.constant 0 : i32
    %c0_i32_0 = arith.constant 0 : i32
    return %c0_i32, %arg1 : i32, i32
  }
  func.func @transform_3(%arg0: i32, %arg1: i32) -> (i32, i32, i32) {
    %c0_i32 = arith.constant 0 : i32
    %c0_i32_0 = arith.constant 0 : i32
    return %arg0, %c0_i32, %arg1 : i32, i32, i32
  }
  func.func @transform_4(%arg0: i32, %arg1: i32) -> (i32, i32, i32) {
    %c0_i32 = arith.constant 0 : i32
    %c0_i32_0 = arith.constant 0 : i32
    return %arg0, %c0_i32, %arg1 : i32, i32, i32
  }
}

module attributes {stable_mosaic.version = 11 : i64} {
  func.func @_conv_bn_kernel(%arg0: i32, %arg1: i32, %arg2: memref<1x5x256xbf16, #tpu.memory_space<vmem>>, %arg3: memref<3x128x128xbf16, #tpu.memory_space<vmem>>, %arg4: memref<1x128xf32, #tpu.memory_space<vmem>>, %arg5: memref<1x4x128xbf16, #tpu.memory_space<vmem>>) attributes {dimension_semantics = [#tpu.dimension_semantics<parallel>, #tpu.dimension_semantics<parallel>], iteration_bounds = array<i64: 2, 1>, scalar_prefetch = 0 : i64, scratch_operands = 0 : i64, tpu.core_type = #tpu.core_type<tc>, window_params = [{transform_indices = @transform_0, window_bounds = array<i64: 1, 5, 256>}, {transform_indices = @transform_1, window_bounds = array<i64: 3, 128, 128>}, {transform_indices = @transform_2, window_bounds = array<i64: 1, 128>}, {transform_indices = @transform_3, window_bounds = array<i64: 1, 4, 128>}]} {
    %c0 = arith.constant 0 : index
    %c0_0 = arith.constant 0 : index
    %c0_1 = arith.constant 0 : index
    %0 = vector.load %arg2[%c0, %c0_0, %c0_1] : memref<1x5x256xbf16, #tpu.memory_space<vmem>>, vector<1x4x128xbf16>
    %1 = vector.shape_cast %0 : vector<1x4x128xbf16> to vector<4x128xbf16>
    %c0_2 = arith.constant 0 : index
    %c0_3 = arith.constant 0 : index
    %c0_4 = arith.constant 0 : index
    %2 = vector.load %arg3[%c0_2, %c0_3, %c0_4] : memref<3x128x128xbf16, #tpu.memory_space<vmem>>, vector<1x128x128xbf16>
    %3 = vector.shape_cast %2 : vector<1x128x128xbf16> to vector<128x128xbf16>
    %cst = arith.constant dense<0.000000e+00> : vector<4x128xf32>
    %4 = tpu.matmul %1, %3, %cst {dimension_numbers = #tpu.dot_dimension_numbers<[1], [0], [0], [1], [0, 0, 1, 1], [], []>} : vector<4x128xbf16>, vector<128x128xbf16>, vector<4x128xf32> -> vector<4x128xf32>
    %c0_5 = arith.constant 0 : index
    %c0_6 = arith.constant 0 : index
    %c128 = arith.constant 128 : index
    %5 = vector.load %arg2[%c0_5, %c0_6, %c128] : memref<1x5x256xbf16, #tpu.memory_space<vmem>>, vector<1x4x128xbf16>
    %6 = vector.shape_cast %5 : vector<1x4x128xbf16> to vector<4x128xbf16>
    %c1 = arith.constant 1 : index
    %c0_7 = arith.constant 0 : index
    %c0_8 = arith.constant 0 : index
    %7 = vector.load %arg3[%c1, %c0_7, %c0_8] : memref<3x128x128xbf16, #tpu.memory_space<vmem>>, vector<1x128x128xbf16>
    %8 = vector.shape_cast %7 : vector<1x128x128xbf16> to vector<128x128xbf16>
    %cst_9 = arith.constant dense<0.000000e+00> : vector<4x128xf32>
    %9 = tpu.matmul %6, %8, %cst_9 {dimension_numbers = #tpu.dot_dimension_numbers<[1], [0], [0], [1], [0, 0, 1, 1], [], []>} : vector<4x128xbf16>, vector<128x128xbf16>, vector<4x128xf32> -> vector<4x128xf32>
    %10 = arith.addf %4, %9 : vector<4x128xf32>
    %c0_10 = arith.constant 0 : index
    %c1_11 = arith.constant 1 : index
    %c0_12 = arith.constant 0 : index
    %11 = vector.load %arg2[%c0_10, %c1_11, %c0_12] : memref<1x5x256xbf16, #tpu.memory_space<vmem>>, vector<1x4x128xbf16>
    %12 = vector.shape_cast %11 : vector<1x4x128xbf16> to vector<4x128xbf16>
    %c2 = arith.constant 2 : index
    %c0_13 = arith.constant 0 : index
    %c0_14 = arith.constant 0 : index
    %13 = vector.load %arg3[%c2, %c0_13, %c0_14] : memref<3x128x128xbf16, #tpu.memory_space<vmem>>, vector<1x128x128xbf16>
    %14 = vector.shape_cast %13 : vector<1x128x128xbf16> to vector<128x128xbf16>
    %cst_15 = arith.constant dense<0.000000e+00> : vector<4x128xf32>
    %15 = tpu.matmul %12, %14, %cst_15 {dimension_numbers = #tpu.dot_dimension_numbers<[1], [0], [0], [1], [0, 0, 1, 1], [], []>} : vector<4x128xbf16>, vector<128x128xbf16>, vector<4x128xf32> -> vector<4x128xf32>
    %16 = arith.addf %10, %15 : vector<4x128xf32>
    %c0_16 = arith.constant 0 : index
    %c0_17 = arith.constant 0 : index
    %17 = vector.load %arg4[%c0_16, %c0_17] : memref<1x128xf32, #tpu.memory_space<vmem>>, vector<1x128xf32>
    %18 = vector.broadcast %17 : vector<1x128xf32> to vector<4x128xf32>
    %19 = arith.addf %16, %18 : vector<4x128xf32>
    %cst_18 = arith.constant 0.000000e+00 : f32
    %20 = vector.broadcast %cst_18 : f32 to vector<4x128xf32>
    %21 = arith.maximumf %19, %20 : vector<4x128xf32>
    %22 = arith.truncf %21 : vector<4x128xf32> to vector<4x128xbf16>
    %c0_19 = arith.constant 0 : index
    %c0_20 = arith.constant 0 : index
    %c0_21 = arith.constant 0 : index
    %23 = vector.load %arg5[%c0_19, %c0_20, %c0_21] : memref<1x4x128xbf16, #tpu.memory_space<vmem>>, vector<1x4x128xbf16>
    %24 = vector.shape_cast %23 : vector<1x4x128xbf16> to vector<4x128xbf16>
    %25 = vector.shape_cast %22 : vector<4x128xbf16> to vector<1x4x128xbf16>
    tpu.vector_store %arg5[%c0_19, %c0_20, %c0_21], %25 {strides = array<i32>} : memref<1x4x128xbf16, #tpu.memory_space<vmem>>, vector<1x4x128xbf16>,
    return
  }
  func.func @transform_0(%arg0: i32, %arg1: i32) -> (i32, i32, i32) {
    %c0_i32 = arith.constant 0 : i32
    %c0_i32_0 = arith.constant 0 : i32
    %c0_i32_1 = arith.constant 0 : i32
    return %arg0, %c0_i32, %c0_i32_0 : i32, i32, i32
  }
  func.func @transform_1(%arg0: i32, %arg1: i32) -> (i32, i32, i32) {
    %c0_i32 = arith.constant 0 : i32
    %c0_i32_0 = arith.constant 0 : i32
    %c0_i32_1 = arith.constant 0 : i32
    return %c0_i32, %c0_i32_0, %arg1 : i32, i32, i32
  }
  func.func @transform_2(%arg0: i32, %arg1: i32) -> (i32, i32) {
    %c0_i32 = arith.constant 0 : i32
    %c0_i32_0 = arith.constant 0 : i32
    return %c0_i32, %arg1 : i32, i32
  }
  func.func @transform_3(%arg0: i32, %arg1: i32) -> (i32, i32, i32) {
    %c0_i32 = arith.constant 0 : i32
    %c0_i32_0 = arith.constant 0 : i32
    return %arg0, %c0_i32, %arg1 : i32, i32, i32
  }
}

module attributes {stable_mosaic.version = 11 : i64} {
  func.func @_conv_bn_kernel(%arg0: i32, %arg1: i32, %arg2: memref<1x4x256xbf16, #tpu.memory_space<vmem>>, %arg3: memref<1x128x128xbf16, #tpu.memory_space<vmem>>, %arg4: memref<1x128xf32, #tpu.memory_space<vmem>>, %arg5: memref<1x4x128xbf16, #tpu.memory_space<vmem>>) attributes {dimension_semantics = [#tpu.dimension_semantics<parallel>, #tpu.dimension_semantics<parallel>], iteration_bounds = array<i64: 2, 1>, scalar_prefetch = 0 : i64, scratch_operands = 0 : i64, tpu.core_type = #tpu.core_type<tc>, window_params = [{transform_indices = @transform_0, window_bounds = array<i64: 1, 4, 256>}, {transform_indices = @transform_1, window_bounds = array<i64: 1, 128, 128>}, {transform_indices = @transform_2, window_bounds = array<i64: 1, 128>}, {transform_indices = @transform_3, window_bounds = array<i64: 1, 4, 128>}]} {
    %c0 = arith.constant 0 : index
    %c0_0 = arith.constant 0 : index
    %c0_1 = arith.constant 0 : index
    %0 = vector.load %arg2[%c0, %c0_0, %c0_1] : memref<1x4x256xbf16, #tpu.memory_space<vmem>>, vector<1x4x128xbf16>
    %1 = vector.shape_cast %0 : vector<1x4x128xbf16> to vector<4x128xbf16>
    %c0_2 = arith.constant 0 : index
    %c0_3 = arith.constant 0 : index
    %c0_4 = arith.constant 0 : index
    %2 = vector.load %arg3[%c0_2, %c0_3, %c0_4] : memref<1x128x128xbf16, #tpu.memory_space<vmem>>, vector<1x128x128xbf16>
    %3 = vector.shape_cast %2 : vector<1x128x128xbf16> to vector<128x128xbf16>
    %cst = arith.constant dense<0.000000e+00> : vector<4x128xf32>
    %4 = tpu.matmul %1, %3, %cst {dimension_numbers = #tpu.dot_dimension_numbers<[1], [0], [0], [1], [0, 0, 1, 1], [], []>} : vector<4x128xbf16>, vector<128x128xbf16>, vector<4x128xf32> -> vector<4x128xf32>
    %c0_5 = arith.constant 0 : index
    %c0_6 = arith.constant 0 : index
    %5 = vector.load %arg4[%c0_5, %c0_6] : memref<1x128xf32, #tpu.memory_space<vmem>>, vector<1x128xf32>
    %6 = vector.broadcast %5 : vector<1x128xf32> to vector<4x128xf32>
    %7 = arith.addf %4, %6 : vector<4x128xf32>
    %8 = arith.truncf %7 : vector<4x128xf32> to vector<4x128xbf16>
    %c0_7 = arith.constant 0 : index
    %c0_8 = arith.constant 0 : index
    %c0_9 = arith.constant 0 : index
    %9 = vector.load %arg5[%c0_7, %c0_8, %c0_9] : memref<1x4x128xbf16, #tpu.memory_space<vmem>>, vector<1x4x128xbf16>
    %10 = vector.shape_cast %9 : vector<1x4x128xbf16> to vector<4x128xbf16>
    %11 = vector.shape_cast %8 : vector<4x128xbf16> to vector<1x4x128xbf16>
    tpu.vector_store %arg5[%c0_7, %c0_8, %c0_9], %11 {strides = array<i32>} : memref<1x4x128xbf16, #tpu.memory_space<vmem>>, vector<1x4x128xbf16>,
    return
  }
  func.func @transform_0(%arg0: i32, %arg1: i32) -> (i32, i32, i32) {
    %c0_i32 = arith.constant 0 : i32
    %c0_i32_0 = arith.constant 0 : i32
    %c0_i32_1 = arith.constant 0 : i32
    return %arg0, %c0_i32, %c0_i32_0 : i32, i32, i32
  }
  func.func @transform_1(%arg0: i32, %arg1: i32) -> (i32, i32, i32) {
    %c0_i32 = arith.constant 0 : i32
    %c0_i32_0 = arith.constant 0 : i32
    %c0_i32_1 = arith.constant 0 : i32
    return %c0_i32, %c0_i32_0, %arg1 : i32, i32, i32
  }
  func.func @transform_2(%arg0: i32, %arg1: i32) -> (i32, i32) {
    %c0_i32 = arith.constant 0 : i32
    %c0_i32_0 = arith.constant 0 : i32
    return %c0_i32, %arg1 : i32, i32
  }
  func.func @transform_3(%arg0: i32, %arg1: i32) -> (i32, i32, i32) {
    %c0_i32 = arith.constant 0 : i32
    %c0_i32_0 = arith.constant 0 : i32
    return %arg0, %c0_i32, %arg1 : i32, i32, i32
  }
}

module attributes {stable_mosaic.version = 11 : i64} {
  func.func @_conv_bn_kernel(%arg0: i32, %arg1: i32, %arg2: memref<1x6x128xbf16, #tpu.memory_space<vmem>>, %arg3: memref<3x128x128xbf16, #tpu.memory_space<vmem>>, %arg4: memref<1x128xf32, #tpu.memory_space<vmem>>, %arg5: memref<1x4x128xbf16, #tpu.memory_space<vmem>>, %arg6: memref<1x4x128xbf16, #tpu.memory_space<vmem>>) attributes {dimension_semantics = [#tpu.dimension_semantics<parallel>, #tpu.dimension_semantics<parallel>], iteration_bounds = array<i64: 2, 1>, scalar_prefetch = 0 : i64, scratch_operands = 0 : i64, tpu.core_type = #tpu.core_type<tc>, window_params = [{transform_indices = @transform_0, window_bounds = array<i64: 1, 6, 128>}, {transform_indices = @transform_1, window_bounds = array<i64: 3, 128, 128>}, {transform_indices = @transform_2, window_bounds = array<i64: 1, 128>}, {transform_indices = @transform_3, window_bounds = array<i64: 1, 4, 128>}, {transform_indices = @transform_4, window_bounds = array<i64: 1, 4, 128>}]} {
    %c0 = arith.constant 0 : index
    %c0_0 = arith.constant 0 : index
    %c0_1 = arith.constant 0 : index
    %0 = vector.load %arg2[%c0, %c0_0, %c0_1] : memref<1x6x128xbf16, #tpu.memory_space<vmem>>, vector<1x4x128xbf16>
    %1 = vector.shape_cast %0 : vector<1x4x128xbf16> to vector<4x128xbf16>
    %c0_2 = arith.constant 0 : index
    %c0_3 = arith.constant 0 : index
    %c0_4 = arith.constant 0 : index
    %2 = vector.load %arg3[%c0_2, %c0_3, %c0_4] : memref<3x128x128xbf16, #tpu.memory_space<vmem>>, vector<1x128x128xbf16>
    %3 = vector.shape_cast %2 : vector<1x128x128xbf16> to vector<128x128xbf16>
    %cst = arith.constant dense<0.000000e+00> : vector<4x128xf32>
    %4 = tpu.matmul %1, %3, %cst {dimension_numbers = #tpu.dot_dimension_numbers<[1], [0], [0], [1], [0, 0, 1, 1], [], []>} : vector<4x128xbf16>, vector<128x128xbf16>, vector<4x128xf32> -> vector<4x128xf32>
    %c0_5 = arith.constant 0 : index
    %c1 = arith.constant 1 : index
    %c0_6 = arith.constant 0 : index
    %5 = vector.load %arg2[%c0_5, %c1, %c0_6] : memref<1x6x128xbf16, #tpu.memory_space<vmem>>, vector<1x4x128xbf16>
    %6 = vector.shape_cast %5 : vector<1x4x128xbf16> to vector<4x128xbf16>
    %c1_7 = arith.constant 1 : index
    %c0_8 = arith.constant 0 : index
    %c0_9 = arith.constant 0 : index
    %7 = vector.load %arg3[%c1_7, %c0_8, %c0_9] : memref<3x128x128xbf16, #tpu.memory_space<vmem>>, vector<1x128x128xbf16>
    %8 = vector.shape_cast %7 : vector<1x128x128xbf16> to vector<128x128xbf16>
    %cst_10 = arith.constant dense<0.000000e+00> : vector<4x128xf32>
    %9 = tpu.matmul %6, %8, %cst_10 {dimension_numbers = #tpu.dot_dimension_numbers<[1], [0], [0], [1], [0, 0, 1, 1], [], []>} : vector<4x128xbf16>, vector<128x128xbf16>, vector<4x128xf32> -> vector<4x128xf32>
    %10 = arith.addf %4, %9 : vector<4x128xf32>
    %c0_11 = arith.constant 0 : index
    %c2 = arith.constant 2 : index
    %c0_12 = arith.constant 0 : index
    %11 = vector.load %arg2[%c0_11, %c2, %c0_12] : memref<1x6x128xbf16, #tpu.memory_space<vmem>>, vector<1x4x128xbf16>
    %12 = vector.shape_cast %11 : vector<1x4x128xbf16> to vector<4x128xbf16>
    %c2_13 = arith.constant 2 : index
    %c0_14 = arith.constant 0 : index
    %c0_15 = arith.constant 0 : index
    %13 = vector.load %arg3[%c2_13, %c0_14, %c0_15] : memref<3x128x128xbf16, #tpu.memory_space<vmem>>, vector<1x128x128xbf16>
    %14 = vector.shape_cast %13 : vector<1x128x128xbf16> to vector<128x128xbf16>
    %cst_16 = arith.constant dense<0.000000e+00> : vector<4x128xf32>
    %15 = tpu.matmul %12, %14, %cst_16 {dimension_numbers = #tpu.dot_dimension_numbers<[1], [0], [0], [1], [0, 0, 1, 1], [], []>} : vector<4x128xbf16>, vector<128x128xbf16>, vector<4x128xf32> -> vector<4x128xf32>
    %16 = arith.addf %10, %15 : vector<4x128xf32>
    %c0_17 = arith.constant 0 : index
    %c0_18 = arith.constant 0 : index
    %17 = vector.load %arg4[%c0_17, %c0_18] : memref<1x128xf32, #tpu.memory_space<vmem>>, vector<1x128xf32>
    %18 = vector.broadcast %17 : vector<1x128xf32> to vector<4x128xf32>
    %19 = arith.addf %16, %18 : vector<4x128xf32>
    %c0_19 = arith.constant 0 : index
    %c0_20 = arith.constant 0 : index
    %c0_21 = arith.constant 0 : index
    %20 = vector.load %arg5[%c0_19, %c0_20, %c0_21] : memref<1x4x128xbf16, #tpu.memory_space<vmem>>, vector<1x4x128xbf16>
    %21 = vector.shape_cast %20 : vector<1x4x128xbf16> to vector<4x128xbf16>
    %22 = arith.extf %21 : vector<4x128xbf16> to vector<4x128xf32>
    %23 = arith.addf %19, %22 : vector<4x128xf32>
    %cst_22 = arith.constant 0.000000e+00 : f32
    %24 = vector.broadcast %cst_22 : f32 to vector<4x128xf32>
    %25 = arith.maximumf %23, %24 : vector<4x128xf32>
    %26 = arith.truncf %25 : vector<4x128xf32> to vector<4x128xbf16>
    %c0_23 = arith.constant 0 : index
    %c0_24 = arith.constant 0 : index
    %c0_25 = arith.constant 0 : index
    %27 = vector.load %arg6[%c0_23, %c0_24, %c0_25] : memref<1x4x128xbf16, #tpu.memory_space<vmem>>, vector<1x4x128xbf16>
    %28 = vector.shape_cast %27 : vector<1x4x128xbf16> to vector<4x128xbf16>
    %29 = vector.shape_cast %26 : vector<4x128xbf16> to vector<1x4x128xbf16>
    tpu.vector_store %arg6[%c0_23, %c0_24, %c0_25], %29 {strides = array<i32>} : memref<1x4x128xbf16, #tpu.memory_space<vmem>>, vector<1x4x128xbf16>,
    return
  }
  func.func @transform_0(%arg0: i32, %arg1: i32) -> (i32, i32, i32) {
    %c0_i32 = arith.constant 0 : i32
    %c0_i32_0 = arith.constant 0 : i32
    %c0_i32_1 = arith.constant 0 : i32
    return %arg0, %c0_i32, %c0_i32_0 : i32, i32, i32
  }
  func.func @transform_1(%arg0: i32, %arg1: i32) -> (i32, i32, i32) {
    %c0_i32 = arith.constant 0 : i32
    %c0_i32_0 = arith.constant 0 : i32
    %c0_i32_1 = arith.constant 0 : i32
    return %c0_i32, %c0_i32_0, %arg1 : i32, i32, i32
  }
  func.func @transform_2(%arg0: i32, %arg1: i32) -> (i32, i32) {
    %c0_i32 = arith.constant 0 : i32
    %c0_i32_0 = arith.constant 0 : i32
    return %c0_i32, %arg1 : i32, i32
  }
  func.func @transform_3(%arg0: i32, %arg1: i32) -> (i32, i32, i32) {
    %c0_i32 = arith.constant 0 : i32
    %c0_i32_0 = arith.constant 0 : i32
    return %arg0, %c0_i32, %arg1 : i32, i32, i32
  }
  func.func @transform_4(%arg0: i32, %arg1: i32) -> (i32, i32, i32) {
    %c0_i32 = arith.constant 0 : i32
    %c0_i32_0 = arith.constant 0 : i32
    return %arg0, %c0_i32, %arg1 : i32, i32, i32
  }
}

module attributes {stable_mosaic.version = 11 : i64} {
  func.func @_conv_bn_kernel(%arg0: i32, %arg1: i32, %arg2: memref<1x6x128xbf16, #tpu.memory_space<vmem>>, %arg3: memref<3x128x128xbf16, #tpu.memory_space<vmem>>, %arg4: memref<1x128xf32, #tpu.memory_space<vmem>>, %arg5: memref<1x4x128xbf16, #tpu.memory_space<vmem>>) attributes {dimension_semantics = [#tpu.dimension_semantics<parallel>, #tpu.dimension_semantics<parallel>], iteration_bounds = array<i64: 2, 1>, scalar_prefetch = 0 : i64, scratch_operands = 0 : i64, tpu.core_type = #tpu.core_type<tc>, window_params = [{transform_indices = @transform_0, window_bounds = array<i64: 1, 6, 128>}, {transform_indices = @transform_1, window_bounds = array<i64: 3, 128, 128>}, {transform_indices = @transform_2, window_bounds = array<i64: 1, 128>}, {transform_indices = @transform_3, window_bounds = array<i64: 1, 4, 128>}]} {
    %c0 = arith.constant 0 : index
    %c0_0 = arith.constant 0 : index
    %c0_1 = arith.constant 0 : index
    %0 = vector.load %arg2[%c0, %c0_0, %c0_1] : memref<1x6x128xbf16, #tpu.memory_space<vmem>>, vector<1x4x128xbf16>
    %1 = vector.shape_cast %0 : vector<1x4x128xbf16> to vector<4x128xbf16>
    %c0_2 = arith.constant 0 : index
    %c0_3 = arith.constant 0 : index
    %c0_4 = arith.constant 0 : index
    %2 = vector.load %arg3[%c0_2, %c0_3, %c0_4] : memref<3x128x128xbf16, #tpu.memory_space<vmem>>, vector<1x128x128xbf16>
    %3 = vector.shape_cast %2 : vector<1x128x128xbf16> to vector<128x128xbf16>
    %cst = arith.constant dense<0.000000e+00> : vector<4x128xf32>
    %4 = tpu.matmul %1, %3, %cst {dimension_numbers = #tpu.dot_dimension_numbers<[1], [0], [0], [1], [0, 0, 1, 1], [], []>} : vector<4x128xbf16>, vector<128x128xbf16>, vector<4x128xf32> -> vector<4x128xf32>
    %c0_5 = arith.constant 0 : index
    %c1 = arith.constant 1 : index
    %c0_6 = arith.constant 0 : index
    %5 = vector.load %arg2[%c0_5, %c1, %c0_6] : memref<1x6x128xbf16, #tpu.memory_space<vmem>>, vector<1x4x128xbf16>
    %6 = vector.shape_cast %5 : vector<1x4x128xbf16> to vector<4x128xbf16>
    %c1_7 = arith.constant 1 : index
    %c0_8 = arith.constant 0 : index
    %c0_9 = arith.constant 0 : index
    %7 = vector.load %arg3[%c1_7, %c0_8, %c0_9] : memref<3x128x128xbf16, #tpu.memory_space<vmem>>, vector<1x128x128xbf16>
    %8 = vector.shape_cast %7 : vector<1x128x128xbf16> to vector<128x128xbf16>
    %cst_10 = arith.constant dense<0.000000e+00> : vector<4x128xf32>
    %9 = tpu.matmul %6, %8, %cst_10 {dimension_numbers = #tpu.dot_dimension_numbers<[1], [0], [0], [1], [0, 0, 1, 1], [], []>} : vector<4x128xbf16>, vector<128x128xbf16>, vector<4x128xf32> -> vector<4x128xf32>
    %10 = arith.addf %4, %9 : vector<4x128xf32>
    %c0_11 = arith.constant 0 : index
    %c2 = arith.constant 2 : index
    %c0_12 = arith.constant 0 : index
    %11 = vector.load %arg2[%c0_11, %c2, %c0_12] : memref<1x6x128xbf16, #tpu.memory_space<vmem>>, vector<1x4x128xbf16>
    %12 = vector.shape_cast %11 : vector<1x4x128xbf16> to vector<4x128xbf16>
    %c2_13 = arith.constant 2 : index
    %c0_14 = arith.constant 0 : index
    %c0_15 = arith.constant 0 : index
    %13 = vector.load %arg3[%c2_13, %c0_14, %c0_15] : memref<3x128x128xbf16, #tpu.memory_space<vmem>>, vector<1x128x128xbf16>
    %14 = vector.shape_cast %13 : vector<1x128x128xbf16> to vector<128x128xbf16>
    %cst_16 = arith.constant dense<0.000000e+00> : vector<4x128xf32>
    %15 = tpu.matmul %12, %14, %cst_16 {dimension_numbers = #tpu.dot_dimension_numbers<[1], [0], [0], [1], [0, 0, 1, 1], [], []>} : vector<4x128xbf16>, vector<128x128xbf16>, vector<4x128xf32> -> vector<4x128xf32>
    %16 = arith.addf %10, %15 : vector<4x128xf32>
    %c0_17 = arith.constant 0 : index
    %c0_18 = arith.constant 0 : index
    %17 = vector.load %arg4[%c0_17, %c0_18] : memref<1x128xf32, #tpu.memory_space<vmem>>, vector<1x128xf32>
    %18 = vector.broadcast %17 : vector<1x128xf32> to vector<4x128xf32>
    %19 = arith.addf %16, %18 : vector<4x128xf32>
    %cst_19 = arith.constant 0.000000e+00 : f32
    %20 = vector.broadcast %cst_19 : f32 to vector<4x128xf32>
    %21 = arith.maximumf %19, %20 : vector<4x128xf32>
    %22 = arith.truncf %21 : vector<4x128xf32> to vector<4x128xbf16>
    %c0_20 = arith.constant 0 : index
    %c0_21 = arith.constant 0 : index
    %c0_22 = arith.constant 0 : index
    %23 = vector.load %arg5[%c0_20, %c0_21, %c0_22] : memref<1x4x128xbf16, #tpu.memory_space<vmem>>, vector<1x4x128xbf16>
    %24 = vector.shape_cast %23 : vector<1x4x128xbf16> to vector<4x128xbf16>
    %25 = vector.shape_cast %22 : vector<4x128xbf16> to vector<1x4x128xbf16>
    tpu.vector_store %arg5[%c0_20, %c0_21, %c0_22], %25 {strides = array<i32>} : memref<1x4x128xbf16, #tpu.memory_space<vmem>>, vector<1x4x128xbf16>,
    return
  }
  func.func @transform_0(%arg0: i32, %arg1: i32) -> (i32, i32, i32) {
    %c0_i32 = arith.constant 0 : i32
    %c0_i32_0 = arith.constant 0 : i32
    %c0_i32_1 = arith.constant 0 : i32
    return %arg0, %c0_i32, %c0_i32_0 : i32, i32, i32
  }
  func.func @transform_1(%arg0: i32, %arg1: i32) -> (i32, i32, i32) {
    %c0_i32 = arith.constant 0 : i32
    %c0_i32_0 = arith.constant 0 : i32
    %c0_i32_1 = arith.constant 0 : i32
    return %c0_i32, %c0_i32_0, %arg1 : i32, i32, i32
  }
  func.func @transform_2(%arg0: i32, %arg1: i32) -> (i32, i32) {
    %c0_i32 = arith.constant 0 : i32
    %c0_i32_0 = arith.constant 0 : i32
    return %c0_i32, %arg1 : i32, i32
  }
  func.func @transform_3(%arg0: i32, %arg1: i32) -> (i32, i32, i32) {
    %c0_i32 = arith.constant 0 : i32
    %c0_i32_0 = arith.constant 0 : i32
    return %arg0, %c0_i32, %arg1 : i32, i32, i32
  }
}

module attributes {stable_mosaic.version = 11 : i64} {
  func.func @_conv_bn_kernel(%arg0: i32, %arg1: i32, %arg2: memref<1x3x256xbf16, #tpu.memory_space<vmem>>, %arg3: memref<3x128x256xbf16, #tpu.memory_space<vmem>>, %arg4: memref<1x256xf32, #tpu.memory_space<vmem>>, %arg5: memref<1x2x256xbf16, #tpu.memory_space<vmem>>) attributes {dimension_semantics = [#tpu.dimension_semantics<parallel>, #tpu.dimension_semantics<parallel>], iteration_bounds = array<i64: 2, 1>, scalar_prefetch = 0 : i64, scratch_operands = 0 : i64, tpu.core_type = #tpu.core_type<tc>, window_params = [{transform_indices = @transform_0, window_bounds = array<i64: 1, 3, 256>}, {transform_indices = @transform_1, window_bounds = array<i64: 3, 128, 256>}, {transform_indices = @transform_2, window_bounds = array<i64: 1, 256>}, {transform_indices = @transform_3, window_bounds = array<i64: 1, 2, 256>}]} {
    %c0 = arith.constant 0 : index
    %c0_0 = arith.constant 0 : index
    %c0_1 = arith.constant 0 : index
    %0 = vector.load %arg2[%c0, %c0_0, %c0_1] : memref<1x3x256xbf16, #tpu.memory_space<vmem>>, vector<1x2x128xbf16>
    %1 = vector.shape_cast %0 : vector<1x2x128xbf16> to vector<2x128xbf16>
    %c0_2 = arith.constant 0 : index
    %c0_3 = arith.constant 0 : index
    %c0_4 = arith.constant 0 : index
    %2 = vector.load %arg3[%c0_2, %c0_3, %c0_4] : memref<3x128x256xbf16, #tpu.memory_space<vmem>>, vector<1x128x256xbf16>
    %3 = vector.shape_cast %2 : vector<1x128x256xbf16> to vector<128x256xbf16>
    %cst = arith.constant dense<0.000000e+00> : vector<2x256xf32>
    %4 = tpu.matmul %1, %3, %cst {dimension_numbers = #tpu.dot_dimension_numbers<[1], [0], [0], [1], [0, 0, 1, 1], [], []>} : vector<2x128xbf16>, vector<128x256xbf16>, vector<2x256xf32> -> vector<2x256xf32>
    %c0_5 = arith.constant 0 : index
    %c0_6 = arith.constant 0 : index
    %c128 = arith.constant 128 : index
    %5 = vector.load %arg2[%c0_5, %c0_6, %c128] : memref<1x3x256xbf16, #tpu.memory_space<vmem>>, vector<1x2x128xbf16>
    %6 = vector.shape_cast %5 : vector<1x2x128xbf16> to vector<2x128xbf16>
    %c1 = arith.constant 1 : index
    %c0_7 = arith.constant 0 : index
    %c0_8 = arith.constant 0 : index
    %7 = vector.load %arg3[%c1, %c0_7, %c0_8] : memref<3x128x256xbf16, #tpu.memory_space<vmem>>, vector<1x128x256xbf16>
    %8 = vector.shape_cast %7 : vector<1x128x256xbf16> to vector<128x256xbf16>
    %cst_9 = arith.constant dense<0.000000e+00> : vector<2x256xf32>
    %9 = tpu.matmul %6, %8, %cst_9 {dimension_numbers = #tpu.dot_dimension_numbers<[1], [0], [0], [1], [0, 0, 1, 1], [], []>} : vector<2x128xbf16>, vector<128x256xbf16>, vector<2x256xf32> -> vector<2x256xf32>
    %10 = arith.addf %4, %9 : vector<2x256xf32>
    %c0_10 = arith.constant 0 : index
    %c1_11 = arith.constant 1 : index
    %c0_12 = arith.constant 0 : index
    %11 = vector.load %arg2[%c0_10, %c1_11, %c0_12] : memref<1x3x256xbf16, #tpu.memory_space<vmem>>, vector<1x2x128xbf16>
    %12 = vector.shape_cast %11 : vector<1x2x128xbf16> to vector<2x128xbf16>
    %c2 = arith.constant 2 : index
    %c0_13 = arith.constant 0 : index
    %c0_14 = arith.constant 0 : index
    %13 = vector.load %arg3[%c2, %c0_13, %c0_14] : memref<3x128x256xbf16, #tpu.memory_space<vmem>>, vector<1x128x256xbf16>
    %14 = vector.shape_cast %13 : vector<1x128x256xbf16> to vector<128x256xbf16>
    %cst_15 = arith.constant dense<0.000000e+00> : vector<2x256xf32>
    %15 = tpu.matmul %12, %14, %cst_15 {dimension_numbers = #tpu.dot_dimension_numbers<[1], [0], [0], [1], [0, 0, 1, 1], [], []>} : vector<2x128xbf16>, vector<128x256xbf16>, vector<2x256xf32> -> vector<2x256xf32>
    %16 = arith.addf %10, %15 : vector<2x256xf32>
    %c0_16 = arith.constant 0 : index
    %c0_17 = arith.constant 0 : index
    %17 = vector.load %arg4[%c0_16, %c0_17] : memref<1x256xf32, #tpu.memory_space<vmem>>, vector<1x256xf32>
    %18 = vector.broadcast %17 : vector<1x256xf32> to vector<2x256xf32>
    %19 = arith.addf %16, %18 : vector<2x256xf32>
    %cst_18 = arith.constant 0.000000e+00 : f32
    %20 = vector.broadcast %cst_18 : f32 to vector<2x256xf32>
    %21 = arith.maximumf %19, %20 : vector<2x256xf32>
    %22 = arith.truncf %21 : vector<2x256xf32> to vector<2x256xbf16>
    %c0_19 = arith.constant 0 : index
    %c0_20 = arith.constant 0 : index
    %c0_21 = arith.constant 0 : index
    %23 = vector.load %arg5[%c0_19, %c0_20, %c0_21] : memref<1x2x256xbf16, #tpu.memory_space<vmem>>, vector<1x2x256xbf16>
    %24 = vector.shape_cast %23 : vector<1x2x256xbf16> to vector<2x256xbf16>
    %25 = vector.shape_cast %22 : vector<2x256xbf16> to vector<1x2x256xbf16>
    tpu.vector_store %arg5[%c0_19, %c0_20, %c0_21], %25 {strides = array<i32>} : memref<1x2x256xbf16, #tpu.memory_space<vmem>>, vector<1x2x256xbf16>,
    return
  }
  func.func @transform_0(%arg0: i32, %arg1: i32) -> (i32, i32, i32) {
    %c0_i32 = arith.constant 0 : i32
    %c0_i32_0 = arith.constant 0 : i32
    %c0_i32_1 = arith.constant 0 : i32
    return %arg0, %c0_i32, %c0_i32_0 : i32, i32, i32
  }
  func.func @transform_1(%arg0: i32, %arg1: i32) -> (i32, i32, i32) {
    %c0_i32 = arith.constant 0 : i32
    %c0_i32_0 = arith.constant 0 : i32
    %c0_i32_1 = arith.constant 0 : i32
    return %c0_i32, %c0_i32_0, %arg1 : i32, i32, i32
  }
  func.func @transform_2(%arg0: i32, %arg1: i32) -> (i32, i32) {
    %c0_i32 = arith.constant 0 : i32
    %c0_i32_0 = arith.constant 0 : i32
    return %c0_i32, %arg1 : i32, i32
  }
  func.func @transform_3(%arg0: i32, %arg1: i32) -> (i32, i32, i32) {
    %c0_i32 = arith.constant 0 : i32
    %c0_i32_0 = arith.constant 0 : i32
    return %arg0, %c0_i32, %arg1 : i32, i32, i32
  }
}

module attributes {stable_mosaic.version = 11 : i64} {
  func.func @_conv_bn_kernel(%arg0: i32, %arg1: i32, %arg2: memref<1x2x256xbf16, #tpu.memory_space<vmem>>, %arg3: memref<1x128x256xbf16, #tpu.memory_space<vmem>>, %arg4: memref<1x256xf32, #tpu.memory_space<vmem>>, %arg5: memref<1x2x256xbf16, #tpu.memory_space<vmem>>) attributes {dimension_semantics = [#tpu.dimension_semantics<parallel>, #tpu.dimension_semantics<parallel>], iteration_bounds = array<i64: 2, 1>, scalar_prefetch = 0 : i64, scratch_operands = 0 : i64, tpu.core_type = #tpu.core_type<tc>, window_params = [{transform_indices = @transform_0, window_bounds = array<i64: 1, 2, 256>}, {transform_indices = @transform_1, window_bounds = array<i64: 1, 128, 256>}, {transform_indices = @transform_2, window_bounds = array<i64: 1, 256>}, {transform_indices = @transform_3, window_bounds = array<i64: 1, 2, 256>}]} {
    %c0 = arith.constant 0 : index
    %c0_0 = arith.constant 0 : index
    %c0_1 = arith.constant 0 : index
    %0 = vector.load %arg2[%c0, %c0_0, %c0_1] : memref<1x2x256xbf16, #tpu.memory_space<vmem>>, vector<1x2x128xbf16>
    %1 = vector.shape_cast %0 : vector<1x2x128xbf16> to vector<2x128xbf16>
    %c0_2 = arith.constant 0 : index
    %c0_3 = arith.constant 0 : index
    %c0_4 = arith.constant 0 : index
    %2 = vector.load %arg3[%c0_2, %c0_3, %c0_4] : memref<1x128x256xbf16, #tpu.memory_space<vmem>>, vector<1x128x256xbf16>
    %3 = vector.shape_cast %2 : vector<1x128x256xbf16> to vector<128x256xbf16>
    %cst = arith.constant dense<0.000000e+00> : vector<2x256xf32>
    %4 = tpu.matmul %1, %3, %cst {dimension_numbers = #tpu.dot_dimension_numbers<[1], [0], [0], [1], [0, 0, 1, 1], [], []>} : vector<2x128xbf16>, vector<128x256xbf16>, vector<2x256xf32> -> vector<2x256xf32>
    %c0_5 = arith.constant 0 : index
    %c0_6 = arith.constant 0 : index
    %5 = vector.load %arg4[%c0_5, %c0_6] : memref<1x256xf32, #tpu.memory_space<vmem>>, vector<1x256xf32>
    %6 = vector.broadcast %5 : vector<1x256xf32> to vector<2x256xf32>
    %7 = arith.addf %4, %6 : vector<2x256xf32>
    %8 = arith.truncf %7 : vector<2x256xf32> to vector<2x256xbf16>
    %c0_7 = arith.constant 0 : index
    %c0_8 = arith.constant 0 : index
    %c0_9 = arith.constant 0 : index
    %9 = vector.load %arg5[%c0_7, %c0_8, %c0_9] : memref<1x2x256xbf16, #tpu.memory_space<vmem>>, vector<1x2x256xbf16>
    %10 = vector.shape_cast %9 : vector<1x2x256xbf16> to vector<2x256xbf16>
    %11 = vector.shape_cast %8 : vector<2x256xbf16> to vector<1x2x256xbf16>
    tpu.vector_store %arg5[%c0_7, %c0_8, %c0_9], %11 {strides = array<i32>} : memref<1x2x256xbf16, #tpu.memory_space<vmem>>, vector<1x2x256xbf16>,
    return
  }
  func.func @transform_0(%arg0: i32, %arg1: i32) -> (i32, i32, i32) {
    %c0_i32 = arith.constant 0 : i32
    %c0_i32_0 = arith.constant 0 : i32
    %c0_i32_1 = arith.constant 0 : i32
    return %arg0, %c0_i32, %c0_i32_0 : i32, i32, i32
  }
  func.func @transform_1(%arg0: i32, %arg1: i32) -> (i32, i32, i32) {
    %c0_i32 = arith.constant 0 : i32
    %c0_i32_0 = arith.constant 0 : i32
    %c0_i32_1 = arith.constant 0 : i32
    return %c0_i32, %c0_i32_0, %arg1 : i32, i32, i32
  }
  func.func @transform_2(%arg0: i32, %arg1: i32) -> (i32, i32) {
    %c0_i32 = arith.constant 0 : i32
    %c0_i32_0 = arith.constant 0 : i32
    return %c0_i32, %arg1 : i32, i32
  }
  func.func @transform_3(%arg0: i32, %arg1: i32) -> (i32, i32, i32) {
    %c0_i32 = arith.constant 0 : i32
    %c0_i32_0 = arith.constant 0 : i32
    return %arg0, %c0_i32, %arg1 : i32, i32, i32
  }
}

module attributes {stable_mosaic.version = 11 : i64} {
  func.func @_conv_bn_kernel(%arg0: i32, %arg1: i32, %arg2: memref<1x4x256xbf16, #tpu.memory_space<vmem>>, %arg3: memref<3x256x256xbf16, #tpu.memory_space<vmem>>, %arg4: memref<1x256xf32, #tpu.memory_space<vmem>>, %arg5: memref<1x2x256xbf16, #tpu.memory_space<vmem>>, %arg6: memref<1x2x256xbf16, #tpu.memory_space<vmem>>) attributes {dimension_semantics = [#tpu.dimension_semantics<parallel>, #tpu.dimension_semantics<parallel>], iteration_bounds = array<i64: 2, 1>, scalar_prefetch = 0 : i64, scratch_operands = 0 : i64, tpu.core_type = #tpu.core_type<tc>, window_params = [{transform_indices = @transform_0, window_bounds = array<i64: 1, 4, 256>}, {transform_indices = @transform_1, window_bounds = array<i64: 3, 256, 256>}, {transform_indices = @transform_2, window_bounds = array<i64: 1, 256>}, {transform_indices = @transform_3, window_bounds = array<i64: 1, 2, 256>}, {transform_indices = @transform_4, window_bounds = array<i64: 1, 2, 256>}]} {
    %c0 = arith.constant 0 : index
    %c0_0 = arith.constant 0 : index
    %c0_1 = arith.constant 0 : index
    %0 = vector.load %arg2[%c0, %c0_0, %c0_1] : memref<1x4x256xbf16, #tpu.memory_space<vmem>>, vector<1x2x256xbf16>
    %1 = vector.shape_cast %0 : vector<1x2x256xbf16> to vector<2x256xbf16>
    %c0_2 = arith.constant 0 : index
    %c0_3 = arith.constant 0 : index
    %c0_4 = arith.constant 0 : index
    %2 = vector.load %arg3[%c0_2, %c0_3, %c0_4] : memref<3x256x256xbf16, #tpu.memory_space<vmem>>, vector<1x256x256xbf16>
    %3 = vector.shape_cast %2 : vector<1x256x256xbf16> to vector<256x256xbf16>
    %cst = arith.constant dense<0.000000e+00> : vector<2x256xf32>
    %4 = tpu.matmul %1, %3, %cst {dimension_numbers = #tpu.dot_dimension_numbers<[1], [0], [0], [1], [0, 0, 1, 1], [], []>} : vector<2x256xbf16>, vector<256x256xbf16>, vector<2x256xf32> -> vector<2x256xf32>
    %c0_5 = arith.constant 0 : index
    %c1 = arith.constant 1 : index
    %c0_6 = arith.constant 0 : index
    %5 = vector.load %arg2[%c0_5, %c1, %c0_6] : memref<1x4x256xbf16, #tpu.memory_space<vmem>>, vector<1x2x256xbf16>
    %6 = vector.shape_cast %5 : vector<1x2x256xbf16> to vector<2x256xbf16>
    %c1_7 = arith.constant 1 : index
    %c0_8 = arith.constant 0 : index
    %c0_9 = arith.constant 0 : index
    %7 = vector.load %arg3[%c1_7, %c0_8, %c0_9] : memref<3x256x256xbf16, #tpu.memory_space<vmem>>, vector<1x256x256xbf16>
    %8 = vector.shape_cast %7 : vector<1x256x256xbf16> to vector<256x256xbf16>
    %cst_10 = arith.constant dense<0.000000e+00> : vector<2x256xf32>
    %9 = tpu.matmul %6, %8, %cst_10 {dimension_numbers = #tpu.dot_dimension_numbers<[1], [0], [0], [1], [0, 0, 1, 1], [], []>} : vector<2x256xbf16>, vector<256x256xbf16>, vector<2x256xf32> -> vector<2x256xf32>
    %10 = arith.addf %4, %9 : vector<2x256xf32>
    %c0_11 = arith.constant 0 : index
    %c2 = arith.constant 2 : index
    %c0_12 = arith.constant 0 : index
    %11 = vector.load %arg2[%c0_11, %c2, %c0_12] : memref<1x4x256xbf16, #tpu.memory_space<vmem>>, vector<1x2x256xbf16>
    %12 = vector.shape_cast %11 : vector<1x2x256xbf16> to vector<2x256xbf16>
    %c2_13 = arith.constant 2 : index
    %c0_14 = arith.constant 0 : index
    %c0_15 = arith.constant 0 : index
    %13 = vector.load %arg3[%c2_13, %c0_14, %c0_15] : memref<3x256x256xbf16, #tpu.memory_space<vmem>>, vector<1x256x256xbf16>
    %14 = vector.shape_cast %13 : vector<1x256x256xbf16> to vector<256x256xbf16>
    %cst_16 = arith.constant dense<0.000000e+00> : vector<2x256xf32>
    %15 = tpu.matmul %12, %14, %cst_16 {dimension_numbers = #tpu.dot_dimension_numbers<[1], [0], [0], [1], [0, 0, 1, 1], [], []>} : vector<2x256xbf16>, vector<256x256xbf16>, vector<2x256xf32> -> vector<2x256xf32>
    %16 = arith.addf %10, %15 : vector<2x256xf32>
    %c0_17 = arith.constant 0 : index
    %c0_18 = arith.constant 0 : index
    %17 = vector.load %arg4[%c0_17, %c0_18] : memref<1x256xf32, #tpu.memory_space<vmem>>, vector<1x256xf32>
    %18 = vector.broadcast %17 : vector<1x256xf32> to vector<2x256xf32>
    %19 = arith.addf %16, %18 : vector<2x256xf32>
    %c0_19 = arith.constant 0 : index
    %c0_20 = arith.constant 0 : index
    %c0_21 = arith.constant 0 : index
    %20 = vector.load %arg5[%c0_19, %c0_20, %c0_21] : memref<1x2x256xbf16, #tpu.memory_space<vmem>>, vector<1x2x256xbf16>
    %21 = vector.shape_cast %20 : vector<1x2x256xbf16> to vector<2x256xbf16>
    %22 = arith.extf %21 : vector<2x256xbf16> to vector<2x256xf32>
    %23 = arith.addf %19, %22 : vector<2x256xf32>
    %cst_22 = arith.constant 0.000000e+00 : f32
    %24 = vector.broadcast %cst_22 : f32 to vector<2x256xf32>
    %25 = arith.maximumf %23, %24 : vector<2x256xf32>
    %26 = arith.truncf %25 : vector<2x256xf32> to vector<2x256xbf16>
    %c0_23 = arith.constant 0 : index
    %c0_24 = arith.constant 0 : index
    %c0_25 = arith.constant 0 : index
    %27 = vector.load %arg6[%c0_23, %c0_24, %c0_25] : memref<1x2x256xbf16, #tpu.memory_space<vmem>>, vector<1x2x256xbf16>
    %28 = vector.shape_cast %27 : vector<1x2x256xbf16> to vector<2x256xbf16>
    %29 = vector.shape_cast %26 : vector<2x256xbf16> to vector<1x2x256xbf16>
    tpu.vector_store %arg6[%c0_23, %c0_24, %c0_25], %29 {strides = array<i32>} : memref<1x2x256xbf16, #tpu.memory_space<vmem>>, vector<1x2x256xbf16>,
    return
  }
  func.func @transform_0(%arg0: i32, %arg1: i32) -> (i32, i32, i32) {
    %c0_i32 = arith.constant 0 : i32
    %c0_i32_0 = arith.constant 0 : i32
    %c0_i32_1 = arith.constant 0 : i32
    return %arg0, %c0_i32, %c0_i32_0 : i32, i32, i32
  }
  func.func @transform_1(%arg0: i32, %arg1: i32) -> (i32, i32, i32) {
    %c0_i32 = arith.constant 0 : i32
    %c0_i32_0 = arith.constant 0 : i32
    %c0_i32_1 = arith.constant 0 : i32
    return %c0_i32, %c0_i32_0, %arg1 : i32, i32, i32
  }
  func.func @transform_2(%arg0: i32, %arg1: i32) -> (i32, i32) {
    %c0_i32 = arith.constant 0 : i32
    %c0_i32_0 = arith.constant 0 : i32
    return %c0_i32, %arg1 : i32, i32
  }
  func.func @transform_3(%arg0: i32, %arg1: i32) -> (i32, i32, i32) {
    %c0_i32 = arith.constant 0 : i32
    %c0_i32_0 = arith.constant 0 : i32
    return %arg0, %c0_i32, %arg1 : i32, i32, i32
  }
  func.func @transform_4(%arg0: i32, %arg1: i32) -> (i32, i32, i32) {
    %c0_i32 = arith.constant 0 : i32
    %c0_i32_0 = arith.constant 0 : i32
    return %arg0, %c0_i32, %arg1 : i32, i32, i32
  }
}

module attributes {stable_mosaic.version = 11 : i64} {
  func.func @_conv_bn_kernel(%arg0: i32, %arg1: i32, %arg2: memref<1x4x256xbf16, #tpu.memory_space<vmem>>, %arg3: memref<3x256x256xbf16, #tpu.memory_space<vmem>>, %arg4: memref<1x256xf32, #tpu.memory_space<vmem>>, %arg5: memref<1x2x256xbf16, #tpu.memory_space<vmem>>) attributes {dimension_semantics = [#tpu.dimension_semantics<parallel>, #tpu.dimension_semantics<parallel>], iteration_bounds = array<i64: 2, 1>, scalar_prefetch = 0 : i64, scratch_operands = 0 : i64, tpu.core_type = #tpu.core_type<tc>, window_params = [{transform_indices = @transform_0, window_bounds = array<i64: 1, 4, 256>}, {transform_indices = @transform_1, window_bounds = array<i64: 3, 256, 256>}, {transform_indices = @transform_2, window_bounds = array<i64: 1, 256>}, {transform_indices = @transform_3, window_bounds = array<i64: 1, 2, 256>}]} {
    %c0 = arith.constant 0 : index
    %c0_0 = arith.constant 0 : index
    %c0_1 = arith.constant 0 : index
    %0 = vector.load %arg2[%c0, %c0_0, %c0_1] : memref<1x4x256xbf16, #tpu.memory_space<vmem>>, vector<1x2x256xbf16>
    %1 = vector.shape_cast %0 : vector<1x2x256xbf16> to vector<2x256xbf16>
    %c0_2 = arith.constant 0 : index
    %c0_3 = arith.constant 0 : index
    %c0_4 = arith.constant 0 : index
    %2 = vector.load %arg3[%c0_2, %c0_3, %c0_4] : memref<3x256x256xbf16, #tpu.memory_space<vmem>>, vector<1x256x256xbf16>
    %3 = vector.shape_cast %2 : vector<1x256x256xbf16> to vector<256x256xbf16>
    %cst = arith.constant dense<0.000000e+00> : vector<2x256xf32>
    %4 = tpu.matmul %1, %3, %cst {dimension_numbers = #tpu.dot_dimension_numbers<[1], [0], [0], [1], [0, 0, 1, 1], [], []>} : vector<2x256xbf16>, vector<256x256xbf16>, vector<2x256xf32> -> vector<2x256xf32>
    %c0_5 = arith.constant 0 : index
    %c1 = arith.constant 1 : index
    %c0_6 = arith.constant 0 : index
    %5 = vector.load %arg2[%c0_5, %c1, %c0_6] : memref<1x4x256xbf16, #tpu.memory_space<vmem>>, vector<1x2x256xbf16>
    %6 = vector.shape_cast %5 : vector<1x2x256xbf16> to vector<2x256xbf16>
    %c1_7 = arith.constant 1 : index
    %c0_8 = arith.constant 0 : index
    %c0_9 = arith.constant 0 : index
    %7 = vector.load %arg3[%c1_7, %c0_8, %c0_9] : memref<3x256x256xbf16, #tpu.memory_space<vmem>>, vector<1x256x256xbf16>
    %8 = vector.shape_cast %7 : vector<1x256x256xbf16> to vector<256x256xbf16>
    %cst_10 = arith.constant dense<0.000000e+00> : vector<2x256xf32>
    %9 = tpu.matmul %6, %8, %cst_10 {dimension_numbers = #tpu.dot_dimension_numbers<[1], [0], [0], [1], [0, 0, 1, 1], [], []>} : vector<2x256xbf16>, vector<256x256xbf16>, vector<2x256xf32> -> vector<2x256xf32>
    %10 = arith.addf %4, %9 : vector<2x256xf32>
    %c0_11 = arith.constant 0 : index
    %c2 = arith.constant 2 : index
    %c0_12 = arith.constant 0 : index
    %11 = vector.load %arg2[%c0_11, %c2, %c0_12] : memref<1x4x256xbf16, #tpu.memory_space<vmem>>, vector<1x2x256xbf16>
    %12 = vector.shape_cast %11 : vector<1x2x256xbf16> to vector<2x256xbf16>
    %c2_13 = arith.constant 2 : index
    %c0_14 = arith.constant 0 : index
    %c0_15 = arith.constant 0 : index
    %13 = vector.load %arg3[%c2_13, %c0_14, %c0_15] : memref<3x256x256xbf16, #tpu.memory_space<vmem>>, vector<1x256x256xbf16>
    %14 = vector.shape_cast %13 : vector<1x256x256xbf16> to vector<256x256xbf16>
    %cst_16 = arith.constant dense<0.000000e+00> : vector<2x256xf32>
    %15 = tpu.matmul %12, %14, %cst_16 {dimension_numbers = #tpu.dot_dimension_numbers<[1], [0], [0], [1], [0, 0, 1, 1], [], []>} : vector<2x256xbf16>, vector<256x256xbf16>, vector<2x256xf32> -> vector<2x256xf32>
    %16 = arith.addf %10, %15 : vector<2x256xf32>
    %c0_17 = arith.constant 0 : index
    %c0_18 = arith.constant 0 : index
    %17 = vector.load %arg4[%c0_17, %c0_18] : memref<1x256xf32, #tpu.memory_space<vmem>>, vector<1x256xf32>
    %18 = vector.broadcast %17 : vector<1x256xf32> to vector<2x256xf32>
    %19 = arith.addf %16, %18 : vector<2x256xf32>
    %cst_19 = arith.constant 0.000000e+00 : f32
    %20 = vector.broadcast %cst_19 : f32 to vector<2x256xf32>
    %21 = arith.maximumf %19, %20 : vector<2x256xf32>
    %22 = arith.truncf %21 : vector<2x256xf32> to vector<2x256xbf16>
    %c0_20 = arith.constant 0 : index
    %c0_21 = arith.constant 0 : index
    %c0_22 = arith.constant 0 : index
    %23 = vector.load %arg5[%c0_20, %c0_21, %c0_22] : memref<1x2x256xbf16, #tpu.memory_space<vmem>>, vector<1x2x256xbf16>
    %24 = vector.shape_cast %23 : vector<1x2x256xbf16> to vector<2x256xbf16>
    %25 = vector.shape_cast %22 : vector<2x256xbf16> to vector<1x2x256xbf16>
    tpu.vector_store %arg5[%c0_20, %c0_21, %c0_22], %25 {strides = array<i32>} : memref<1x2x256xbf16, #tpu.memory_space<vmem>>, vector<1x2x256xbf16>,
    return
  }
  func.func @transform_0(%arg0: i32, %arg1: i32) -> (i32, i32, i32) {
    %c0_i32 = arith.constant 0 : i32
    %c0_i32_0 = arith.constant 0 : i32
    %c0_i32_1 = arith.constant 0 : i32
    return %arg0, %c0_i32, %c0_i32_0 : i32, i32, i32
  }
  func.func @transform_1(%arg0: i32, %arg1: i32) -> (i32, i32, i32) {
    %c0_i32 = arith.constant 0 : i32
    %c0_i32_0 = arith.constant 0 : i32
    %c0_i32_1 = arith.constant 0 : i32
    return %c0_i32, %c0_i32_0, %arg1 : i32, i32, i32
  }
  func.func @transform_2(%arg0: i32, %arg1: i32) -> (i32, i32) {
    %c0_i32 = arith.constant 0 : i32
    %c0_i32_0 = arith.constant 0 : i32
    return %c0_i32, %arg1 : i32, i32
  }
  func.func @transform_3(%arg0: i32, %arg1: i32) -> (i32, i32, i32) {
    %c0_i32 = arith.constant 0 : i32
    %c0_i32_0 = arith.constant 0 : i32
    return %arg0, %c0_i32, %arg1 : i32, i32, i32
  }
}

module attributes {stable_mosaic.version = 11 : i64} {
  func.func @_head_kernel(%arg0: i32, %arg1: memref<1x2x256xbf16, #tpu.memory_space<vmem>>, %arg2: memref<256x128xf32, #tpu.memory_space<vmem>>, %arg3: memref<1x128xf32, #tpu.memory_space<vmem>>, %arg4: memref<1x1x128xf32, #tpu.memory_space<vmem>>) attributes {dimension_semantics = [#tpu.dimension_semantics<parallel>], iteration_bounds = array<i64: 2>, scalar_prefetch = 0 : i64, scratch_operands = 0 : i64, tpu.core_type = #tpu.core_type<tc>, window_params = [{transform_indices = @transform_0, window_bounds = array<i64: 1, 2, 256>}, {pipeline_mode = #tpu.pipeline_mode<synchronous>, transform_indices = @transform_1, window_bounds = array<i64: 256, 128>}, {pipeline_mode = #tpu.pipeline_mode<synchronous>, transform_indices = @transform_2, window_bounds = array<i64: 1, 128>}, {transform_indices = @transform_3, window_bounds = array<i64: 1, 1, 128>}]} {
    %c0 = arith.constant 0 : index
    %c0_0 = arith.constant 0 : index
    %c0_1 = arith.constant 0 : index
    %0 = vector.load %arg1[%c0, %c0_0, %c0_1] : memref<1x2x256xbf16, #tpu.memory_space<vmem>>, vector<1x2x256xbf16>
    %1 = vector.shape_cast %0 : vector<1x2x256xbf16> to vector<2x256xbf16>
    %2 = arith.extf %1 : vector<2x256xbf16> to vector<2x256xf32>
    %cst = arith.constant dense<0.000000e+00> : vector<256xf32>
    %3 = vector.multi_reduction <add>, %2, %cst [0] : vector<2x256xf32> to vector<256xf32>
    %4 = vector.shape_cast %3 : vector<256xf32> to vector<1x256xf32>
    %cst_2 = arith.constant 2.000000e+00 : f32
    %5 = vector.broadcast %cst_2 : f32 to vector<1x256xf32>
    %6 = arith.divf %4, %5 : vector<1x256xf32>
    %c0_3 = arith.constant 0 : index
    %c0_4 = arith.constant 0 : index
    %7 = vector.load %arg2[%c0_3, %c0_4] : memref<256x128xf32, #tpu.memory_space<vmem>>, vector<256x128xf32>
    %cst_5 = arith.constant dense<0.000000e+00> : vector<1x128xf32>
    %8 = tpu.matmul %6, %7, %cst_5 {dimension_numbers = #tpu.dot_dimension_numbers<[1], [0], [0], [1], [0, 0, 1, 1], [], []>} : vector<1x256xf32>, vector<256x128xf32>, vector<1x128xf32> -> vector<1x128xf32>
    %c0_6 = arith.constant 0 : index
    %c0_7 = arith.constant 0 : index
    %9 = vector.load %arg3[%c0_6, %c0_7] : memref<1x128xf32, #tpu.memory_space<vmem>>, vector<1x128xf32>
    %10 = arith.addf %8, %9 : vector<1x128xf32>
    %cst_8 = arith.constant dense<0xFF800000> : vector<1xf32>
    %11 = vector.multi_reduction <maximumf>, %10, %cst_8 [1] : vector<1x128xf32> to vector<1xf32>
    %12 = vector.shape_cast %11 : vector<1xf32> to vector<1x1xf32>
    %13 = vector.broadcast %12 : vector<1x1xf32> to vector<1x128xf32>
    %14 = arith.subf %10, %13 : vector<1x128xf32>
    %15 = math.exp %14 : vector<1x128xf32>
    %cst_9 = arith.constant dense<0.000000e+00> : vector<1xf32>
    %16 = vector.multi_reduction <add>, %15, %cst_9 [1] : vector<1x128xf32> to vector<1xf32>
    %17 = vector.shape_cast %16 : vector<1xf32> to vector<1x1xf32>
    %18 = vector.broadcast %17 : vector<1x1xf32> to vector<1x128xf32>
    %19 = arith.divf %15, %18 : vector<1x128xf32>
    %c0_10 = arith.constant 0 : index
    %c0_11 = arith.constant 0 : index
    %c0_12 = arith.constant 0 : index
    %20 = vector.load %arg4[%c0_10, %c0_11, %c0_12] : memref<1x1x128xf32, #tpu.memory_space<vmem>>, vector<1x1x128xf32>
    %21 = vector.shape_cast %20 : vector<1x1x128xf32> to vector<1x128xf32>
    %22 = vector.shape_cast %19 : vector<1x128xf32> to vector<1x1x128xf32>
    tpu.vector_store %arg4[%c0_10, %c0_11, %c0_12], %22 {strides = array<i32>} : memref<1x1x128xf32, #tpu.memory_space<vmem>>, vector<1x1x128xf32>,
    return
  }
  func.func @transform_0(%arg0: i32) -> (i32, i32, i32) {
    %c0_i32 = arith.constant 0 : i32
    %c0_i32_0 = arith.constant 0 : i32
    %c0_i32_1 = arith.constant 0 : i32
    return %arg0, %c0_i32, %c0_i32_0 : i32, i32, i32
  }
  func.func @transform_1(%arg0: i32) -> (i32, i32) {
    %c0_i32 = arith.constant 0 : i32
    %c0_i32_0 = arith.constant 0 : i32
    %c0_i32_1 = arith.constant 0 : i32
    return %c0_i32, %c0_i32_0 : i32, i32
  }
  func.func @transform_2(%arg0: i32) -> (i32, i32) {
    %c0_i32 = arith.constant 0 : i32
    %c0_i32_0 = arith.constant 0 : i32
    %c0_i32_1 = arith.constant 0 : i32
    return %c0_i32, %c0_i32_0 : i32, i32
  }
  func.func @transform_3(%arg0: i32) -> (i32, i32, i32) {
    %c0_i32 = arith.constant 0 : i32
    %c0_i32_0 = arith.constant 0 : i32
    %c0_i32_1 = arith.constant 0 : i32
    return %arg0, %c0_i32, %c0_i32_0 : i32, i32, i32
  }
}

</mosaic_0001>

<bundles_post_ra>
// kernel: resnet1d_forward.18
= control target key start
LH: loop header
LB: loop body
LE: loop exit
PB: predicated region body
PF: predicated region fallthrough
CT: control target
= control target key end

     0   :  { %s228_s6 = smov 0   ;;  %s239_s0 = inlined_call_operand.vmem [shape: bf16[2,9,256], index: 0, kind: input, shape index: {}]   ;;  %s240_s1 = inlined_call_operand.vmem [shape: bf16[2,8,128], index: 1, kind: output, shape index: {}]  }
   0x1 LB: > { %s187_s7 = sadd.s32 4294967295, %s216_s6   ;;  %p191_p0 = scmp.ge.s32.totalorder %s216_s6, 1  ;;  %s216_s6 = sphi %s228_s6, %s11_s6  }
   0x2   : > { %p87_p1 = scmp.lt.s32.totalorder %s216_s6, 3 }
   0x4   : > { %p88_p2 = pnand %p191_p0, %p87_p1 }
   0x5   : > { %p106_p3 = scmp.lt.s32.totalorder (!%p88_p2), %s187_s7, 1 }
   0x6   : > { %91 = sbr.rel (%p88_p2) target bundleno = 25 (0x19), region = 24 }
   0xb   : > { %s242_s7 = smov (!%p106_p3, %s187_s7), 1  ;;  %vm126_vm0 = vcmask 1046528  }
   0xc   : > { %s197_s8 = sshll.u32 %s242_s7, 4  ;;  %s194_s12 = sshll.u32 %s242_s7, 2 }
   0xd   : > { %s110_s11 = scalar_lea.vmem %s239_s0, %s197_s8  ;;  %s114_s15 = scalar_lea.vmem %s240_s1, %s194_s12 }
   0xe   : > { %v199_v0 = vld [vmem:[%s110_s11] sm:$0xff]   ;;  %v121_v1 = vld [vmem:[%s110_s11 + $0x8] sm:$0x1] }
   0xf   : > { %v200_v2 = vunpack.c.l.bf16 %v199_v0  ;;  %v201_v3 = vunpack.c.h.bf16 %v199_v0  ;;  %v123_v4 = vunpack.c.l.bf16 %v121_v1 }
  0x11   : > { %v119_v5 = vmax.f32 %v200_v2, %v201_v3  ;;  %v127_v6 = vrot.slane %v200_v2, 1  ;;  %v128_v7 = vrot.slane %v123_v4, 1 }
  0x13   : > { %v129_v8 = vsel %vm126_vm0, %v127_v6, %v128_v7 }
  0x14   : > { %v131_v9 = vmax.f32 %v119_v5, %v129_v8 }
  0x16   : > { %v132_v10 = vpack.c.bf16 %v131_v9, %v131_v9 }
  0x18   : > { %133 = vst [vmem:[%s114_s15] sm:$0xf] %v132_v10 }
  0x19 PF: > { %s11_s6 = sadd.s32 1, %s216_s6  }
  0x1a   : > { %p8_p4 = scmp.ge.s32.totalorder %s11_s6, 4  }
  0x1c   :  { %10 = sbr.rel (!%p8_p4) target bundleno = 1 (0x1), region = 54 }

// kernel: resnet1d_forward.19
= control target key start
LH: loop header
LB: loop body
LE: loop exit
PB: predicated region body
PF: predicated region fallthrough
CT: control target
= control target key end

     0   :  { %s816_s12 = smov 0   ;;  %s818_s13 = smov 0   ;;  %s928_s0 = inlined_call_operand.vmem [shape: bf16[2,10,128], index: 0, kind: input, shape index: {}]   ;;  %s929_s1 = inlined_call_operand.vmem [shape: bf16[3,128,128], index: 1, kind: input, shape index: {}]   ;;  %s930_s2 = inlined_call_operand.vmem [shape: f32[1,128], index: 2, kind: input, shape index: {}]   ;;  %s931_s3 = inlined_call_operand.vmem [shape: bf16[2,8,128], index: 3, kind: output, shape index: {}]  }
   0x1   :  { %s820_s14 = smov 0  }
   0x2 LB: > { %s25_s15 = sadd.s32 1, %s790_s13  ;;  %p588_p0 = scmp.ge.s32.totalorder %s794_s14, 1  ;;  %s794_s14 = sphi %s820_s14, %s13_s14   ;;  %s790_s13 = sphi %s818_s13, %s933_s13   ;;  %s786_s12 = sphi %s816_s12, %s932_s12  }
   0x3   : > { %p27_p1 = scmp.ge.s32.totalorder %s25_s15, 2  ;;  %p168_p2 = scmp.lt.s32.totalorder %s794_s14, 3 }
   0x5   : > { %s935_s15 = smov (%p27_p1, %s25_s15), 0  ;;  %p169_p3 = pnand %p588_p0, %p168_p2 }
   0x6   : > { %p201_p4 = scmp.lt.s32.totalorder (!%p169_p3), %s786_s12, 1 }
   0x7   : > { %172 = sbr.rel (%p169_p3) target bundleno = 187 (0xbb), region = 32 }
   0xc   : > { %v738_v0 = vld [vmem:[%s929_s1 + $0x78] sm:$0xff]  ;;  %v737_v3 = vld [vmem:[%s929_s1 + $0x70] sm:$0xff]  ;;  %s937_s12 = smov (!%p201_p4, %s786_s12), 1  ;;  %v736_v6 = vld [vmem:[%s929_s1 + $0x68] sm:$0xff] }
   0xd   : > { %v730_v1 = vld [vmem:[%s929_s1 + $0x38] sm:$0xff]  ;;  %316 = vmatpush.bf16.msra.mxu0 %v738_v0  ;;  %v729_v4 = vld [vmem:[%s929_s1 + $0x30] sm:$0xff]  ;;  %s722_s28 = sshll.u32 %s937_s12, 3  ;;  %v728_v7 = vld [vmem:[%s929_s1 + $0x28] sm:$0xff]  ;;  %s591_s24 = sshll.u32 %s937_s12, 2 }
   0xe   : > { %v746_v2 = vld [vmem:[%s929_s1 + $0xb8] sm:$0xff]  ;;  %377 = vmatpush.bf16.msra.mxu1 %v730_v1  ;;  %v745_v5 = vld [vmem:[%s929_s1 + $0xb0] sm:$0xff]  ;;  %v744_v8 = vld [vmem:[%s929_s1 + $0xa8] sm:$0xff]  ;;  %s205_s10 = scalar_lea.vmem %s928_s0, %s722_s28  ;;  %s219_s27 = scalar_lea.vmem %s931_s3, %s591_s24 }
   0xf   : > { %461 = vmatpush.bf16.msra.mxu2 %v746_v2  ;;  %v735_v9 = vld [vmem:[%s929_s1 + $0x60] sm:$0xff]  ;;  %v734_v16 = vld [vmem:[%s929_s1 + $0x58] sm:$0xff]  ;;  %v733_v20 = vld [vmem:[%s929_s1 + $0x50] sm:$0xff] }
  0x10   : > { %v727_v10 = vld [vmem:[%s929_s1 + $0x20] sm:$0xff]  ;;  %v726_v17 = vld [vmem:[%s929_s1 + $0x18] sm:$0xff]  ;;  %v725_v21 = vld [vmem:[%s929_s1 + $0x10] sm:$0xff] }
  0x11   : > { %317 = vmatpush.bf16.msra.mxu0 %v737_v3  ;;  %v220_v11 = vld [vmem:[%s205_s10] sm:$0xf]  ;;  %v237_v12 = vld [vmem:[%s205_s10 + $0x4] sm:$0x1]  ;;  %v742_v18 = vld [vmem:[%s929_s1 + $0x98] sm:$0xff] }
  0x12   : > { %378 = vmatpush.bf16.msra.mxu1 %v729_v4  ;;  %v743_v13 = vld [vmem:[%s929_s1 + $0xa0] sm:$0xff]  ;;  %v257_v14 = vunpack.c.l.b16 %v220_v11  ;;  %v258_v15 = vunpack.c.l.b16 %v237_v12  ;;  %v741_v22 = vld [vmem:[%s929_s1 + $0x90] sm:$0xff]  ;;  %v732_v25 = vld [vmem:[%s929_s1 + $0x48] sm:$0xff] }
  0x13   : > { %462 = vmatpush.bf16.msra.mxu2 %v745_v5  ;;  %v390_v23 = vld [vmem:[%s205_s10] sm:$0xe]  ;;  %v724_v26 = vld [vmem:[%s929_s1 + $0x8] sm:$0xff]  ;;  %v771_v40 = vld [vmem:[%s930_s2] ss:$0 sm:$0xff] }
  0x14   : > { %v259_v19 = vpack.c.b16 %v258_v15, %v257_v14  ;;  %v409_v27 = vunpack.c.l.b16 %v390_v23  ;;  %v740_v28 = vld [vmem:[%s929_s1 + $0x88] sm:$0xff]  ;;  %v731_v31 = vld [vmem:[%s929_s1 + $0x40] sm:$0xff] }
  0x15   : > { %318 = vmatpush.bf16.msra.mxu0 %v736_v6  ;;  %v723_v32 = vld [vmem:[%s929_s1] sm:$0xff] }
  0x16   : > { %379 = vmatpush.bf16.msra.mxu1 %v728_v7  ;;  %v263_v24 = vshll.u32 %v259_v19, 16  ;;  %v261_v29 = vshrl.u32 %v259_v19, 16  ;;  %v410_v33 = vpack.c.b16 %v258_v15, %v409_v27  ;;  %v739_v34 = vld [vmem:[%s929_s1 + $0x80] sm:$0xff] }
  0x17   : > { %463 = vmatpush.bf16.msra.mxu2 %v744_v8 }
  0x18   : > { %v265_v30 = vrot.slane %v263_v24, 1  ;;  %v411_v36 = vrot.slane %v410_v33, 1 }
  0x19   : > { %319 = vmatpush.bf16.msra.mxu0 %v735_v9 }
  0x1a   : > { %380 = vmatpush.bf16.msra.mxu1 %v727_v10  ;;  %v266_v35 = vor.u32 %v265_v30, %v261_v29 }
  0x1b   : > { %464 = vmatpush.bf16.msra.mxu2 %v743_v13 }
  0x1d   : > { %320 = vmatpush.bf16.msra.mxu0 %v734_v16 }
  0x1e   : > { %381 = vmatpush.bf16.msra.mxu1 %v726_v17 }
  0x1f   : > { %465 = vmatpush.bf16.msra.mxu2 %v742_v18 }
  0x21   : > { %321 = vmatpush.bf16.msra.mxu0 %v733_v20 }
  0x22   : > { %382 = vmatpush.bf16.msra.mxu1 %v725_v21 }
  0x23   : > { %466 = vmatpush.bf16.msra.mxu2 %v741_v22 }
  0x25   : > { %322 = vmatpush.bf16.msra.mxu0 %v732_v25 }
  0x26   : > { %383 = vmatpush.bf16.msra.mxu1 %v724_v26 }
  0x27   : > { %467 = vmatpush.bf16.msra.mxu2 %v740_v28 }
  0x29   : > { %323 = vmatpush.bf16.msra.mxu0 %v731_v31 }
  0x2a   : > { %384 = vmatpush.bf16.msra.mxu1 %v723_v32 }
  0x2b   : > { %468 = vmatpush.bf16.msra.mxu2 %v739_v34 }
  0x2c   : > { %324 = vmatmul.bf16.vlgmr.msra.gmra.mxu0 %v266_v35 }
  0x2d   : > { %385 = vmatmul.bf16.vlgmr.msra.gmra.mxu1 %v220_v11 }
  0x2e   : > { %469 = vmatmul.bf16.vlgmr.msra.gmra.mxu2 %v411_v36 }
  0xa9   : > { %v325_v37 = vpop.f32.mrf.mxu0 }
  0xaa   : > { %v386_v38 = vpop.f32.mrf.mxu1 }
  0xab   : > { %v387_v39 = vadd.f32 %v386_v38, %v325_v37 }
  0xb1   : > { %v470_v41 = vpop.f32.mrf.mxu2  ;;  %v327_v43 = vpop.f32.mrf.mxu0 }
  0xb2   : > { %v474_v42 = vadd.f32 %v470_v41, %v387_v39  ;;  %v388_v44 = vpop.f32.mrf.mxu1 }
  0xb4   : > { %v479_v45 = vadd.f32 %v771_v40, %v474_v42 }
  0xb6   : > { %v480_v46 = vmax.f32 %v479_v45, 0.0 }
  0xb8   : > { %v481_v47 = vpack.c.bf16 %v480_v46, %v480_v46 }
  0xb9   : > { %v472_v48 = vpop.f32.mrf.mxu2 }
  0xba   : > { %482 = vst [vmem:[%s219_s27] sm:$0xf] %v481_v47 }
  0xbb PF: > { %s13_s14 = sadd.s32 1, %s794_s14   ;;  %s932_s12 = smov %s790_s13 }
  0xbc   : > { %p10_p5 = scmp.ge.s32.totalorder %s13_s14, 4   ;;  %s933_s13 = smov %s935_s15 }
  0xbe   :  { %12 = sbr.rel (!%p10_p5) target bundleno = 2 (0x2), region = 70 }

// kernel: resnet1d_forward.17
= control target key start
LH: loop header
LB: loop body
LE: loop exit
PB: predicated region body
PF: predicated region fallthrough
CT: control target
= control target key end

     0   :  { %s859_s12 = smov 0   ;;  %s861_s13 = smov 0   ;;  %s971_s0 = inlined_call_operand.vmem [shape: bf16[2,18,128], index: 0, kind: input, shape index: {}]   ;;  %s972_s1 = inlined_call_operand.vmem [shape: bf16[3,128,128], index: 1, kind: input, shape index: {}]   ;;  %s973_s2 = inlined_call_operand.vmem [shape: f32[1,128], index: 2, kind: input, shape index: {}]   ;;  %s974_s3 = inlined_call_operand.vmem [shape: bf16[2,16,128], index: 3, kind: output, shape index: {}]  }
   0x1   :  { %s863_s14 = smov 0  }
   0x2 LB: > { %s25_s15 = sadd.s32 1, %s833_s13  ;;  %p618_p0 = scmp.ge.s32.totalorder %s837_s14, 1  ;;  %s837_s14 = sphi %s863_s14, %s13_s14   ;;  %s833_s13 = sphi %s861_s13, %s976_s13   ;;  %s829_s12 = sphi %s859_s12, %s975_s12  }
   0x3   : > { %p27_p1 = scmp.ge.s32.totalorder %s25_s15, 2  ;;  %p168_p2 = scmp.lt.s32.totalorder %s837_s14, 3 }
   0x5   : > { %s978_s15 = smov (%p27_p1, %s25_s15), 0  ;;  %p169_p3 = pnand %p618_p0, %p168_p2 }
   0x6   : > { %p202_p4 = scmp.lt.s32.totalorder (!%p169_p3), %s829_s12, 1 }
   0x7   : > { %172 = sbr.rel (%p169_p3) target bundleno = 195 (0xc3), region = 32 }
   0xc   : > { %v768_v0 = vld [vmem:[%s972_s1 + $0x78] sm:$0xff]  ;;  %v767_v3 = vld [vmem:[%s972_s1 + $0x70] sm:$0xff]  ;;  %s980_s12 = smov (!%p202_p4, %s829_s12), 1  ;;  %v766_v6 = vld [vmem:[%s972_s1 + $0x68] sm:$0xff]  ;;  %vm266_vm0 = vsmask.f32 7424 }
   0xd   : > { %v760_v1 = vld [vmem:[%s972_s1 + $0x38] sm:$0xff]  ;;  %328 = vmatpush.bf16.msra.mxu0 %v768_v0  ;;  %v759_v4 = vld [vmem:[%s972_s1 + $0x30] sm:$0xff]  ;;  %s789_s28 = smul.u32 12, %s980_s12  ;;  %v758_v7 = vld [vmem:[%s972_s1 + $0x28] sm:$0xff]  ;;  %vm426_vm1 = vcmask 1046528   ;;  %s752_s24 = sshll.u32 %s980_s12, 3 }
   0xe   : > { %v776_v2 = vld [vmem:[%s972_s1 + $0xb8] sm:$0xff]  ;;  %391 = vmatpush.bf16.msra.mxu1 %v760_v1  ;;  %v775_v5 = vld [vmem:[%s972_s1 + $0xb0] sm:$0xff]  ;;  %v774_v8 = vld [vmem:[%s972_s1 + $0xa8] sm:$0xff]  ;;  %s221_s27 = scalar_lea.vmem %s974_s3, %s752_s24 }
   0xf   : > { %479 = vmatpush.bf16.msra.mxu2 %v776_v2  ;;  %s206_s10 = scalar_lea.vmem %s971_s0, %s789_s28  ;;  %v765_v9 = vld [vmem:[%s972_s1 + $0x60] sm:$0xff]  ;;  %v764_v13 = vld [vmem:[%s972_s1 + $0x58] sm:$0xff]  ;;  %v763_v18 = vld [vmem:[%s972_s1 + $0x50] sm:$0xff] }
  0x10   : > { %v757_v10 = vld [vmem:[%s972_s1 + $0x20] sm:$0xff]  ;;  %v240_v12 = vld [vmem:[%s206_s10 + $0x8] sm:$0x1]  ;;  %v756_v14 = vld [vmem:[%s972_s1 + $0x18] sm:$0xff] }
  0x11   : > { %329 = vmatpush.bf16.msra.mxu0 %v767_v3  ;;  %v773_v11 = vld [vmem:[%s972_s1 + $0xa0] sm:$0xff]  ;;  %v263_v15 = vunpack.c.l.b16 %v240_v12  ;;  %v772_v16 = vld [vmem:[%s972_s1 + $0x98] sm:$0xff]  ;;  %v755_v19 = vld [vmem:[%s972_s1 + $0x10] sm:$0xff] }
  0x12   : > { %392 = vmatpush.bf16.msra.mxu1 %v759_v4  ;;  %v778_v17 = vld [vmem:[%s206_s10] sm:$0xff]   ;;  %v771_v22 = vld [vmem:[%s972_s1 + $0x90] sm:$0xff]  ;;  %v762_v25 = vld [vmem:[%s972_s1 + $0x48] sm:$0xff] }
  0x13   : > { %480 = vmatpush.bf16.msra.mxu2 %v775_v5  ;;  %v265_v20 = vpack.c.b16 %v263_v15, %v263_v15  ;;  %v270_v21 = vshll.u32 %v778_v17, 16  ;;  %v786_v23 = vld [vmem:[%s206_s10] sm:$0xf0]  ;;  %v787_v24 = vld [vmem:[%s206_s10] sm:$0xe]  ;;  %v754_v26 = vld [vmem:[%s972_s1 + $0x8] sm:$0xff] }
  0x14   : > { %v268_v27 = vshrl.u32 %v778_v17, 16  ;;  %v770_v30 = vld [vmem:[%s972_s1 + $0x88] sm:$0xff]  ;;  %v788_v31 = vor.u32 %v787_v24, %v786_v23  ;;  %v761_v32 = vld [vmem:[%s972_s1 + $0x40] sm:$0xff] }
  0x15   : > { %330 = vmatpush.bf16.msra.mxu0 %v766_v6  ;;  %v272_v28 = vrot.slane %v270_v21, 1  ;;  %v275_v29 = vshll.u32 %v265_v20, 16  ;;  %v753_v33 = vld [vmem:[%s972_s1] sm:$0xff]  ;;  %v428_v38 = vrot.slane %v265_v20, 1 }
  0x16   : > { %393 = vmatpush.bf16.msra.mxu1 %v758_v7  ;;  %v769_v36 = vld [vmem:[%s972_s1 + $0x80] sm:$0xff]  ;;  %v427_v37 = vrot.slane %v788_v31, 1 }
  0x17   : > { %481 = vmatpush.bf16.msra.mxu2 %v774_v8  ;;  %v273_v34 = vor.u32 %v272_v28, %v268_v27  ;;  %v277_v35 = vrot.slane %v275_v29, 1  ;;  %v814_v48 = vld [vmem:[%s973_s2] ss:$0 sm:$0xff] }
  0x18   : > { %v429_v40 = vsel %vm426_vm1, %v427_v37, %v428_v38 }
  0x19   : > { %331 = vmatpush.bf16.msra.mxu0 %v765_v9  ;;  %v278_v39 = vsel %vm266_vm0, %v273_v34, %v277_v35 }
  0x1a   : > { %394 = vmatpush.bf16.msra.mxu1 %v757_v10 }
  0x1b   : > { %482 = vmatpush.bf16.msra.mxu2 %v773_v11 }
  0x1d   : > { %332 = vmatpush.bf16.msra.mxu0 %v764_v13 }
  0x1e   : > { %395 = vmatpush.bf16.msra.mxu1 %v756_v14 }
  0x1f   : > { %483 = vmatpush.bf16.msra.mxu2 %v772_v16 }
  0x21   : > { %333 = vmatpush.bf16.msra.mxu0 %v763_v18 }
  0x22   : > { %396 = vmatpush.bf16.msra.mxu1 %v755_v19 }
  0x23   : > { %484 = vmatpush.bf16.msra.mxu2 %v771_v22 }
  0x25   : > { %334 = vmatpush.bf16.msra.mxu0 %v762_v25 }
  0x26   : > { %397 = vmatpush.bf16.msra.mxu1 %v754_v26 }
  0x27   : > { %485 = vmatpush.bf16.msra.mxu2 %v770_v30 }
  0x29   : > { %335 = vmatpush.bf16.msra.mxu0 %v761_v32 }
  0x2a   : > { %398 = vmatpush.bf16.msra.mxu1 %v753_v33 }
  0x2b   : > { %486 = vmatpush.bf16.msra.mxu2 %v769_v36 }
  0x2c   : > { %336 = vmatmul.bf16.vlgmr.msra.gmra.mxu0 %v278_v39 }
  0x2d   : > { %399 = vmatmul.bf16.vlgmr.msra.gmra.mxu1 %v778_v17 }
  0x2e   : > { %487 = vmatmul.bf16.vlgmr.msra.gmra.mxu2 %v429_v40 }
  0xa9   : > { %v337_v41 = vpop.f32.mrf.mxu0 }
  0xaa   : > { %v400_v42 = vpop.f32.mrf.mxu1 }
  0xab   : > { %v401_v44 = vadd.f32 %v400_v42, %v337_v41 }
  0xb1   : > { %v488_v43 = vpop.f32.mrf.mxu2  ;;  %v339_v45 = vpop.f32.mrf.mxu0 }
  0xb2   : > { %v402_v46 = vpop.f32.mrf.mxu1  ;;  %v493_v47 = vadd.f32 %v488_v43, %v401_v44 }
  0xb3   : > { %v403_v49 = vadd.f32 %v402_v46, %v339_v45 }
  0xb4   : > { %v499_v51 = vadd.f32 %v814_v48, %v493_v47 }
  0xb6   : > { %v501_v54 = vmax.f32 %v499_v51, 0.0 }
  0xb9   : > { %v490_v50 = vpop.f32.mrf.mxu2 }
  0xba   : > { %v494_v52 = vadd.f32 %v490_v50, %v403_v49 }
  0xbc   : > { %v500_v53 = vadd.f32 %v814_v48, %v494_v52 }
  0xbe   : > { %v502_v55 = vmax.f32 %v500_v53, 0.0 }
  0xc0   : > { %v784_v56 = vpack.c.bf16 %v502_v55, %v501_v54 }
  0xc2   : > { %785 = vst [vmem:[%s221_s27] sm:$0xff] %v784_v56  }
  0xc3 PF: > { %s13_s14 = sadd.s32 1, %s837_s14   ;;  %s975_s12 = smov %s833_s13 }
  0xc4   : > { %p10_p5 = scmp.ge.s32.totalorder %s13_s14, 4   ;;  %s976_s13 = smov %s978_s15 }
  0xc6   :  { %12 = sbr.rel (!%p10_p5) target bundleno = 2 (0x2), region = 70 }

// kernel: resnet1d_forward.20
= control target key start
LH: loop header
LB: loop body
LE: loop exit
PB: predicated region body
PF: predicated region fallthrough
CT: control target
= control target key end

     0   :  { %s895_s15 = smov 0   ;;  %s897_s16 = smov 0   ;;  %s1010_s0 = inlined_call_operand.vmem [shape: bf16[2,10,128], index: 0, kind: input, shape index: {}]   ;;  %s1011_s1 = inlined_call_operand.vmem [shape: bf16[3,128,128], index: 1, kind: input, shape index: {}]   ;;  %s1012_s2 = inlined_call_operand.vmem [shape: f32[1,128], index: 2, kind: input, shape index: {}]   ;;  %s1013_s3 = inlined_call_operand.vmem [shape: bf16[2,8,128], index: 3, kind: input, shape index: {}]   ;;  %s1014_s4 = inlined_call_operand.vmem [shape: bf16[2,8,128], index: 4, kind: output, shape index: {}]  }
   0x1   :  { %s899_s17 = smov 0  }
   0x2 LB: > { %s26_s18 = sadd.s32 1, %s864_s16  ;;  %p661_p0 = scmp.ge.s32.totalorder %s868_s17, 1  ;;  %s868_s17 = sphi %s899_s17, %s14_s17   ;;  %s864_s16 = sphi %s897_s16, %s1016_s16   ;;  %s860_s15 = sphi %s895_s15, %s1015_s15  }
   0x3   : > { %p28_p1 = scmp.ge.s32.totalorder %s26_s18, 2  ;;  %p207_p2 = scmp.lt.s32.totalorder %s868_s17, 3 }
   0x5   : > { %s1018_s18 = smov (%p28_p1, %s26_s18), 0  ;;  %p208_p3 = pnand %p661_p0, %p207_p2 }
   0x6   : > { %p249_p4 = scmp.lt.s32.totalorder (!%p208_p3), %s860_s15, 1 }
   0x7   : > { %211 = sbr.rel (%p208_p3) target bundleno = 189 (0xbd), region = 36 }
   0xc   : > { %v812_v0 = vld [vmem:[%s1011_s1 + $0x78] sm:$0xff]  ;;  %v811_v3 = vld [vmem:[%s1011_s1 + $0x70] sm:$0xff]  ;;  %s1020_s15 = smov (!%p249_p4, %s860_s15), 1  ;;  %v810_v6 = vld [vmem:[%s1011_s1 + $0x68] sm:$0xff] }
   0xd   : > { %v804_v1 = vld [vmem:[%s1011_s1 + $0x38] sm:$0xff]  ;;  %371 = vmatpush.bf16.msra.mxu0 %v812_v0  ;;  %v803_v4 = vld [vmem:[%s1011_s1 + $0x30] sm:$0xff]  ;;  %s796_s5 = sshll.u32 %s1020_s15, 3  ;;  %v802_v7 = vld [vmem:[%s1011_s1 + $0x28] sm:$0xff]  ;;  %s664_s27 = sshll.u32 %s1020_s15, 2 }
   0xe   : > { %v820_v2 = vld [vmem:[%s1011_s1 + $0xb8] sm:$0xff]  ;;  %432 = vmatpush.bf16.msra.mxu1 %v804_v1  ;;  %v819_v5 = vld [vmem:[%s1011_s1 + $0xb0] sm:$0xff]  ;;  %v818_v8 = vld [vmem:[%s1011_s1 + $0xa8] sm:$0xff]  ;;  %s253_s14 = scalar_lea.vmem %s1010_s0, %s796_s5  ;;  %s267_s30 = scalar_lea.vmem %s1013_s3, %s664_s27 }
   0xf   : > { %516 = vmatpush.bf16.msra.mxu2 %v820_v2  ;;  %v809_v9 = vld [vmem:[%s1011_s1 + $0x60] sm:$0xff]  ;;  %v808_v16 = vld [vmem:[%s1011_s1 + $0x58] sm:$0xff]  ;;  %v807_v20 = vld [vmem:[%s1011_s1 + $0x50] sm:$0xff]  ;;  %s274_s8 = scalar_lea.vmem %s1014_s4, %s664_s27 }
  0x10   : > { %v801_v10 = vld [vmem:[%s1011_s1 + $0x20] sm:$0xff]  ;;  %v800_v17 = vld [vmem:[%s1011_s1 + $0x18] sm:$0xff]  ;;  %v799_v21 = vld [vmem:[%s1011_s1 + $0x10] sm:$0xff] }
  0x11   : > { %372 = vmatpush.bf16.msra.mxu0 %v811_v3  ;;  %v275_v11 = vld [vmem:[%s253_s14] sm:$0xf]  ;;  %v292_v12 = vld [vmem:[%s253_s14 + $0x4] sm:$0x1]  ;;  %v816_v18 = vld [vmem:[%s1011_s1 + $0x98] sm:$0xff] }
  0x12   : > { %433 = vmatpush.bf16.msra.mxu1 %v803_v4  ;;  %v817_v13 = vld [vmem:[%s1011_s1 + $0xa0] sm:$0xff]  ;;  %v312_v14 = vunpack.c.l.b16 %v275_v11  ;;  %v313_v15 = vunpack.c.l.b16 %v292_v12  ;;  %v815_v22 = vld [vmem:[%s1011_s1 + $0x90] sm:$0xff]  ;;  %v806_v25 = vld [vmem:[%s1011_s1 + $0x48] sm:$0xff] }
  0x13   : > { %517 = vmatpush.bf16.msra.mxu2 %v819_v5  ;;  %v445_v23 = vld [vmem:[%s253_s14] sm:$0xe]  ;;  %v798_v26 = vld [vmem:[%s1011_s1 + $0x8] sm:$0xff]  ;;  %v845_v41 = vld [vmem:[%s1012_s2] ss:$0 sm:$0xff] }
  0x14   : > { %v314_v19 = vpack.c.b16 %v313_v15, %v312_v14  ;;  %v464_v27 = vunpack.c.l.b16 %v445_v23  ;;  %v814_v28 = vld [vmem:[%s1011_s1 + $0x88] sm:$0xff]  ;;  %v805_v31 = vld [vmem:[%s1011_s1 + $0x40] sm:$0xff] }
  0x15   : > { %373 = vmatpush.bf16.msra.mxu0 %v810_v6  ;;  %v797_v32 = vld [vmem:[%s1011_s1] sm:$0xff] }
  0x16   : > { %434 = vmatpush.bf16.msra.mxu1 %v802_v7  ;;  %v318_v24 = vshll.u32 %v314_v19, 16  ;;  %v316_v29 = vshrl.u32 %v314_v19, 16  ;;  %v465_v33 = vpack.c.b16 %v313_v15, %v464_v27  ;;  %v813_v34 = vld [vmem:[%s1011_s1 + $0x80] sm:$0xff] }
  0x17   : > { %518 = vmatpush.bf16.msra.mxu2 %v818_v8  ;;  %v535_v40 = vld [vmem:[%s267_s30] sm:$0xf] }
  0x18   : > { %v320_v30 = vrot.slane %v318_v24, 1  ;;  %v466_v36 = vrot.slane %v465_v33, 1  ;;  %v536_v44 = vunpack.c.l.bf16 %v535_v40 }
  0x19   : > { %374 = vmatpush.bf16.msra.mxu0 %v809_v9 }
  0x1a   : > { %435 = vmatpush.bf16.msra.mxu1 %v801_v10  ;;  %v321_v35 = vor.u32 %v320_v30, %v316_v29 }
  0x1b   : > { %519 = vmatpush.bf16.msra.mxu2 %v817_v13 }
  0x1d   : > { %375 = vmatpush.bf16.msra.mxu0 %v808_v16 }
  0x1e   : > { %436 = vmatpush.bf16.msra.mxu1 %v800_v17 }
  0x1f   : > { %520 = vmatpush.bf16.msra.mxu2 %v816_v18 }
  0x21   : > { %376 = vmatpush.bf16.msra.mxu0 %v807_v20 }
  0x22   : > { %437 = vmatpush.bf16.msra.mxu1 %v799_v21 }
  0x23   : > { %521 = vmatpush.bf16.msra.mxu2 %v815_v22 }
  0x25   : > { %377 = vmatpush.bf16.msra.mxu0 %v806_v25 }
  0x26   : > { %438 = vmatpush.bf16.msra.mxu1 %v798_v26 }
  0x27   : > { %522 = vmatpush.bf16.msra.mxu2 %v814_v28 }
  0x29   : > { %378 = vmatpush.bf16.msra.mxu0 %v805_v31 }
  0x2a   : > { %439 = vmatpush.bf16.msra.mxu1 %v797_v32 }
  0x2b   : > { %523 = vmatpush.bf16.msra.mxu2 %v813_v34 }
  0x2c   : > { %379 = vmatmul.bf16.vlgmr.msra.gmra.mxu0 %v321_v35 }
  0x2d   : > { %440 = vmatmul.bf16.vlgmr.msra.gmra.mxu1 %v275_v11 }
  0x2e   : > { %524 = vmatmul.bf16.vlgmr.msra.gmra.mxu2 %v466_v36 }
  0xa9   : > { %v380_v37 = vpop.f32.mrf.mxu0 }
  0xaa   : > { %v441_v38 = vpop.f32.mrf.mxu1 }
  0xab   : > { %v442_v39 = vadd.f32 %v441_v38, %v380_v37 }
  0xb1   : > { %v525_v42 = vpop.f32.mrf.mxu2  ;;  %v382_v45 = vpop.f32.mrf.mxu0 }
  0xb2   : > { %v529_v43 = vadd.f32 %v525_v42, %v442_v39  ;;  %v443_v46 = vpop.f32.mrf.mxu1 }
  0xb4   : > { %v534_v47 = vadd.f32 %v845_v41, %v529_v43 }
  0xb6   : > { %v537_v48 = vadd.f32 %v536_v44, %v534_v47 }
  0xb8   : > { %v538_v49 = vmax.f32 %v537_v48, 0.0 }
  0xb9   : > { %v527_v50 = vpop.f32.mrf.mxu2 }
  0xba   : > { %v539_v51 = vpack.c.bf16 %v538_v49, %v538_v49 }
  0xbc   : > { %540 = vst [vmem:[%s274_s8] sm:$0xf] %v539_v51 }
  0xbd PF: > { %s14_s17 = sadd.s32 1, %s868_s17   ;;  %s1015_s15 = smov %s864_s16 }
  0xbe   : > { %p11_p5 = scmp.ge.s32.totalorder %s14_s17, 4   ;;  %s1016_s16 = smov %s1018_s18 }
  0xc0   :  { %13 = sbr.rel (!%p11_p5) target bundleno = 2 (0x2), region = 77 }

// kernel: resnet1d_forward.24
= control target key start
LH: loop header
LB: loop body
LE: loop exit
PB: predicated region body
PF: predicated region fallthrough
CT: control target
= control target key end

     0   :  { %s525_s12 = smov 0   ;;  %s527_s13 = smov 0   ;;  %s585_s0 = inlined_call_operand.vmem [shape: bf16[2,4,256], index: 0, kind: input, shape index: {}]   ;;  %s586_s1 = inlined_call_operand.vmem [shape: bf16[1,128,128], index: 1, kind: input, shape index: {}]   ;;  %s587_s2 = inlined_call_operand.vmem [shape: f32[1,128], index: 2, kind: input, shape index: {}]   ;;  %s588_s3 = inlined_call_operand.vmem [shape: bf16[2,4,128], index: 3, kind: output, shape index: {}]  }
   0x1   :  { %s529_s14 = smov 0  }
   0x2 LB: > { %s25_s15 = sadd.s32 1, %s499_s13  ;;  %p409_p0 = scmp.ge.s32.totalorder %s503_s14, 1  ;;  %s503_s14 = sphi %s529_s14, %s13_s14   ;;  %s499_s13 = sphi %s527_s13, %s590_s13   ;;  %s495_s12 = sphi %s525_s12, %s589_s12  }
   0x3   : > { %p27_p1 = scmp.ge.s32.totalorder %s25_s15, 2  ;;  %p168_p2 = scmp.lt.s32.totalorder %s503_s14, 3 }
   0x5   : > { %s592_s15 = smov (%p27_p1, %s25_s15), 0  ;;  %p169_p3 = pnand %p409_p0, %p168_p2 }
   0x6   : > { %p201_p4 = scmp.lt.s32.totalorder (!%p169_p3), %s495_s12, 1 }
   0x7   : > { %172 = sbr.rel (%p169_p3) target bundleno = 178 (0xb2), region = 32 }
   0xc   : > { %v455_v0 = vld [vmem:[%s586_s1 + $0x38] sm:$0xff]  ;;  %v454_v1 = vld [vmem:[%s586_s1 + $0x30] sm:$0xff]  ;;  %v453_v2 = vld [vmem:[%s586_s1 + $0x28] sm:$0xff]  ;;  %s594_s12 = smov (!%p201_p4, %s495_s12), 1 }
   0xd   : > { %289 = vmatpush.bf16.msra.mxu0 %v455_v0  ;;  %v452_v3 = vld [vmem:[%s586_s1 + $0x20] sm:$0xff]  ;;  %v451_v4 = vld [vmem:[%s586_s1 + $0x18] sm:$0xff]  ;;  %v450_v5 = vld [vmem:[%s586_s1 + $0x10] sm:$0xff]  ;;  %s447_s30 = sshll.u32 %s594_s12, 2  ;;  %s412_s11 = sshll.u32 %s594_s12, 1 }
   0xe   : > { %v449_v6 = vld [vmem:[%s586_s1 + $0x8] sm:$0xff]  ;;  %v448_v7 = vld [vmem:[%s586_s1] sm:$0xff]  ;;  %s205_s8 = scalar_lea.vmem %s585_s0, %s447_s30  ;;  %s219_s18 = scalar_lea.vmem %s588_s3, %s412_s11 }
   0xf   : > { %v220_v8 = vld [vmem:[%s205_s8] sm:$0x3] }
  0x10   : > { %v480_v9 = vld [vmem:[%s587_s2] ss:$0 sm:$0xff] }
  0x11   : > { %290 = vmatpush.bf16.msra.mxu0 %v454_v1 }
  0x15   : > { %291 = vmatpush.bf16.msra.mxu0 %v453_v2 }
  0x19   : > { %292 = vmatpush.bf16.msra.mxu0 %v452_v3 }
  0x1d   : > { %293 = vmatpush.bf16.msra.mxu0 %v451_v4 }
  0x21   : > { %294 = vmatpush.bf16.msra.mxu0 %v450_v5 }
  0x25   : > { %295 = vmatpush.bf16.msra.mxu0 %v449_v6 }
  0x29   : > { %296 = vmatpush.bf16.msra.mxu0 %v448_v7 }
  0x2c   : > { %297 = vmatmul.bf16.vlgmr.msra.gmra.mxu0 %v220_v8 }
  0xa9   : > { %v298_v10 = vpop.f32.mrf.mxu0 }
  0xaa   : > { %v299_v11 = vadd.f32 %v480_v9, %v298_v10 }
  0xac   : > { %v302_v12 = vpack.c.bf16 %v299_v11, %v299_v11 }
  0xae   : > { %303 = vst [vmem:[%s219_s18] sm:$0x3] %v302_v12 }
  0xb1   : > { %v300_v13 = vpop.f32.mrf.mxu0 }
  0xb2 PF: > { %s13_s14 = sadd.s32 1, %s503_s14   ;;  %s589_s12 = smov %s499_s13 }
  0xb3   : > { %p10_p5 = scmp.ge.s32.totalorder %s13_s14, 4   ;;  %s590_s13 = smov %s592_s15 }
  0xb5   :  { %12 = sbr.rel (!%p10_p5) target bundleno = 2 (0x2), region = 68 }

// kernel: resnet1d_forward.23
= control target key start
LH: loop header
LB: loop body
LE: loop exit
PB: predicated region body
PF: predicated region fallthrough
CT: control target
= control target key end

     0   :  { %s809_s12 = smov 0   ;;  %s811_s13 = smov 0   ;;  %s926_s0 = inlined_call_operand.vmem [shape: bf16[2,5,256], index: 0, kind: input, shape index: {}]   ;;  %s927_s1 = inlined_call_operand.vmem [shape: bf16[3,128,128], index: 1, kind: input, shape index: {}]   ;;  %s928_s2 = inlined_call_operand.vmem [shape: f32[1,128], index: 2, kind: input, shape index: {}]   ;;  %s929_s3 = inlined_call_operand.vmem [shape: bf16[2,4,128], index: 3, kind: output, shape index: {}]  }
   0x1   :  { %s813_s14 = smov 0  }
   0x2 LB: > { %s25_s15 = sadd.s32 1, %s783_s13  ;;  %p581_p0 = scmp.ge.s32.totalorder %s787_s14, 1  ;;  %s787_s14 = sphi %s813_s14, %s13_s14   ;;  %s783_s13 = sphi %s811_s13, %s931_s13   ;;  %s779_s12 = sphi %s809_s12, %s930_s12  }
   0x3   : > { %p27_p1 = scmp.ge.s32.totalorder %s25_s15, 2  ;;  %p168_p2 = scmp.lt.s32.totalorder %s787_s14, 3 }
   0x5   : > { %s933_s15 = smov (%p27_p1, %s25_s15), 0  ;;  %p169_p3 = pnand %p581_p0, %p168_p2 }
   0x6   : > { %p201_p4 = scmp.lt.s32.totalorder (!%p169_p3), %s779_s12, 1 }
   0x7   : > { %172 = sbr.rel (%p169_p3) target bundleno = 187 (0xbb), region = 32 }
   0xc   : > { %v731_v0 = vld [vmem:[%s927_s1 + $0x78] sm:$0xff]  ;;  %v730_v3 = vld [vmem:[%s927_s1 + $0x70] sm:$0xff]  ;;  %s935_s12 = smov (!%p201_p4, %s779_s12), 1  ;;  %v729_v6 = vld [vmem:[%s927_s1 + $0x68] sm:$0xff] }
   0xd   : > { %v723_v1 = vld [vmem:[%s927_s1 + $0x38] sm:$0xff]  ;;  %303 = vmatpush.bf16.msra.mxu0 %v731_v0  ;;  %v722_v4 = vld [vmem:[%s927_s1 + $0x30] sm:$0xff]  ;;  %s715_s28 = sshll.u32 %s935_s12, 3  ;;  %v721_v7 = vld [vmem:[%s927_s1 + $0x28] sm:$0xff]  ;;  %s584_s25 = sshll.u32 %s935_s12, 1 }
   0xe   : > { %v739_v2 = vld [vmem:[%s927_s1 + $0xb8] sm:$0xff]  ;;  %364 = vmatpush.bf16.msra.mxu1 %v723_v1  ;;  %v738_v5 = vld [vmem:[%s927_s1 + $0xb0] sm:$0xff]  ;;  %v737_v8 = vld [vmem:[%s927_s1 + $0xa8] sm:$0xff]  ;;  %s860_s10 = scalar_lea.vmem %s926_s0, %s715_s28  ;;  %s219_s27 = scalar_lea.vmem %s929_s3, %s584_s25 }
   0xf   : > { %454 = vmatpush.bf16.msra.mxu2 %v739_v2  ;;  %v728_v9 = vld [vmem:[%s927_s1 + $0x60] sm:$0xff]  ;;  %v727_v13 = vld [vmem:[%s927_s1 + $0x58] sm:$0xff]  ;;  %v726_v17 = vld [vmem:[%s927_s1 + $0x50] sm:$0xff] }
  0x10   : > { %v720_v10 = vld [vmem:[%s927_s1 + $0x20] sm:$0xff]  ;;  %v719_v14 = vld [vmem:[%s927_s1 + $0x18] sm:$0xff]  ;;  %v718_v18 = vld [vmem:[%s927_s1 + $0x10] sm:$0xff] }
  0x11   : > { %304 = vmatpush.bf16.msra.mxu0 %v730_v3  ;;  %v736_v11 = vld [vmem:[%s927_s1 + $0xa0] sm:$0xff]  ;;  %v735_v16 = vld [vmem:[%s927_s1 + $0x98] sm:$0xff]  ;;  %v734_v20 = vld [vmem:[%s927_s1 + $0x90] sm:$0xff] }
  0x12   : > { %365 = vmatpush.bf16.msra.mxu1 %v722_v4  ;;  %v377_v12 = vld [vmem:[%s860_s10] sm:$0x7]  ;;  %v725_v21 = vld [vmem:[%s927_s1 + $0x48] sm:$0xff]  ;;  %v237_v30 = vld [vmem:[%s860_s10 + $0x4] sm:$0x3] }
  0x13   : > { %455 = vmatpush.bf16.msra.mxu2 %v738_v5  ;;  %v396_v15 = vunpack.c.l.b16 %v377_v12  ;;  %v717_v22 = vld [vmem:[%s927_s1 + $0x8] sm:$0xff]  ;;  %v724_v25 = vld [vmem:[%s927_s1 + $0x40] sm:$0xff] }
  0x14   : > { %v733_v24 = vld [vmem:[%s927_s1 + $0x88] sm:$0xff]  ;;  %v716_v26 = vld [vmem:[%s927_s1] sm:$0xff] }
  0x15   : > { %305 = vmatpush.bf16.msra.mxu0 %v729_v6  ;;  %v397_v19 = vpack.c.b16 %v396_v15, %v396_v15  ;;  %v732_v29 = vld [vmem:[%s927_s1 + $0x80] sm:$0xff] }
  0x16   : > { %366 = vmatpush.bf16.msra.mxu1 %v721_v7  ;;  %v220_v31 = vld [vmem:[%s860_s10] sm:$0x3] }
  0x17   : > { %456 = vmatpush.bf16.msra.mxu2 %v737_v8  ;;  %v401_v23 = vshll.u32 %v397_v19, 16  ;;  %v399_v27 = vshrl.u32 %v397_v19, 16  ;;  %v764_v36 = vld [vmem:[%s928_s2] ss:$0 sm:$0xff] }
  0x19   : > { %306 = vmatpush.bf16.msra.mxu0 %v728_v9  ;;  %v403_v28 = vrot.slane %v401_v23, 1 }
  0x1a   : > { %367 = vmatpush.bf16.msra.mxu1 %v720_v10 }
  0x1b   : > { %457 = vmatpush.bf16.msra.mxu2 %v736_v11  ;;  %v404_v32 = vor.u32 %v403_v28, %v399_v27 }
  0x1d   : > { %307 = vmatpush.bf16.msra.mxu0 %v727_v13 }
  0x1e   : > { %368 = vmatpush.bf16.msra.mxu1 %v719_v14 }
  0x1f   : > { %458 = vmatpush.bf16.msra.mxu2 %v735_v16 }
  0x21   : > { %308 = vmatpush.bf16.msra.mxu0 %v726_v17 }
  0x22   : > { %369 = vmatpush.bf16.msra.mxu1 %v718_v18 }
  0x23   : > { %459 = vmatpush.bf16.msra.mxu2 %v734_v20 }
  0x25   : > { %309 = vmatpush.bf16.msra.mxu0 %v725_v21 }
  0x26   : > { %370 = vmatpush.bf16.msra.mxu1 %v717_v22 }
  0x27   : > { %460 = vmatpush.bf16.msra.mxu2 %v733_v24 }
  0x29   : > { %310 = vmatpush.bf16.msra.mxu0 %v724_v25 }
  0x2a   : > { %371 = vmatpush.bf16.msra.mxu1 %v716_v26 }
  0x2b   : > { %461 = vmatpush.bf16.msra.mxu2 %v732_v29 }
  0x2c   : > { %311 = vmatmul.bf16.vlgmr.msra.gmra.mxu0 %v237_v30 }
  0x2d   : > { %372 = vmatmul.bf16.vlgmr.msra.gmra.mxu1 %v220_v31 }
  0x2e   : > { %462 = vmatmul.bf16.vlgmr.msra.gmra.mxu2 %v404_v32 }
  0xa9   : > { %v312_v33 = vpop.f32.mrf.mxu0 }
  0xaa   : > { %v373_v34 = vpop.f32.mrf.mxu1 }
  0xab   : > { %v374_v35 = vadd.f32 %v373_v34, %v312_v33 }
  0xb1   : > { %v463_v37 = vpop.f32.mrf.mxu2  ;;  %v314_v39 = vpop.f32.mrf.mxu0 }
  0xb2   : > { %v467_v38 = vadd.f32 %v463_v37, %v374_v35  ;;  %v375_v40 = vpop.f32.mrf.mxu1 }
  0xb4   : > { %v472_v41 = vadd.f32 %v764_v36, %v467_v38 }
  0xb6   : > { %v473_v42 = vmax.f32 %v472_v41, 0.0 }
  0xb8   : > { %v474_v43 = vpack.c.bf16 %v473_v42, %v473_v42 }
  0xb9   : > { %v465_v44 = vpop.f32.mrf.mxu2 }
  0xba   : > { %475 = vst [vmem:[%s219_s27] sm:$0x3] %v474_v43 }
  0xbb PF: > { %s13_s14 = sadd.s32 1, %s787_s14   ;;  %s930_s12 = smov %s783_s13 }
  0xbc   : > { %p10_p5 = scmp.ge.s32.totalorder %s13_s14, 4   ;;  %s931_s13 = smov %s933_s15 }
  0xbe   :  { %12 = sbr.rel (!%p10_p5) target bundleno = 2 (0x2), region = 70 }

// kernel: resnet1d_forward.25
= control target key start
LH: loop header
LB: loop body
LE: loop exit
PB: predicated region body
PF: predicated region fallthrough
CT: control target
= control target key end

     0   :  { %s888_s15 = smov 0   ;;  %s890_s16 = smov 0   ;;  %s1008_s0 = inlined_call_operand.vmem [shape: bf16[2,6,128], index: 0, kind: input, shape index: {}]   ;;  %s1009_s1 = inlined_call_operand.vmem [shape: bf16[3,128,128], index: 1, kind: input, shape index: {}]   ;;  %s1010_s2 = inlined_call_operand.vmem [shape: f32[1,128], index: 2, kind: input, shape index: {}]   ;;  %s1011_s3 = inlined_call_operand.vmem [shape: bf16[2,4,128], index: 3, kind: input, shape index: {}]   ;;  %s1012_s4 = inlined_call_operand.vmem [shape: bf16[2,4,128], index: 4, kind: output, shape index: {}]  }
   0x1   :  { %s892_s17 = smov 0  }
   0x2 LB: > { %s26_s18 = sadd.s32 1, %s857_s16  ;;  %p656_p0 = scmp.ge.s32.totalorder %s861_s17, 1  ;;  %s861_s17 = sphi %s892_s17, %s14_s17   ;;  %s857_s16 = sphi %s890_s16, %s1014_s16   ;;  %s853_s15 = sphi %s888_s15, %s1013_s15  }
   0x3   : > { %p28_p1 = scmp.ge.s32.totalorder %s26_s18, 2  ;;  %p206_p2 = scmp.lt.s32.totalorder %s861_s17, 3 }
   0x5   : > { %s1016_s18 = smov (%p28_p1, %s26_s18), 0  ;;  %p207_p3 = pnand %p656_p0, %p206_p2 }
   0x6   : > { %p247_p4 = scmp.lt.s32.totalorder (!%p207_p3), %s853_s15, 1 }
   0x7   : > { %210 = sbr.rel (%p207_p3) target bundleno = 189 (0xbd), region = 36 }
   0xc   : > { %v805_v0 = vld [vmem:[%s1009_s1 + $0x78] sm:$0xff]  ;;  %v804_v3 = vld [vmem:[%s1009_s1 + $0x70] sm:$0xff]  ;;  %s1018_s15 = smov (!%p247_p4, %s853_s15), 1  ;;  %v803_v6 = vld [vmem:[%s1009_s1 + $0x68] sm:$0xff] }
   0xd   : > { %v797_v1 = vld [vmem:[%s1009_s1 + $0x38] sm:$0xff]  ;;  %366 = vmatpush.bf16.msra.mxu0 %v805_v0  ;;  %v796_v4 = vld [vmem:[%s1009_s1 + $0x30] sm:$0xff]  ;;  %s657_s5 = sshll.u32 %s1018_s15, 2  ;;  %v795_v7 = vld [vmem:[%s1009_s1 + $0x28] sm:$0xff]  ;;  %s658_s28 = sshll.u32 %s1018_s15, 1 }
   0xe   : > { %v813_v2 = vld [vmem:[%s1009_s1 + $0xb8] sm:$0xff]  ;;  %427 = vmatpush.bf16.msra.mxu1 %v797_v1  ;;  %v812_v5 = vld [vmem:[%s1009_s1 + $0xb0] sm:$0xff]  ;;  %v811_v8 = vld [vmem:[%s1009_s1 + $0xa8] sm:$0xff]  ;;  %s939_s14 = scalar_lea.vmem %s1008_s0, %s657_s5  ;;  %s264_s5 = scalar_lea.vmem %s1011_s3, %s658_s28 }
   0xf   : > { %511 = vmatpush.bf16.msra.mxu2 %v813_v2  ;;  %v802_v9 = vld [vmem:[%s1009_s1 + $0x60] sm:$0xff]  ;;  %v801_v14 = vld [vmem:[%s1009_s1 + $0x58] sm:$0xff]  ;;  %v800_v18 = vld [vmem:[%s1009_s1 + $0x50] sm:$0xff]  ;;  %s271_s8 = scalar_lea.vmem %s1012_s4, %s658_s28 }
  0x10   : > { %v794_v10 = vld [vmem:[%s1009_s1 + $0x20] sm:$0xff]  ;;  %v793_v15 = vld [vmem:[%s1009_s1 + $0x18] sm:$0xff]  ;;  %v792_v19 = vld [vmem:[%s1009_s1 + $0x10] sm:$0xff] }
  0x11   : > { %367 = vmatpush.bf16.msra.mxu0 %v804_v3  ;;  %v289_v11 = vld [vmem:[%s939_s14] sm:$0x7]  ;;  %v809_v16 = vld [vmem:[%s1009_s1 + $0x98] sm:$0xff]  ;;  %v808_v20 = vld [vmem:[%s1009_s1 + $0x90] sm:$0xff] }
  0x12   : > { %428 = vmatpush.bf16.msra.mxu1 %v796_v4  ;;  %v810_v12 = vld [vmem:[%s1009_s1 + $0xa0] sm:$0xff]  ;;  %v308_v13 = vunpack.c.l.b16 %v289_v11  ;;  %v799_v23 = vld [vmem:[%s1009_s1 + $0x48] sm:$0xff] }
  0x13   : > { %512 = vmatpush.bf16.msra.mxu2 %v812_v5  ;;  %v440_v21 = vld [vmem:[%s939_s14] sm:$0x6]  ;;  %v791_v24 = vld [vmem:[%s1009_s1 + $0x8] sm:$0xff]  ;;  %v838_v40 = vld [vmem:[%s1010_s2] ss:$0 sm:$0xff] }
  0x14   : > { %v309_v17 = vpack.c.b16 %v308_v13, %v308_v13  ;;  %v459_v25 = vunpack.c.l.b16 %v440_v21  ;;  %v807_v26 = vld [vmem:[%s1009_s1 + $0x88] sm:$0xff]  ;;  %v798_v29 = vld [vmem:[%s1009_s1 + $0x40] sm:$0xff] }
  0x15   : > { %368 = vmatpush.bf16.msra.mxu0 %v803_v6  ;;  %v790_v30 = vld [vmem:[%s1009_s1] sm:$0xff] }
  0x16   : > { %429 = vmatpush.bf16.msra.mxu1 %v795_v7  ;;  %v313_v22 = vshll.u32 %v309_v17, 16  ;;  %v311_v27 = vshrl.u32 %v309_v17, 16  ;;  %v460_v31 = vpack.c.b16 %v459_v25, %v459_v25  ;;  %v806_v32 = vld [vmem:[%s1009_s1 + $0x80] sm:$0xff] }
  0x17   : > { %513 = vmatpush.bf16.msra.mxu2 %v811_v8  ;;  %v272_v34 = vld [vmem:[%s939_s14] sm:$0x3] }
  0x18   : > { %v315_v28 = vrot.slane %v313_v22, 1  ;;  %v461_v35 = vrot.slane %v460_v31, 1  ;;  %v530_v39 = vld [vmem:[%s264_s5] sm:$0x3] }
  0x19   : > { %369 = vmatpush.bf16.msra.mxu0 %v802_v9  ;;  %v531_v43 = vunpack.c.l.bf16 %v530_v39 }
  0x1a   : > { %430 = vmatpush.bf16.msra.mxu1 %v794_v10  ;;  %v316_v33 = vor.u32 %v315_v28, %v311_v27 }
  0x1b   : > { %514 = vmatpush.bf16.msra.mxu2 %v810_v12 }
  0x1d   : > { %370 = vmatpush.bf16.msra.mxu0 %v801_v14 }
  0x1e   : > { %431 = vmatpush.bf16.msra.mxu1 %v793_v15 }
  0x1f   : > { %515 = vmatpush.bf16.msra.mxu2 %v809_v16 }
  0x21   : > { %371 = vmatpush.bf16.msra.mxu0 %v800_v18 }
  0x22   : > { %432 = vmatpush.bf16.msra.mxu1 %v792_v19 }
  0x23   : > { %516 = vmatpush.bf16.msra.mxu2 %v808_v20 }
  0x25   : > { %372 = vmatpush.bf16.msra.mxu0 %v799_v23 }
  0x26   : > { %433 = vmatpush.bf16.msra.mxu1 %v791_v24 }
  0x27   : > { %517 = vmatpush.bf16.msra.mxu2 %v807_v26 }
  0x29   : > { %373 = vmatpush.bf16.msra.mxu0 %v798_v29 }
  0x2a   : > { %434 = vmatpush.bf16.msra.mxu1 %v790_v30 }
  0x2b   : > { %518 = vmatpush.bf16.msra.mxu2 %v806_v32 }
  0x2c   : > { %374 = vmatmul.bf16.vlgmr.msra.gmra.mxu0 %v316_v33 }
  0x2d   : > { %435 = vmatmul.bf16.vlgmr.msra.gmra.mxu1 %v272_v34 }
  0x2e   : > { %519 = vmatmul.bf16.vlgmr.msra.gmra.mxu2 %v461_v35 }
  0xa9   : > { %v375_v36 = vpop.f32.mrf.mxu0 }
  0xaa   : > { %v436_v37 = vpop.f32.mrf.mxu1 }
  0xab   : > { %v437_v38 = vadd.f32 %v436_v37, %v375_v36 }
  0xb1   : > { %v520_v41 = vpop.f32.mrf.mxu2  ;;  %v377_v44 = vpop.f32.mrf.mxu0 }
  0xb2   : > { %v524_v42 = vadd.f32 %v520_v41, %v437_v38  ;;  %v438_v45 = vpop.f32.mrf.mxu1 }
  0xb4   : > { %v529_v46 = vadd.f32 %v838_v40, %v524_v42 }
  0xb6   : > { %v532_v47 = vadd.f32 %v531_v43, %v529_v46 }
  0xb8   : > { %v533_v48 = vmax.f32 %v532_v47, 0.0 }
  0xb9   : > { %v522_v49 = vpop.f32.mrf.mxu2 }
  0xba   : > { %v534_v50 = vpack.c.bf16 %v533_v48, %v533_v48 }
  0xbc   : > { %535 = vst [vmem:[%s271_s8] sm:$0x3] %v534_v50 }
  0xbd PF: > { %s14_s17 = sadd.s32 1, %s861_s17   ;;  %s1013_s15 = smov %s857_s16 }
  0xbe   : > { %p11_p5 = scmp.ge.s32.totalorder %s14_s17, 4   ;;  %s1014_s16 = smov %s1016_s18 }
  0xc0   :  { %13 = sbr.rel (!%p11_p5) target bundleno = 2 (0x2), region = 77 }

// kernel: resnet1d_forward.26
= control target key start
LH: loop header
LB: loop body
LE: loop exit
PB: predicated region body
PF: predicated region fallthrough
CT: control target
= control target key end

     0   :  { %s809_s12 = smov 0   ;;  %s811_s13 = smov 0   ;;  %s926_s0 = inlined_call_operand.vmem [shape: bf16[2,6,128], index: 0, kind: input, shape index: {}]   ;;  %s927_s1 = inlined_call_operand.vmem [shape: bf16[3,128,128], index: 1, kind: input, shape index: {}]   ;;  %s928_s2 = inlined_call_operand.vmem [shape: f32[1,128], index: 2, kind: input, shape index: {}]   ;;  %s929_s3 = inlined_call_operand.vmem [shape: bf16[2,4,128], index: 3, kind: output, shape index: {}]  }
   0x1   :  { %s813_s14 = smov 0  }
   0x2 LB: > { %s25_s15 = sadd.s32 1, %s783_s13  ;;  %p583_p0 = scmp.ge.s32.totalorder %s787_s14, 1  ;;  %s787_s14 = sphi %s813_s14, %s13_s14   ;;  %s783_s13 = sphi %s811_s13, %s931_s13   ;;  %s779_s12 = sphi %s809_s12, %s930_s12  }
   0x3   : > { %p27_p1 = scmp.ge.s32.totalorder %s25_s15, 2  ;;  %p167_p2 = scmp.lt.s32.totalorder %s787_s14, 3 }
   0x5   : > { %s933_s15 = smov (%p27_p1, %s25_s15), 0  ;;  %p168_p3 = pnand %p583_p0, %p167_p2 }
   0x6   : > { %p199_p4 = scmp.lt.s32.totalorder (!%p168_p3), %s779_s12, 1 }
   0x7   : > { %171 = sbr.rel (%p168_p3) target bundleno = 187 (0xbb), region = 32 }
   0xc   : > { %v731_v0 = vld [vmem:[%s927_s1 + $0x78] sm:$0xff]  ;;  %v730_v3 = vld [vmem:[%s927_s1 + $0x70] sm:$0xff]  ;;  %s935_s12 = smov (!%p199_p4, %s779_s12), 1  ;;  %v729_v6 = vld [vmem:[%s927_s1 + $0x68] sm:$0xff] }
   0xd   : > { %v723_v1 = vld [vmem:[%s927_s1 + $0x38] sm:$0xff]  ;;  %311 = vmatpush.bf16.msra.mxu0 %v731_v0  ;;  %v722_v4 = vld [vmem:[%s927_s1 + $0x30] sm:$0xff]  ;;  %s584_s28 = sshll.u32 %s935_s12, 2  ;;  %v721_v7 = vld [vmem:[%s927_s1 + $0x28] sm:$0xff]  ;;  %s585_s25 = sshll.u32 %s935_s12, 1 }
   0xe   : > { %v739_v2 = vld [vmem:[%s927_s1 + $0xb8] sm:$0xff]  ;;  %372 = vmatpush.bf16.msra.mxu1 %v723_v1  ;;  %v738_v5 = vld [vmem:[%s927_s1 + $0xb0] sm:$0xff]  ;;  %v737_v8 = vld [vmem:[%s927_s1 + $0xa8] sm:$0xff]  ;;  %s860_s10 = scalar_lea.vmem %s926_s0, %s584_s28  ;;  %s216_s27 = scalar_lea.vmem %s929_s3, %s585_s25 }
   0xf   : > { %456 = vmatpush.bf16.msra.mxu2 %v739_v2  ;;  %v728_v9 = vld [vmem:[%s927_s1 + $0x60] sm:$0xff]  ;;  %v727_v14 = vld [vmem:[%s927_s1 + $0x58] sm:$0xff]  ;;  %v726_v18 = vld [vmem:[%s927_s1 + $0x50] sm:$0xff] }
  0x10   : > { %v720_v10 = vld [vmem:[%s927_s1 + $0x20] sm:$0xff]  ;;  %v719_v15 = vld [vmem:[%s927_s1 + $0x18] sm:$0xff]  ;;  %v718_v19 = vld [vmem:[%s927_s1 + $0x10] sm:$0xff] }
  0x11   : > { %312 = vmatpush.bf16.msra.mxu0 %v730_v3  ;;  %v234_v11 = vld [vmem:[%s860_s10] sm:$0x7]  ;;  %v735_v16 = vld [vmem:[%s927_s1 + $0x98] sm:$0xff]  ;;  %v734_v20 = vld [vmem:[%s927_s1 + $0x90] sm:$0xff] }
  0x12   : > { %373 = vmatpush.bf16.msra.mxu1 %v722_v4  ;;  %v736_v12 = vld [vmem:[%s927_s1 + $0xa0] sm:$0xff]  ;;  %v253_v13 = vunpack.c.l.b16 %v234_v11  ;;  %v725_v23 = vld [vmem:[%s927_s1 + $0x48] sm:$0xff] }
  0x13   : > { %457 = vmatpush.bf16.msra.mxu2 %v738_v5  ;;  %v385_v21 = vld [vmem:[%s860_s10] sm:$0x6]  ;;  %v717_v24 = vld [vmem:[%s927_s1 + $0x8] sm:$0xff]  ;;  %v764_v39 = vld [vmem:[%s928_s2] ss:$0 sm:$0xff] }
  0x14   : > { %v254_v17 = vpack.c.b16 %v253_v13, %v253_v13  ;;  %v404_v25 = vunpack.c.l.b16 %v385_v21  ;;  %v733_v26 = vld [vmem:[%s927_s1 + $0x88] sm:$0xff]  ;;  %v724_v29 = vld [vmem:[%s927_s1 + $0x40] sm:$0xff] }
  0x15   : > { %313 = vmatpush.bf16.msra.mxu0 %v729_v6  ;;  %v716_v30 = vld [vmem:[%s927_s1] sm:$0xff] }
  0x16   : > { %374 = vmatpush.bf16.msra.mxu1 %v721_v7  ;;  %v258_v22 = vshll.u32 %v254_v17, 16  ;;  %v256_v27 = vshrl.u32 %v254_v17, 16  ;;  %v405_v31 = vpack.c.b16 %v404_v25, %v404_v25  ;;  %v732_v32 = vld [vmem:[%s927_s1 + $0x80] sm:$0xff] }
  0x17   : > { %458 = vmatpush.bf16.msra.mxu2 %v737_v8  ;;  %v217_v34 = vld [vmem:[%s860_s10] sm:$0x3] }
  0x18   : > { %v260_v28 = vrot.slane %v258_v22, 1  ;;  %v406_v35 = vrot.slane %v405_v31, 1 }
  0x19   : > { %314 = vmatpush.bf16.msra.mxu0 %v728_v9 }
  0x1a   : > { %375 = vmatpush.bf16.msra.mxu1 %v720_v10  ;;  %v261_v33 = vor.u32 %v260_v28, %v256_v27 }
  0x1b   : > { %459 = vmatpush.bf16.msra.mxu2 %v736_v12 }
  0x1d   : > { %315 = vmatpush.bf16.msra.mxu0 %v727_v14 }
  0x1e   : > { %376 = vmatpush.bf16.msra.mxu1 %v719_v15 }
  0x1f   : > { %460 = vmatpush.bf16.msra.mxu2 %v735_v16 }
  0x21   : > { %316 = vmatpush.bf16.msra.mxu0 %v726_v18 }
  0x22   : > { %377 = vmatpush.bf16.msra.mxu1 %v718_v19 }
  0x23   : > { %461 = vmatpush.bf16.msra.mxu2 %v734_v20 }
  0x25   : > { %317 = vmatpush.bf16.msra.mxu0 %v725_v23 }
  0x26   : > { %378 = vmatpush.bf16.msra.mxu1 %v717_v24 }
  0x27   : > { %462 = vmatpush.bf16.msra.mxu2 %v733_v26 }
  0x29   : > { %318 = vmatpush.bf16.msra.mxu0 %v724_v29 }
  0x2a   : > { %379 = vmatpush.bf16.msra.mxu1 %v716_v30 }
  0x2b   : > { %463 = vmatpush.bf16.msra.mxu2 %v732_v32 }
  0x2c   : > { %319 = vmatmul.bf16.vlgmr.msra.gmra.mxu0 %v261_v33 }
  0x2d   : > { %380 = vmatmul.bf16.vlgmr.msra.gmra.mxu1 %v217_v34 }
  0x2e   : > { %464 = vmatmul.bf16.vlgmr.msra.gmra.mxu2 %v406_v35 }
  0xa9   : > { %v320_v36 = vpop.f32.mrf.mxu0 }
  0xaa   : > { %v381_v37 = vpop.f32.mrf.mxu1 }
  0xab   : > { %v382_v38 = vadd.f32 %v381_v37, %v320_v36 }
  0xb1   : > { %v465_v40 = vpop.f32.mrf.mxu2  ;;  %v322_v42 = vpop.f32.mrf.mxu0 }
  0xb2   : > { %v469_v41 = vadd.f32 %v465_v40, %v382_v38  ;;  %v383_v43 = vpop.f32.mrf.mxu1 }
  0xb4   : > { %v474_v44 = vadd.f32 %v764_v39, %v469_v41 }
  0xb6   : > { %v475_v45 = vmax.f32 %v474_v44, 0.0 }
  0xb8   : > { %v476_v46 = vpack.c.bf16 %v475_v45, %v475_v45 }
  0xb9   : > { %v467_v47 = vpop.f32.mrf.mxu2 }
  0xba   : > { %477 = vst [vmem:[%s216_s27] sm:$0x3] %v476_v46 }
  0xbb PF: > { %s13_s14 = sadd.s32 1, %s787_s14   ;;  %s930_s12 = smov %s783_s13 }
  0xbc   : > { %p10_p5 = scmp.ge.s32.totalorder %s13_s14, 4   ;;  %s931_s13 = smov %s933_s15 }
  0xbe   :  { %12 = sbr.rel (!%p10_p5) target bundleno = 2 (0x2), region = 70 }

// kernel: resnet1d_forward.28
= control target key start
LH: loop header
LB: loop body
LE: loop exit
PB: predicated region body
PF: predicated region fallthrough
CT: control target
= control target key end

     0   :  { %s1090_s12 = smov 0   ;;  %s1092_s13 = smov 0   ;;  %s1422_s0 = inlined_call_operand.vmem [shape: bf16[2,3,256], index: 0, kind: input, shape index: {}]   ;;  %s1423_s1 = inlined_call_operand.vmem [shape: bf16[3,128,256], index: 1, kind: input, shape index: {}]   ;;  %s1424_s2 = inlined_call_operand.vmem [shape: f32[1,256], index: 2, kind: input, shape index: {}]   ;;  %s1425_s3 = inlined_call_operand.vmem [shape: bf16[2,2,256], index: 3, kind: output, shape index: {}]  }
   0x1   :  { %s1094_s14 = smov 0  }
   0x2 LB: > { %s25_s15 = sadd.s32 1, %s1064_s13  ;;  %p743_p0 = scmp.ge.s32.totalorder %s1068_s14, 1  ;;  %s1068_s14 = sphi %s1094_s14, %s13_s14   ;;  %s1064_s13 = sphi %s1092_s13, %s1427_s13   ;;  %s1060_s12 = sphi %s1090_s12, %s1426_s12  }
   0x3   : > { %p27_p1 = scmp.ge.s32.totalorder %s25_s15, 2  ;;  %p172_p2 = scmp.lt.s32.totalorder %s1068_s14, 3 }
   0x5   : > { %s1429_s15 = smov (%p27_p1, %s25_s15), 0  ;;  %p173_p3 = pnand %p743_p0, %p172_p2 }
   0x6   : > { %p208_p4 = scmp.lt.s32.totalorder (!%p173_p3), %s1060_s12, 1 }
   0x7   : > { %176 = sbr.rel (%p173_p3) target bundleno = 217 (0xd9), region = 32 }
   0xc   : > { %v821_v0 = vld [vmem:[%s1423_s1 + $0xf0] sm:$0xf]  ;;  %v1005_v1 = vld [vmem:[%s1423_s1 + $0xf4] sm:$0xf0]  ;;  %v1004_v2 = vld [vmem:[%s1423_s1 + $0xf4] sm:$0xf] }
   0xd   : > { %v822_v3 = vor.u32 %v1005_v1, %v821_v0  ;;  %v823_v4 = vld [vmem:[%s1423_s1 + $0xf8] sm:$0xf0]  ;;  %v813_v5 = vld [vmem:[%s1423_s1 + $0xe0] sm:$0xf]  ;;  %v1003_v6 = vld [vmem:[%s1423_s1 + $0xe4] sm:$0xf0] }
   0xe   : > { %v826_v7 = vor.u32 %v1004_v2, %v823_v4  ;;  %v1002_v8 = vld [vmem:[%s1423_s1 + $0xe4] sm:$0xf]  ;;  %v815_v9 = vld [vmem:[%s1423_s1 + $0xe8] sm:$0xf0]  ;;  %v885_v10 = vld [vmem:[%s1423_s1 + $0x70] sm:$0xf]  ;;  %v814_v11 = vor.u32 %v1003_v6, %v813_v5 }
   0xf   : > { %348 = vmatpush.bf16.msra.mxu0 %v822_v3  ;;  %v989_v12 = vld [vmem:[%s1423_s1 + $0x74] sm:$0xf0]  ;;  %v988_v13 = vld [vmem:[%s1423_s1 + $0x74] sm:$0xf]  ;;  %v887_v14 = vld [vmem:[%s1423_s1 + $0x78] sm:$0xf0]  ;;  %v818_v15 = vor.u32 %v1002_v8, %v815_v9 }
  0x10   : > { %361 = vmatpush.bf16.msra.mxu1 %v826_v7  ;;  %v886_v16 = vor.u32 %v989_v12, %v885_v10  ;;  %v890_v17 = vor.u32 %v988_v13, %v887_v14  ;;  %v805_v18 = vld [vmem:[%s1423_s1 + $0xd0] sm:$0xf]  ;;  %v1001_v19 = vld [vmem:[%s1423_s1 + $0xd4] sm:$0xf0]  ;;  %v1000_v20 = vld [vmem:[%s1423_s1 + $0xd4] sm:$0xf] }
  0x11   : > { %v807_v21 = vld [vmem:[%s1423_s1 + $0xd8] sm:$0xf0]  ;;  %v877_v22 = vld [vmem:[%s1423_s1 + $0x60] sm:$0xf]  ;;  %v987_v23 = vld [vmem:[%s1423_s1 + $0x64] sm:$0xf0]  ;;  %v806_v27 = vor.u32 %v1001_v19, %v805_v18 }
  0x12   : > { %454 = vmatpush.bf16.msra.mxu2 %v886_v16  ;;  %467 = vmatpush.bf16.msra.mxu3 %v890_v17  ;;  %v878_v24 = vor.u32 %v987_v23, %v877_v22  ;;  %v986_v25 = vld [vmem:[%s1423_s1 + $0x64] sm:$0xf]  ;;  %v879_v26 = vld [vmem:[%s1423_s1 + $0x68] sm:$0xf0]  ;;  %v797_v29 = vld [vmem:[%s1423_s1 + $0xc0] sm:$0xf]  ;;  %v810_v31 = vor.u32 %v1000_v20, %v807_v21 }
  0x13   : > { %349 = vmatpush.bf16.msra.mxu0 %v814_v11  ;;  %v882_v28 = vor.u32 %v986_v25, %v879_v26  ;;  %v999_v30 = vld [vmem:[%s1423_s1 + $0xc4] sm:$0xf0]  ;;  %v869_v32 = vld [vmem:[%s1423_s1 + $0x50] sm:$0xf]  ;;  %v985_v33 = vld [vmem:[%s1423_s1 + $0x54] sm:$0xf0] }
  0x14   : > { %362 = vmatpush.bf16.msra.mxu1 %v818_v15  ;;  %v984_v34 = vld [vmem:[%s1423_s1 + $0x54] sm:$0xf]  ;;  %v998_v35 = vld [vmem:[%s1423_s1 + $0xc4] sm:$0xf]  ;;  %v799_v36 = vld [vmem:[%s1423_s1 + $0xc8] sm:$0xf0]  ;;  %v870_v38 = vor.u32 %v985_v33, %v869_v32  ;;  %v798_v41 = vor.u32 %v999_v30, %v797_v29 }
  0x15   : > { %v871_v37 = vld [vmem:[%s1423_s1 + $0x58] sm:$0xf0]  ;;  %v861_v40 = vld [vmem:[%s1423_s1 + $0x40] sm:$0xf]  ;;  %v983_v42 = vld [vmem:[%s1423_s1 + $0x44] sm:$0xf0]  ;;  %v802_v45 = vor.u32 %v998_v35, %v799_v36 }
  0x16   : > { %455 = vmatpush.bf16.msra.mxu2 %v878_v24  ;;  %468 = vmatpush.bf16.msra.mxu3 %v882_v28  ;;  %v874_v39 = vor.u32 %v984_v34, %v871_v37  ;;  %v982_v43 = vld [vmem:[%s1423_s1 + $0x44] sm:$0xf]  ;;  %v863_v44 = vld [vmem:[%s1423_s1 + $0x48] sm:$0xf0]  ;;  %v789_v46 = vld [vmem:[%s1423_s1 + $0xb0] sm:$0xf]  ;;  %v862_v50 = vor.u32 %v983_v42, %v861_v40 }
  0x17   : > { %350 = vmatpush.bf16.msra.mxu0 %v806_v27  ;;  %v997_v47 = vld [vmem:[%s1423_s1 + $0xb4] sm:$0xf0]  ;;  %v996_v48 = vld [vmem:[%s1423_s1 + $0xb4] sm:$0xf]  ;;  %v791_v49 = vld [vmem:[%s1423_s1 + $0xb8] sm:$0xf0]  ;;  %v866_v51 = vor.u32 %v982_v43, %v863_v44 }
  0x18   : > { %363 = vmatpush.bf16.msra.mxu1 %v810_v31  ;;  %v853_v52 = vld [vmem:[%s1423_s1 + $0x30] sm:$0xf]  ;;  %v790_v53 = vor.u32 %v997_v47, %v789_v46  ;;  %v981_v54 = vld [vmem:[%s1423_s1 + $0x34] sm:$0xf0]  ;;  %v980_v55 = vld [vmem:[%s1423_s1 + $0x34] sm:$0xf]  ;;  %v794_v57 = vor.u32 %v996_v48, %v791_v49 }
  0x19   : > { %v855_v56 = vld [vmem:[%s1423_s1 + $0x38] sm:$0xf0]  ;;  %v781_v58 = vld [vmem:[%s1423_s1 + $0xa0] sm:$0xf]  ;;  %v995_v59 = vld [vmem:[%s1423_s1 + $0xa4] sm:$0xf0]  ;;  %v854_v62 = vor.u32 %v981_v54, %v853_v52 }
  0x1a   : > { %456 = vmatpush.bf16.msra.mxu2 %v870_v38  ;;  %469 = vmatpush.bf16.msra.mxu3 %v874_v39  ;;  %v994_v60 = vld [vmem:[%s1423_s1 + $0xa4] sm:$0xf]  ;;  %v783_v61 = vld [vmem:[%s1423_s1 + $0xa8] sm:$0xf0]  ;;  %v858_v63 = vor.u32 %v980_v55, %v855_v56  ;;  %v845_v0 = vld [vmem:[%s1423_s1 + $0x20] sm:$0xf]  ;;  %v782_v1 = vor.u32 %v995_v59, %v781_v58 }
  0x1b   : > { %351 = vmatpush.bf16.msra.mxu0 %v798_v41  ;;  %v979_v2 = vld [vmem:[%s1423_s1 + $0x24] sm:$0xf0]  ;;  %v978_v3 = vld [vmem:[%s1423_s1 + $0x24] sm:$0xf]  ;;  %v847_v4 = vld [vmem:[%s1423_s1 + $0x28] sm:$0xf0]  ;;  %v786_v5 = vor.u32 %v994_v60, %v783_v61 }
  0x1c   : > { %364 = vmatpush.bf16.msra.mxu1 %v802_v45  ;;  %v773_v6 = vld [vmem:[%s1423_s1 + $0x90] sm:$0xf]  ;;  %v993_v7 = vld [vmem:[%s1423_s1 + $0x94] sm:$0xf0]  ;;  %v992_v8 = vld [vmem:[%s1423_s1 + $0x94] sm:$0xf]  ;;  %v846_v10 = vor.u32 %v979_v2, %v845_v0  ;;  %v850_v11 = vor.u32 %v978_v3, %v847_v4 }
  0x1d   : > { %v775_v9 = vld [vmem:[%s1423_s1 + $0x98] sm:$0xf0]  ;;  %v765_v12 = vld [vmem:[%s1423_s1 + $0x80] sm:$0xf]  ;;  %v991_v13 = vld [vmem:[%s1423_s1 + $0x84] sm:$0xf0]  ;;  %v774_v15 = vor.u32 %v993_v7, %v773_v6 }
  0x1e   : > { %457 = vmatpush.bf16.msra.mxu2 %v862_v50  ;;  %470 = vmatpush.bf16.msra.mxu3 %v866_v51  ;;  %v837_v14 = vld [vmem:[%s1423_s1 + $0x10] sm:$0xf]  ;;  %v977_v16 = vld [vmem:[%s1423_s1 + $0x14] sm:$0xf0]  ;;  %v976_v17 = vld [vmem:[%s1423_s1 + $0x14] sm:$0xf]  ;;  %v778_v19 = vor.u32 %v992_v8, %v775_v9  ;;  %v766_v29 = vor.u32 %v991_v13, %v765_v12 }
  0x1f   : > { %352 = vmatpush.bf16.msra.mxu0 %v790_v53  ;;  %v839_v18 = vld [vmem:[%s1423_s1 + $0x18] sm:$0xf0]  ;;  %v990_v20 = vld [vmem:[%s1423_s1 + $0x84] sm:$0xf]  ;;  %v767_v21 = vld [vmem:[%s1423_s1 + $0x88] sm:$0xf0]  ;;  %v838_v26 = vor.u32 %v977_v16, %v837_v14 }
  0x20   : > { %365 = vmatpush.bf16.msra.mxu1 %v794_v57  ;;  %v965_v22 = vld [vmem:[%s1423_s1 + $0x170] sm:$0xf]  ;;  %v1021_v23 = vld [vmem:[%s1423_s1 + $0x174] sm:$0xf0]  ;;  %v1020_v24 = vld [vmem:[%s1423_s1 + $0x174] sm:$0xf]  ;;  %v842_v27 = vor.u32 %v976_v17, %v839_v18  ;;  %v770_v33 = vor.u32 %v990_v20, %v767_v21 }
  0x21   : > { %v967_v25 = vld [vmem:[%s1423_s1 + $0x178] sm:$0xf0]  ;;  %v829_v28 = vld [vmem:[%s1423_s1] sm:$0xf]  ;;  %s1431_s12 = smov (!%p208_p4, %s1060_s12), 1  ;;  %v966_v34 = vor.u32 %v1021_v23, %v965_v22  ;;  %vm629_vm0 = vcmask 1040384  }
  0x22   : > { %458 = vmatpush.bf16.msra.mxu2 %v854_v62  ;;  %471 = vmatpush.bf16.msra.mxu3 %v858_v63  ;;  %v975_v30 = vld [vmem:[%s1423_s1 + $0x4] sm:$0xf0]  ;;  %v974_v31 = vld [vmem:[%s1423_s1 + $0x4] sm:$0xf]  ;;  %v831_v32 = vld [vmem:[%s1423_s1 + $0x8] sm:$0xf0]  ;;  %v970_v35 = vor.u32 %v1020_v24, %v967_v25 }
  0x23   : > { %353 = vmatpush.bf16.msra.mxu0 %v782_v1  ;;  %s973_s10 = sshll.u32 %s1431_s12, 2  ;;  %v957_v36 = vld [vmem:[%s1423_s1 + $0x160] sm:$0xf]  ;;  %v1019_v37 = vld [vmem:[%s1423_s1 + $0x164] sm:$0xf0]  ;;  %v830_v40 = vor.u32 %v975_v30, %v829_v28  ;;  %v834_v41 = vor.u32 %v974_v31, %v831_v32  ;;  %s746_s30 = sshll.u32 %s1431_s12, 1 }
  0x24   : > { %366 = vmatpush.bf16.msra.mxu1 %v786_v5  ;;  %s212_s21 = scalar_lea.vmem %s1422_s0, %s973_s10  ;;  %v1018_v38 = vld [vmem:[%s1423_s1 + $0x164] sm:$0xf]  ;;  %v959_v39 = vld [vmem:[%s1423_s1 + $0x168] sm:$0xf0]  ;;  %v958_v43 = vor.u32 %v1019_v37, %v957_v36  ;;  %v949_v46 = vld [vmem:[%s1423_s1 + $0x150] sm:$0xf]  ;;  %s231_s6 = scalar_lea.vmem %s1425_s3, %s746_s30 }
  0x25   : > { %v480_v42 = vld [vmem:[%s212_s21] sm:$0x3]  ;;  %v250_v44 = vld [vmem:[%s212_s21 + $0x2] sm:$0x1]  ;;  %v962_v45 = vor.u32 %v1018_v38, %v959_v39  ;;  %v1017_v47 = vld [vmem:[%s1423_s1 + $0x154] sm:$0xf0] }
  0x26   : > { %459 = vmatpush.bf16.msra.mxu2 %v846_v10  ;;  %472 = vmatpush.bf16.msra.mxu3 %v850_v11  ;;  %499 = vst [vmem:[#allocation1] ss:$4 sm:$0xff] %v480_v42  ;;  %v1016_v48 = vld [vmem:[%s1423_s1 + $0x154] sm:$0xf]  ;;  %v951_v49 = vld [vmem:[%s1423_s1 + $0x158] sm:$0xf0]  ;;  %v950_v51 = vor.u32 %v1017_v47, %v949_v46 }
  0x27   : > { %354 = vmatpush.bf16.msra.mxu0 %v774_v15  ;;  %v233_v50 = vld [vmem:[%s212_s21] sm:$0x1]  ;;  %v954_v52 = vor.u32 %v1016_v48, %v951_v49  ;;  %v1015_v54 = vld [vmem:[%s1423_s1 + $0x144] sm:$0xf0]  ;;  %v1014_v55 = vld [vmem:[%s1423_s1 + $0x144] sm:$0xf] }
  0x28   : > { %367 = vmatpush.bf16.msra.mxu1 %v778_v19  ;;  %v941_v53 = vld [vmem:[%s1423_s1 + $0x140] sm:$0xf]  ;;  %v943_v56 = vld [vmem:[%s1423_s1 + $0x148] sm:$0xf0]  ;;  %v933_v59 = vld [vmem:[%s1423_s1 + $0x130] sm:$0xf] }
  0x29   : > { %v942_v57 = vor.u32 %v1015_v54, %v941_v53  ;;  %v946_v58 = vor.u32 %v1014_v55, %v943_v56  ;;  %v1013_v60 = vld [vmem:[%s1423_s1 + $0x134] sm:$0xf0]  ;;  %v1012_v61 = vld [vmem:[%s1423_s1 + $0x134] sm:$0xf]  ;;  %v935_v62 = vld [vmem:[%s1423_s1 + $0x138] sm:$0xf0] }
  0x2a   : > { %460 = vmatpush.bf16.msra.mxu2 %v838_v26  ;;  %473 = vmatpush.bf16.msra.mxu3 %v842_v27  ;;  %v934_v63 = vor.u32 %v1013_v60, %v933_v59  ;;  %v938_v0 = vor.u32 %v1012_v61, %v935_v62  ;;  %v925_v1 = vld [vmem:[%s1423_s1 + $0x120] sm:$0xf]  ;;  %v1011_v2 = vld [vmem:[%s1423_s1 + $0x124] sm:$0xf0]  ;;  %v1010_v3 = vld [vmem:[%s1423_s1 + $0x124] sm:$0xf] }
  0x2b   : > { %355 = vmatpush.bf16.msra.mxu0 %v766_v29  ;;  %v927_v4 = vld [vmem:[%s1423_s1 + $0x128] sm:$0xf0]  ;;  %v926_v5 = vor.u32 %v1011_v2, %v925_v1  ;;  %v917_v8 = vld [vmem:[%s1423_s1 + $0x110] sm:$0xf]  ;;  %v1009_v9 = vld [vmem:[%s1423_s1 + $0x114] sm:$0xf0] }
  0x2c   : > { %368 = vmatpush.bf16.msra.mxu1 %v770_v33  ;;  %v930_v7 = vor.u32 %v1010_v3, %v927_v4  ;;  %v1008_v10 = vld [vmem:[%s1423_s1 + $0x114] sm:$0xf]  ;;  %v919_v11 = vld [vmem:[%s1423_s1 + $0x118] sm:$0xf0]  ;;  %v918_v13 = vor.u32 %v1009_v9, %v917_v8  ;;  %v909_v15 = vld [vmem:[%s1423_s1 + $0x100] sm:$0xf] }
  0x2d   : > { %v500_v6 = vld.sshfl [vmem:[#allocation1] sm:$0xff pattern:$0x73625140]  ;;  %v922_v14 = vor.u32 %v1008_v10, %v919_v11  ;;  %v1007_v16 = vld [vmem:[%s1423_s1 + $0x104] sm:$0xf0] }
  0x2e   : > { %461 = vmatpush.bf16.msra.mxu2 %v830_v40  ;;  %474 = vmatpush.bf16.msra.mxu3 %v834_v41  ;;  %v503_v12 = vshll.u32 %v500_v6, 16  ;;  %v1006_v17 = vld [vmem:[%s1423_s1 + $0x104] sm:$0xf]  ;;  %v911_v18 = vld [vmem:[%s1423_s1 + $0x108] sm:$0xf0]  ;;  %v501_v19 = vshrl.u32 %v500_v6, 16  ;;  %v910_v21 = vor.u32 %v1007_v16, %v909_v15 }
  0x2f   : > { %588 = vmatpush.bf16.msrb.mxu0 %v966_v34  ;;  %369 = vmatmul.bf16.vlgmr.msra.gmra.mxu1 %v250_v44  ;;  %v914_v22 = vor.u32 %v1006_v17, %v911_v18  ;;  %v616_v32 = vld [vmem:[%s1424_s2] sm:$0x3] }
  0x30   : > { %601 = vmatpush.bf16.msrb.mxu1 %v970_v35  ;;  %356 = vmatmul.bf16.vlgmr.msra.gmra.mxu0 %v250_v44  ;;  %v505_v20 = vrot.slane %v503_v12, 1  ;;  %v618_v34 = vperm.slane %v616_v32, 0  ;;  %v619_v37 = vperm.slane %v616_v32, 1 }
  0x31   : > { %462 = vmatmul.bf16.vlgmr.msra.gmra.mxu2 %v233_v50  ;;  %475 = vmatmul.bf16.vlgmr.msra.gmra.mxu3 %v233_v50 }
  0x32   : > { %v506_v23 = vor.u32 %v505_v20, %v501_v19 }
  0x33   : > { %589 = vmatpush.bf16.msrb.mxu0 %v958_v43 }
  0x34   : > { %602 = vmatpush.bf16.msrb.mxu1 %v962_v45 }
  0x37   : > { %590 = vmatpush.bf16.msrb.mxu0 %v950_v51 }
  0x38   : > { %603 = vmatpush.bf16.msrb.mxu1 %v954_v52 }
  0x3b   : > { %591 = vmatpush.bf16.msrb.mxu0 %v942_v57 }
  0x3c   : > { %604 = vmatpush.bf16.msrb.mxu1 %v946_v58 }
  0x3f   : > { %592 = vmatpush.bf16.msrb.mxu0 %v934_v63 }
  0x40   : > { %605 = vmatpush.bf16.msrb.mxu1 %v938_v0 }
  0x43   : > { %593 = vmatpush.bf16.msrb.mxu0 %v926_v5 }
  0x44   : > { %606 = vmatpush.bf16.msrb.mxu1 %v930_v7 }
  0x47   : > { %594 = vmatpush.bf16.msrb.mxu0 %v918_v13 }
  0x48   : > { %607 = vmatpush.bf16.msrb.mxu1 %v922_v14 }
  0x4b   : > { %595 = vmatpush.bf16.msrb.mxu0 %v910_v21 }
  0x4c   : > { %608 = vmatpush.bf16.msrb.mxu1 %v914_v22 }
  0x4e   : > { %596 = vmatmul.bf16.vlgmr.msrb.gmra.mxu0 %v506_v23 }
  0x4f   : > { %609 = vmatmul.bf16.vlgmr.msrb.gmra.mxu1 %v506_v23 }
  0xac   : > { %v370_v25 = vpop.f32.mrf.mxu1 }
  0xad   : > { %v357_v24 = vpop.f32.mrf.mxu0 }
  0xb4   : > { %v372_v27 = vpop.f32.mrf.mxu1  ;;  %v463_v28 = vpop.f32.mrf.mxu2 }
  0xb5   : > { %v359_v26 = vpop.f32.mrf.mxu0  ;;  %v476_v29 = vpop.f32.mrf.mxu3  ;;  %v464_v33 = vadd.f32 %v463_v28, %v357_v24 }
  0xb6   : > { %v477_v35 = vadd.f32 %v476_v29, %v370_v25 }
  0xbc   : > { %v465_v30 = vpop.f32.mrf.mxu2 }
  0xbd   : > { %v478_v31 = vpop.f32.mrf.mxu3 }
  0xcb   : > { %v597_v36 = vpop.f32.mrf.mxu0 }
  0xcc   : > { %v614_v38 = vadd.f32 %v597_v36, %v464_v33  ;;  %v610_v39 = vpop.f32.mrf.mxu1 }
  0xcd   : > { %v615_v40 = vadd.f32 %v610_v39, %v477_v35 }
  0xce   : > { %v622_v41 = vadd.f32 %v618_v34, %v614_v38 }
  0xcf   : > { %v623_v42 = vadd.f32 %v619_v37, %v615_v40 }
  0xd0   : > { %v624_v43 = vmax.f32 %v622_v41, 0.0 }
  0xd1   : > { %v625_v44 = vmax.f32 %v623_v42, 0.0 }
  0xd3   : > { %v626_v45 = vpack.c.bf16 %v625_v44, %v624_v43  ;;  %v599_v46 = vpop.f32.mrf.mxu0 }
  0xd4   : > { %v612_v47 = vpop.f32.mrf.mxu1 }
  0xd5   : > { %v628_v48 = vrot.slane %v626_v45, 3 }
  0xd7   : > { %v632_v49 = vsel %vm629_vm0, %v626_v45, %v628_v48 }
  0xd8   : > { %634 = vst [vmem:[%s231_s6] sm:$0x3] %v632_v49 }
  0xd9 PF: > { %s13_s14 = sadd.s32 1, %s1068_s14   ;;  %s1426_s12 = smov %s1064_s13 }
  0xda   : > { %p10_p5 = scmp.ge.s32.totalorder %s13_s14, 4   ;;  %s1427_s13 = smov %s1429_s15 }
  0xdc   :  { %12 = sbr.rel (!%p10_p5) target bundleno = 2 (0x2), region = 70 }

// kernel: resnet1d_forward.29
= control target key start
LH: loop header
LB: loop body
LE: loop exit
PB: predicated region body
PF: predicated region fallthrough
CT: control target
= control target key end

     0   :  { %s629_s12 = smov 0   ;;  %s631_s13 = smov 0   ;;  %s768_s0 = inlined_call_operand.vmem [shape: bf16[2,2,256], index: 0, kind: input, shape index: {}]   ;;  %s769_s1 = inlined_call_operand.vmem [shape: bf16[1,128,256], index: 1, kind: input, shape index: {}]   ;;  %s770_s2 = inlined_call_operand.vmem [shape: f32[1,256], index: 2, kind: input, shape index: {}]   ;;  %s771_s3 = inlined_call_operand.vmem [shape: bf16[2,2,256], index: 3, kind: output, shape index: {}]  }
   0x1   :  { %s633_s14 = smov 0  }
   0x2 LB: > { %s25_s15 = sadd.s32 1, %s603_s13  ;;  %p476_p0 = scmp.ge.s32.totalorder %s607_s14, 1  ;;  %s607_s14 = sphi %s633_s14, %s13_s14   ;;  %s603_s13 = sphi %s631_s13, %s773_s13   ;;  %s599_s12 = sphi %s629_s12, %s772_s12  }
   0x3   : > { %p27_p1 = scmp.ge.s32.totalorder %s25_s15, 2  ;;  %p171_p2 = scmp.lt.s32.totalorder %s607_s14, 3 }
   0x5   : > { %s775_s15 = smov (%p27_p1, %s25_s15), 0  ;;  %p172_p3 = pnand %p476_p0, %p171_p2 }
   0x6   : > { %p206_p4 = scmp.lt.s32.totalorder (!%p172_p3), %s599_s12, 1 }
   0x7   : > { %175 = sbr.rel (%p172_p3) target bundleno = 181 (0xb5), region = 32 }
   0xc   : > { %v537_v0 = vld [vmem:[%s769_s1 + $0x70] sm:$0xf]  ;;  %v560_v1 = vld [vmem:[%s769_s1 + $0x74] sm:$0xf0]  ;;  %v559_v2 = vld [vmem:[%s769_s1 + $0x74] sm:$0xf] }
   0xd   : > { %v538_v3 = vor.u32 %v560_v1, %v537_v0  ;;  %v539_v4 = vld [vmem:[%s769_s1 + $0x78] sm:$0xf0]  ;;  %v529_v5 = vld [vmem:[%s769_s1 + $0x60] sm:$0xf]  ;;  %v558_v6 = vld [vmem:[%s769_s1 + $0x64] sm:$0xf0] }
   0xe   : > { %v542_v7 = vor.u32 %v559_v2, %v539_v4  ;;  %v557_v8 = vld [vmem:[%s769_s1 + $0x64] sm:$0xf]  ;;  %v531_v9 = vld [vmem:[%s769_s1 + $0x68] sm:$0xf0]  ;;  %v530_v10 = vor.u32 %v558_v6, %v529_v5  ;;  %v521_v12 = vld [vmem:[%s769_s1 + $0x50] sm:$0xf] }
   0xf   : > { %333 = vmatpush.bf16.msra.mxu0 %v538_v3  ;;  %v534_v11 = vor.u32 %v557_v8, %v531_v9  ;;  %v556_v13 = vld [vmem:[%s769_s1 + $0x54] sm:$0xf0]  ;;  %v555_v14 = vld [vmem:[%s769_s1 + $0x54] sm:$0xf]  ;;  %v523_v15 = vld [vmem:[%s769_s1 + $0x58] sm:$0xf0] }
  0x10   : > { %346 = vmatpush.bf16.msra.mxu1 %v542_v7  ;;  %v522_v16 = vor.u32 %v556_v13, %v521_v12  ;;  %v526_v17 = vor.u32 %v555_v14, %v523_v15  ;;  %v513_v18 = vld [vmem:[%s769_s1 + $0x40] sm:$0xf]  ;;  %v554_v19 = vld [vmem:[%s769_s1 + $0x44] sm:$0xf0]  ;;  %v553_v20 = vld [vmem:[%s769_s1 + $0x44] sm:$0xf] }
  0x11   : > { %v515_v21 = vld [vmem:[%s769_s1 + $0x48] sm:$0xf0]  ;;  %v514_v22 = vor.u32 %v554_v19, %v513_v18  ;;  %v505_v24 = vld [vmem:[%s769_s1 + $0x30] sm:$0xf]  ;;  %v552_v25 = vld [vmem:[%s769_s1 + $0x34] sm:$0xf0] }
  0x12   : > { %v518_v23 = vor.u32 %v553_v20, %v515_v21  ;;  %v551_v26 = vld [vmem:[%s769_s1 + $0x34] sm:$0xf]  ;;  %v507_v27 = vld [vmem:[%s769_s1 + $0x38] sm:$0xf0]  ;;  %v506_v28 = vor.u32 %v552_v25, %v505_v24  ;;  %v497_v30 = vld [vmem:[%s769_s1 + $0x20] sm:$0xf] }
  0x13   : > { %334 = vmatpush.bf16.msra.mxu0 %v530_v10  ;;  %v510_v29 = vor.u32 %v551_v26, %v507_v27  ;;  %v550_v31 = vld [vmem:[%s769_s1 + $0x24] sm:$0xf0]  ;;  %v549_v32 = vld [vmem:[%s769_s1 + $0x24] sm:$0xf]  ;;  %v499_v33 = vld [vmem:[%s769_s1 + $0x28] sm:$0xf0] }
  0x14   : > { %347 = vmatpush.bf16.msra.mxu1 %v534_v11  ;;  %v498_v34 = vor.u32 %v550_v31, %v497_v30  ;;  %v502_v35 = vor.u32 %v549_v32, %v499_v33  ;;  %v489_v36 = vld [vmem:[%s769_s1 + $0x10] sm:$0xf]  ;;  %v548_v37 = vld [vmem:[%s769_s1 + $0x14] sm:$0xf0]  ;;  %v547_v38 = vld [vmem:[%s769_s1 + $0x14] sm:$0xf] }
  0x15   : > { %v491_v39 = vld [vmem:[%s769_s1 + $0x18] sm:$0xf0]  ;;  %s777_s12 = smov (!%p206_p4, %s599_s12), 1  ;;  %v490_v40 = vor.u32 %v548_v37, %v489_v36  ;;  %v481_v42 = vld [vmem:[%s769_s1] sm:$0xf]  ;;  %vm362_vm0 = vcmask 1040384  }
  0x16   : > { %v494_v41 = vor.u32 %v547_v38, %v491_v39  ;;  %v546_v43 = vld [vmem:[%s769_s1 + $0x4] sm:$0xf0]  ;;  %v545_v44 = vld [vmem:[%s769_s1 + $0x4] sm:$0xf]  ;;  %v483_v45 = vld [vmem:[%s769_s1 + $0x8] sm:$0xf0] }
  0x17   : > { %335 = vmatpush.bf16.msra.mxu0 %v522_v16  ;;  %s477_s7 = sshll.u32 %s777_s12, 1  ;;  %v482_v46 = vor.u32 %v546_v43, %v481_v42  ;;  %v486_v47 = vor.u32 %v545_v44, %v483_v45  ;;  %v247_v49 = vld [vmem:[%s770_s2] sm:$0x3] }
  0x18   : > { %348 = vmatpush.bf16.msra.mxu1 %v526_v17  ;;  %s209_s10 = scalar_lea.vmem %s768_s0, %s477_s7  ;;  %v249_v50 = vperm.slane %v247_v49, 0  ;;  %v250_v51 = vperm.slane %v247_v49, 1  ;;  %s228_s18 = scalar_lea.vmem %s771_s3, %s477_s7 }
  0x19   : > { %v230_v48 = vld [vmem:[%s209_s10] sm:$0x1] }
  0x1b   : > { %336 = vmatpush.bf16.msra.mxu0 %v514_v22 }
  0x1c   : > { %349 = vmatpush.bf16.msra.mxu1 %v518_v23 }
  0x1f   : > { %337 = vmatpush.bf16.msra.mxu0 %v506_v28 }
  0x20   : > { %350 = vmatpush.bf16.msra.mxu1 %v510_v29 }
  0x23   : > { %338 = vmatpush.bf16.msra.mxu0 %v498_v34 }
  0x24   : > { %351 = vmatpush.bf16.msra.mxu1 %v502_v35 }
  0x27   : > { %339 = vmatpush.bf16.msra.mxu0 %v490_v40 }
  0x28   : > { %352 = vmatpush.bf16.msra.mxu1 %v494_v41 }
  0x2b   : > { %340 = vmatpush.bf16.msra.mxu0 %v482_v46 }
  0x2c   : > { %353 = vmatpush.bf16.msra.mxu1 %v486_v47 }
  0x2e   : > { %341 = vmatmul.bf16.vlgmr.msra.gmra.mxu0 %v230_v48 }
  0x2f   : > { %354 = vmatmul.bf16.vlgmr.msra.gmra.mxu1 %v230_v48 }
  0xab   : > { %v342_v52 = vpop.f32.mrf.mxu0 }
  0xac   : > { %v343_v53 = vadd.f32 %v342_v52, %v249_v50  ;;  %v355_v54 = vpop.f32.mrf.mxu1 }
  0xad   : > { %v356_v55 = vadd.f32 %v355_v54, %v250_v51 }
  0xaf   : > { %v359_v56 = vpack.c.bf16 %v356_v55, %v343_v53 }
  0xb1   : > { %v361_v57 = vrot.slane %v359_v56, 3 }
  0xb3   : > { %v365_v58 = vsel %vm362_vm0, %v359_v56, %v361_v57  ;;  %v344_v59 = vpop.f32.mrf.mxu0 }
  0xb4   : > { %367 = vst [vmem:[%s228_s18] sm:$0x3] %v365_v58  ;;  %v357_v60 = vpop.f32.mrf.mxu1 }
  0xb5 PF: > { %s13_s14 = sadd.s32 1, %s607_s14   ;;  %s772_s12 = smov %s603_s13 }
  0xb6   : > { %p10_p5 = scmp.ge.s32.totalorder %s13_s14, 4   ;;  %s773_s13 = smov %s775_s15 }
  0xb8   :  { %12 = sbr.rel (!%p10_p5) target bundleno = 2 (0x2), region = 68 }

// kernel: resnet1d_forward.33
= control target key start
LH: loop header
LB: loop body
LE: loop exit
PB: predicated region body
PF: predicated region fallthrough
CT: control target
= control target key end

     0   :  { %8 = vsyncpa [#allocation3], 0  ;;  %s686_s0 = inlined_call_operand.vmem [shape: bf16[2,2,256], index: 0, kind: input, shape index: {}]   ;;  %s687_s1 = inlined_call_operand.vmem [shape: f32[256,128], index: 1, kind: input, shape index: {}]   ;;  %s688_s2 = inlined_call_operand.vmem [shape: f32[1,128], index: 2, kind: input, shape index: {}]   ;;  %s689_s3 = inlined_call_operand.hbm [shape: f32[2,1,128], index: 3, kind: output, shape index: {}]  }
   0x1   :  { %10 = vsyncpa [#allocation3 + $0x1], 0  ;;  %s502_s12 = smov 0   ;;  %s504_s13 = smov 0  }
   0x2   :  { %s506_s14 = smov 0   ;;  %s508_s15 = smov 0  }
   0x3 LB: > { %s523_s16 = sadd.s32 4294967295, %s479_s15   ;;  %s364_s17 = sadd.s32 4294967294, %s479_s15   ;;  %s479_s15 = sphi %s508_s15, %s695_s15   ;;  %s475_s14 = sphi %s506_s14, %s694_s14   ;;  %s471_s13 = sphi %s504_s13, %s693_s13   ;;  %s467_s12 = sphi %s502_s12, %s692_s12  }
   0x4   : > { %s527_s18 = sadd.s32 1, %s479_s15   ;;  %s91_s19 = sadd.s32 1, %s475_s14 }
   0x5   : > { %s88_s20 = ssub.s32 %s479_s15, %s527_s18  ;;  %p101_p0 = scmp.ne.s32.totalorder %s475_s14, %s471_s13 }
   0x6   : > { %p89_p1 = scmp.eq.s32.totalorder %s88_s20, 0  ;;  %p102_p2 = scmp.eq.s32.totalorder %s523_s16, 1 }
   0x7   : > { %p107_p3 = scmp.ne.s32.totalorder %s471_s13, %s467_s12  ;;  %p108_p4 = scmp.eq.s32.totalorder %s364_s17, 1 }
   0x8   : > { %s538_s21 = scalar_select %p89_p1, %s475_s14, %s91_s19  }
   0x9   : > { %p540_p5 = por %p102_p2, %p101_p0  ;;  %p544_p6 = por %p108_p4, %p107_p3 }
   0xa   : > { %p367_p7 = scmp.ge.s32.totalorder %s479_s15, 1  ;;  %p139_p8 = scmp.lt.s32.totalorder %s479_s15, 3 }
   0xc   : > { %p140_p9 = pnand %p367_p7, %p139_p8 }
   0xd   : > { %p161_p10 = scmp.lt.s32.totalorder (!%p140_p9), %s523_s16, 1  ;;  %s305_s26 = scalar_lea.hbm (!%p140_p9), %s689_s3, %s523_s16 }
   0xe   : > { %143 = sbr.rel (%p140_p9) target bundleno = 448 (0x1c0), region = 32  ;;  %s309_s29 = sshll.u32 (!%p140_p9), %s305_s26, 4  ;;  %s310_s29 = int_to_ptr.hbm [resolvable:$true] %s309_s29 }
   0xf   : > { %s431_s4 = sshra.s32 (!%p140_p9), %s310_s29, 4  ;;  %s437_s7 = scalar_lea.hbm (!%p140_p9), %s689_s3, 2  ;;  %s432_s4 = int_to_ptr.hbm [resolvable:$true] %s431_s4 }
  0x10   : > { %s433_s5 = scalar_lea.hbm (!%p140_p9), %s432_s4, 1  ;;  %p438_p0 = scmp.lt.s32.totalorder (!%p140_p9), %s432_s4, %s689_s3 }
  0x11   : > { %p434_p11 = scmp.ne.s32.totalorder (!%p140_p9), %s432_s4, %s433_s5  ;;  %p439_p1 = scmp.lt.s32.totalorder (!%p140_p9), %s437_s7, %s433_s5 }
  0x13   : > { %v212_v0 = vld [vmem:[%s687_s1 + $0x78] sm:$0xff]  ;;  %v211_v1 = vld [vmem:[%s687_s1 + $0x70] sm:$0xff]  ;;  %v210_v4 = vld [vmem:[%s687_s1 + $0x68] sm:$0xff]  ;;  %s162_s9 = scalar_select %p161_p10, %s523_s16, 1  ;;  %v481_v10 = vmov 2.0   ;;  %vm173_vm0 = vcmask 1041408  }
  0x14   : > { %v228_v2 = vld [vmem:[%s687_s1 + $0xf8] sm:$0xff]  ;;  %230 = vmatpush.msra.mxu0 %v212_v0  ;;  %v227_v3 = vld [vmem:[%s687_s1 + $0xf0] sm:$0xff]  ;;  %v226_v5 = vld [vmem:[%s687_s1 + $0xe8] sm:$0xff]  ;;  %411 = vrcp.f32 %v481_v10  ;;  %vm270_vm2 = vcmask 1040384   ;;  %p435_p12 = pnand %p434_p11, %p540_p5  ;;  %p440_p2 = por %p439_p1, %p438_p0 }
  0x15   : > { %250 = vmatpush.msra.mxu1 %v228_v2  ;;  %v209_v6 = vld [vmem:[%s687_s1 + $0x60] sm:$0xff]  ;;  %s368_s20 = sshll.u32 %s162_s9, 1  ;;  %v208_v8 = vld [vmem:[%s687_s1 + $0x58] sm:$0xff]  ;;  %v207_v11 = vld [vmem:[%s687_s1 + $0x50] sm:$0xff] }
  0x16   : > { %231 = vmatpush.msra.mxu0 %v211_v1  ;;  %v225_v7 = vld [vmem:[%s687_s1 + $0xe0] sm:$0xff]  ;;  %v224_v9 = vld [vmem:[%s687_s1 + $0xd8] sm:$0xff]  ;;  %s164_s30 = scalar_lea.vmem %s686_s0, %s368_s20  ;;  %v223_v12 = vld [vmem:[%s687_s1 + $0xd0] sm:$0xff]  ;;  %s159_s20 = sand.u32 1, %s471_s13  }
  0x17   : > { %251 = vmatpush.msra.mxu1 %v227_v3  ;;  %v206_v13 = vld [vmem:[%s687_s1 + $0x48] sm:$0xff]  ;;  %v165_v15 = vld [vmem:[%s164_s30] sm:$0x3]  ;;  %v204_v20 = vld [vmem:[%s687_s1 + $0x38] sm:$0xff]  ;;  %s160_s27 = scalar_lea.vmem [#allocation2], %s159_s20  ;;  %s297_s30 = scalar_lea.sflag [#allocation3], %s159_s20 }
  0x18   : > { %232 = vmatpush.msra.mxu0 %v210_v4  ;;  %v222_v14 = vld [vmem:[%s687_s1 + $0xc8] sm:$0xff]  ;;  %v166_v16 = vunpack.c.l.bf16 %v165_v15  ;;  %v205_v18 = vld [vmem:[%s687_s1 + $0x40] sm:$0xff]  ;;  %v220_v21 = vld [vmem:[%s687_s1 + $0xb8] sm:$0xff]  ;;  %s307_s28 = sshll.u32 %s160_s27, 4  ;;  %p436_p13 = pneg %p435_p12  ;;  %s308_s28 = int_to_ptr.vmem [resolvable:$true] %s307_s28 }
  0x19   : > { %252 = vmatpush.msra.mxu1 %v226_v5  ;;  %v221_v19 = vld [vmem:[%s687_s1 + $0xc0] sm:$0xff]  ;;  %v203_v23 = vld [vmem:[%s687_s1 + $0x30] sm:$0xff]  ;;  %v202_v25 = vld [vmem:[%s687_s1 + $0x28] sm:$0xff] }
  0x1a   : > { %233 = vmatpush.msra.mxu0 %v209_v6  ;;  %v412_v17 = vpop.eup %411  ;;  %168 = vst [vmem:[#allocation1] ss:$4 sm:$0xff] %v166_v16  ;;  %v219_v24 = vld [vmem:[%s687_s1 + $0xb0] sm:$0xff]  ;;  %v218_v26 = vld [vmem:[%s687_s1 + $0xa8] sm:$0xff]  ;;  %v201_v27 = vld [vmem:[%s687_s1 + $0x20] sm:$0xff]  ;;  %p441_p3 = pnand %p440_p2, %p436_p13 }
  0x1b   : > { %253 = vmatpush.msra.mxu1 %v225_v7  ;;  %v189_v22 = vmul.f32 2.0, %v412_v17  ;;  %v217_v28 = vld [vmem:[%s687_s1 + $0xa0] sm:$0xff]  ;;  %v200_v34 = vld [vmem:[%s687_s1 + $0x18] sm:$0xff]  ;;  %v199_v39 = vld [vmem:[%s687_s1 + $0x10] sm:$0xff]  ;;  %vm193_vm1 = vweird.f32 %v412_v17 }
  0x1c   : > { %234 = vmatpush.msra.mxu0 %v208_v8  ;;  %v216_v35 = vld [vmem:[%s687_s1 + $0x98] sm:$0xff]  ;;  %v215_v40 = vld [vmem:[%s687_s1 + $0x90] sm:$0xff]  ;;  %v198_v43 = vld [vmem:[%s687_s1 + $0x8] sm:$0xff] }
  0x1d   : > { %254 = vmatpush.msra.mxu1 %v224_v9  ;;  %v190_v29 = vsub.f32 1.0, %v189_v22  ;;  %v214_v44 = vld [vmem:[%s687_s1 + $0x88] sm:$0xff]  ;;  %v197_v48 = vld [vmem:[%s687_s1] sm:$0xff] }
  0x1e   : > { %235 = vmatpush.msra.mxu0 %v207_v11  ;;  %v213_v50 = vld [vmem:[%s687_s1 + $0x80] sm:$0xff] }
  0x1f   : > { %255 = vmatpush.msra.mxu1 %v223_v12  ;;  %v191_v38 = vmul.f32 %v412_v17, %v190_v29  ;;  %v229_v59 = vld [vmem:[%s688_s2] sm:$0x1] }
  0x20   : > { %236 = vmatpush.msra.mxu0 %v206_v13 }
  0x21   : > { %256 = vmatpush.msra.mxu1 %v222_v14  ;;  %v169_v30 = vld.sshfl [vmem:[#allocation1] sm:$0xff pattern:$0x73625140]  ;;  %v170_v31 = vld.sshfl [vmem:[#allocation1 + $0x8] sm:$0xff pattern:$0x73625140]  ;;  %v192_v47 = vadd.f32 %v412_v17, %v191_v38 }
  0x22   : > { %237 = vmatpush.msra.mxu0 %v205_v18  ;;  %v174_v32 = vsel %vm173_vm0, %v169_v30, 0.0  ;;  %v181_v33 = vsel %vm173_vm0, %v170_v31, 0.0 }
  0x23   : > { %257 = vmatpush.msra.mxu1 %v221_v19  ;;  %v175_v36 = vrot.slane %v174_v32, 4  ;;  %v182_v37 = vrot.slane %v181_v33, 4  ;;  %v194_v54 = vsel %vm193_vm1, %v412_v17, %v192_v47 }
  0x24   : > { %238 = vmatpush.msra.mxu0 %v204_v20 }
  0x25   : > { %258 = vmatpush.msra.mxu1 %v220_v21  ;;  %v176_v41 = vadd.f32 %v175_v36, %v174_v32  ;;  %v183_v42 = vadd.f32 %v182_v37, %v181_v33 }
  0x26   : > { %239 = vmatpush.msra.mxu0 %v203_v23 }
  0x27   : > { %259 = vmatpush.msra.mxu1 %v219_v24  ;;  %v177_v45 = vrot.slane %v176_v41, 2  ;;  %v184_v46 = vrot.slane %v183_v42, 2 }
  0x28   : > { %240 = vmatpush.msra.mxu0 %v202_v25 }
  0x29   : > { %260 = vmatpush.msra.mxu1 %v218_v26  ;;  %v178_v49 = vadd.f32 %v177_v45, %v176_v41  ;;  %v185_v51 = vadd.f32 %v184_v46, %v183_v42 }
  0x2a   : > { %241 = vmatpush.msra.mxu0 %v201_v27 }
  0x2b   : > { %261 = vmatpush.msra.mxu1 %v217_v28  ;;  %v179_v52 = vrot.slane %v178_v49, 1  ;;  %v186_v53 = vrot.slane %v185_v51, 1 }
  0x2c   : > { %242 = vmatpush.msra.mxu0 %v200_v34 }
  0x2d   : > { %262 = vmatpush.msra.mxu1 %v216_v35  ;;  %v180_v55 = vadd.f32 %v179_v52, %v178_v49  ;;  %v187_v56 = vadd.f32 %v186_v53, %v185_v51 }
  0x2e   : > { %243 = vmatpush.msra.mxu0 %v199_v39 }
  0x2f   : > { %263 = vmatpush.msra.mxu1 %v215_v40  ;;  %v195_v57 = vmul.f32 %v194_v54, %v180_v55  ;;  %v196_v58 = vmul.f32 %v194_v54, %v187_v56 }
  0x30   : > { %244 = vmatpush.msra.mxu0 %v198_v43 }
  0x31   : > { %264 = vmatpush.msra.mxu1 %v214_v44 }
  0x32   : > { %245 = vmatpush.msra.mxu0 %v197_v48 }
  0x33   : > { %265 = vmatpush.msra.mxu1 %v213_v50  ;;  %246 = vmatmul.f32.vlgmr.msra.gmra.mxu0 %v195_v57 }
  0x34   : > { %266 = vmatmul.f32.vlgmr.msra.gmra.mxu1 %v196_v58 }
  0xb0   : > { %v247_v60 = vpop.f32.mrf.mxu0 }
  0xb1   : > { %v267_v61 = vpop.f32.mrf.mxu1  ;;  %v248_v62 = vadd.f32 %v247_v60, %v229_v59 }
  0xb3   : > { %v268_v63 = vadd.f32 %v267_v61, %v248_v62 }
  0xb5   : > { %v271_v0 = vsel %vm270_vm2, %v268_v63, -inf }
  0xb6   : > { %272 = vmax.xlane.f32.xlu0 %v271_v0 }
 0x129   : > { %v273_v1 = vpop.xlane.xlu0 %272 }
 0x12a   : > { %v274_v2 = vsub.f32 %v268_v63, %v273_v1 }
 0x12c   : > { %v275_v3 = vmul.f32 1.442695, %v274_v2 }
 0x12e   : > { %413 = vpow2.f32 %v275_v3 }
 0x134   : > { %v414_v4 = vpop.eup %413 }
 0x135   : > { %v277_v5 = vsel %vm270_vm2, %v414_v4, 0.0 }
 0x136   : > { %278 = vadd.xlane.f32.xlu0 %v277_v5 }
 0x1a9   : > { %v279_v6 = vpop.xlane.xlu0 %278 }
 0x1aa   : > { %415 = vrcp.f32 %v279_v6  ;;  %v291_v10 = vand.u32 2147483648, %v279_v6  ;;  %v289_v12 = vand.u32 2147483647, %v279_v6  ;;  %vm285_vm4 = vweird.f32 %v279_v6 }
 0x1ac   : > { %v292_v14 = vor.u32 1.1754944e-38, %v291_v10  ;;  %vm290_vm6 = vcmp.eq.f32.partialorder %v289_v12, 8.507059e+37 }
 0x1b0   : > { %v416_v7 = vpop.eup %415 }
 0x1b1   : > { %v281_v8 = vmul.f32 %v416_v7, %v279_v6  ;;  %vm286_vm3 = vweird.f32 %v416_v7 }
 0x1b2   : > { %vm287_vm5 = vmor %vm285_vm4, %vm286_vm3 }
 0x1b3   : > { %v282_v9 = vsub.f32 1.0, %v281_v8 }
 0x1b5   : > { %v283_v11 = vmul.f32 %v416_v7, %v282_v9 }
 0x1b7   : > { %v284_v13 = vadd.f32 %v416_v7, %v283_v11 }
 0x1b9   : > { %v288_v15 = vsel %vm287_vm5, %v416_v7, %v284_v13 }
 0x1ba   : > { %v293_v16 = vsel %vm290_vm6, %v292_v14, %v288_v15 }
 0x1bb   : > { %v294_v17 = vmul.f32 %v414_v4, %v293_v16 }
 0x1bd   : > { %295 = vst [vmem:[%s160_s27] sm:$0x1] %v294_v17 }
 0x1be   : > { %444 = shalt.err (!%p441_p3)
}
 0x1bf   : > { %371 = dma.vmem_to_hbm [thread:$0]  (%p540_p5), %s308_s28, 16, %s310_s29, %s297_s30  }
 0x1c0 PF: > { %p377_p4 = scmp.ge.s32.totalorder %s479_s15, 2  ;;  %s321_s10 = sand.u32 1, %s467_s12  }
 0x1c1   : > { %s322_s11 = scalar_lea.sflag [#allocation3], %s321_s10 }
 0x1c2   : > { %p374_p7 = pnand %p377_p4, %p544_p6 }
 0x1c4   : > { %p375_p8 = pneg %p374_p7 }
 0x1c6   : > { %462 = dma.done.wait (%p375_p8), %s322_s11, 16  }
 0x1c7   : > { %464 = vsyncadd (%p375_p8), %s322_s11, 4294967280  ;;  %p13_p9 = scmp.ge.s32.totalorder %s527_s18, 4   ;;  %s692_s12 = smov %s471_s13 }
 0x1c8   : > { %s693_s13 = smov %s475_s14  ;;  %s694_s14 = smov %s538_s21 }
 0x1c9   : > { %s695_s15 = smov %s527_s18  ;;  %15 = sbr.rel (!%p13_p9) target bundleno = 3 (0x3), region = 67 }
 0x1ce   :  { %327 = vsyncpa [#allocation3], 1 }
 0x1cf   :  { %329 = vsyncpa [#allocation3 + $0x1], 1 }

// kernel: resnet1d_forward.30
= control target key start
LH: loop header
LB: loop body
LE: loop exit
PB: predicated region body
PF: predicated region fallthrough
CT: control target
= control target key end

     0   :  { %s1843_s15 = smov 0   ;;  %s1845_s16 = smov 0   ;;  %s2489_s0 = inlined_call_operand.vmem [shape: bf16[2,4,256], index: 0, kind: input, shape index: {}]   ;;  %s2490_s1 = inlined_call_operand.vmem [shape: bf16[3,256,256], index: 1, kind: input, shape index: {}]   ;;  %s2491_s2 = inlined_call_operand.vmem [shape: f32[1,256], index: 2, kind: input, shape index: {}]   ;;  %s2492_s3 = inlined_call_operand.vmem [shape: bf16[2,2,256], index: 3, kind: input, shape index: {}]   ;;  %s2493_s4 = inlined_call_operand.vmem [shape: bf16[2,2,256], index: 4, kind: output, shape index: {}]  }
   0x1   :  { %s1847_s17 = smov 0  }
   0x2 LB: > { %s26_s18 = sadd.s32 1, %s1812_s16  ;;  %p1218_p0 = scmp.ge.s32.totalorder %s1816_s17, 1  ;;  %s1816_s17 = sphi %s1847_s17, %s14_s17   ;;  %s1812_s16 = sphi %s1845_s16, %s2495_s16   ;;  %s1808_s15 = sphi %s1843_s15, %s2494_s15  }
   0x3   : > { %p28_p1 = scmp.ge.s32.totalorder %s26_s18, 2  ;;  %p213_p2 = scmp.lt.s32.totalorder %s1816_s17, 3 }
   0x5   : > { %s2497_s18 = smov (%p28_p1, %s26_s18), 0  ;;  %p214_p3 = pnand %p1218_p0, %p213_p2 }
   0x6   : > { %p259_p4 = scmp.lt.s32.totalorder (!%p214_p3), %s1808_s15, 1 }
   0x7   : > { %217 = sbr.rel (%p214_p3) target bundleno = 260 (0x104), region = 36 }
   0xc   : > { %v1313_v0 = vld [vmem:[%s2490_s1 + $0x170] sm:$0xf]  ;;  %v1721_v1 = vld [vmem:[%s2490_s1 + $0x174] sm:$0xf0]  ;;  %v1720_v5 = vld [vmem:[%s2490_s1 + $0x174] sm:$0xf] }
   0xd   : > { %v1377_v2 = vld [vmem:[%s2490_s1 + $0x1f0] sm:$0xf]  ;;  %v1314_v3 = vor.u32 %v1721_v1, %v1313_v0  ;;  %v1737_v4 = vld [vmem:[%s2490_s1 + $0x1f4] sm:$0xf0]  ;;  %v1315_v6 = vld [vmem:[%s2490_s1 + $0x178] sm:$0xf0] }
   0xe   : > { %v1378_v7 = vor.u32 %v1737_v4, %v1377_v2  ;;  %v1318_v8 = vor.u32 %v1720_v5, %v1315_v6  ;;  %v1736_v9 = vld [vmem:[%s2490_s1 + $0x1f4] sm:$0xf]  ;;  %v1379_v10 = vld [vmem:[%s2490_s1 + $0x1f8] sm:$0xf0]  ;;  %v1305_v11 = vld [vmem:[%s2490_s1 + $0x160] sm:$0xf] }
   0xf   : > { %538 = vmatpush.bf16.msra.mxu0 %v1314_v3  ;;  %v1382_v12 = vor.u32 %v1736_v9, %v1379_v10  ;;  %v1719_v13 = vld [vmem:[%s2490_s1 + $0x164] sm:$0xf0]  ;;  %v1369_v14 = vld [vmem:[%s2490_s1 + $0x1e0] sm:$0xf]  ;;  %v1718_v18 = vld [vmem:[%s2490_s1 + $0x164] sm:$0xf] }
  0x10   : > { %v1735_v15 = vld [vmem:[%s2490_s1 + $0x1e4] sm:$0xf0]  ;;  %551 = vmatpush.bf16.msra.mxu1 %v1378_v7  ;;  %564 = vmatpush.bf16.msra.mxu2 %v1318_v8  ;;  %v1306_v16 = vor.u32 %v1719_v13, %v1305_v11  ;;  %v1307_v19 = vld [vmem:[%s2490_s1 + $0x168] sm:$0xf0]  ;;  %v1734_v20 = vld [vmem:[%s2490_s1 + $0x1e4] sm:$0xf] }
  0x11   : > { %v1370_v17 = vor.u32 %v1735_v15, %v1369_v14  ;;  %577 = vmatpush.bf16.msra.mxu3 %v1382_v12  ;;  %v1310_v21 = vor.u32 %v1718_v18, %v1307_v19  ;;  %v1371_v22 = vld [vmem:[%s2490_s1 + $0x1e8] sm:$0xf0]  ;;  %v1297_v23 = vld [vmem:[%s2490_s1 + $0x150] sm:$0xf]  ;;  %v1717_v24 = vld [vmem:[%s2490_s1 + $0x154] sm:$0xf0] }
  0x12   : > { %v1374_v25 = vor.u32 %v1734_v20, %v1371_v22  ;;  %v1361_v26 = vld [vmem:[%s2490_s1 + $0x1d0] sm:$0xf]  ;;  %v1733_v27 = vld [vmem:[%s2490_s1 + $0x1d4] sm:$0xf0]  ;;  %v1716_v28 = vld [vmem:[%s2490_s1 + $0x154] sm:$0xf]  ;;  %v1298_v29 = vor.u32 %v1717_v24, %v1297_v23 }
  0x13   : > { %539 = vmatpush.bf16.msra.mxu0 %v1306_v16  ;;  %v1299_v30 = vld [vmem:[%s2490_s1 + $0x158] sm:$0xf0]  ;;  %v1732_v31 = vld [vmem:[%s2490_s1 + $0x1d4] sm:$0xf]  ;;  %v1362_v33 = vor.u32 %v1733_v27, %v1361_v26  ;;  %v1289_v35 = vld [vmem:[%s2490_s1 + $0x140] sm:$0xf] }
  0x14   : > { %v1363_v32 = vld [vmem:[%s2490_s1 + $0x1d8] sm:$0xf0]  ;;  %552 = vmatpush.bf16.msra.mxu1 %v1370_v17  ;;  %565 = vmatpush.bf16.msra.mxu2 %v1310_v21  ;;  %v1302_v34 = vor.u32 %v1716_v28, %v1299_v30  ;;  %v1715_v36 = vld [vmem:[%s2490_s1 + $0x144] sm:$0xf0]  ;;  %v1353_v37 = vld [vmem:[%s2490_s1 + $0x1c0] sm:$0xf] }
  0x15   : > { %578 = vmatpush.bf16.msra.mxu3 %v1374_v25  ;;  %v1366_v38 = vor.u32 %v1732_v31, %v1363_v32  ;;  %v1731_v39 = vld [vmem:[%s2490_s1 + $0x1c4] sm:$0xf0]  ;;  %v1714_v40 = vld [vmem:[%s2490_s1 + $0x144] sm:$0xf]  ;;  %v1291_v41 = vld [vmem:[%s2490_s1 + $0x148] sm:$0xf0]  ;;  %v1290_v44 = vor.u32 %v1715_v36, %v1289_v35 }
  0x16   : > { %v1730_v42 = vld [vmem:[%s2490_s1 + $0x1c4] sm:$0xf]  ;;  %v1355_v43 = vld [vmem:[%s2490_s1 + $0x1c8] sm:$0xf0]  ;;  %v1354_v45 = vor.u32 %v1731_v39, %v1353_v37  ;;  %v1294_v46 = vor.u32 %v1714_v40, %v1291_v41  ;;  %v1281_v47 = vld [vmem:[%s2490_s1 + $0x130] sm:$0xf] }
  0x17   : > { %540 = vmatpush.bf16.msra.mxu0 %v1298_v29  ;;  %v1713_v48 = vld [vmem:[%s2490_s1 + $0x134] sm:$0xf0]  ;;  %v1345_v49 = vld [vmem:[%s2490_s1 + $0x1b0] sm:$0xf]  ;;  %v1358_v50 = vor.u32 %v1730_v42, %v1355_v43  ;;  %v1712_v52 = vld [vmem:[%s2490_s1 + $0x134] sm:$0xf] }
  0x18   : > { %553 = vmatpush.bf16.msra.mxu1 %v1362_v33  ;;  %566 = vmatpush.bf16.msra.mxu2 %v1302_v34  ;;  %v1729_v51 = vld [vmem:[%s2490_s1 + $0x1b4] sm:$0xf0]  ;;  %v1283_v53 = vld [vmem:[%s2490_s1 + $0x138] sm:$0xf0]  ;;  %v1728_v54 = vld [vmem:[%s2490_s1 + $0x1b4] sm:$0xf]  ;;  %v1282_v56 = vor.u32 %v1713_v48, %v1281_v47 }
  0x19   : > { %579 = vmatpush.bf16.msra.mxu3 %v1366_v38  ;;  %v1347_v55 = vld [vmem:[%s2490_s1 + $0x1b8] sm:$0xf0]  ;;  %v1346_v57 = vor.u32 %v1729_v51, %v1345_v49  ;;  %v1286_v58 = vor.u32 %v1712_v52, %v1283_v53  ;;  %v1273_v59 = vld [vmem:[%s2490_s1 + $0x120] sm:$0xf]  ;;  %v1711_v60 = vld [vmem:[%s2490_s1 + $0x124] sm:$0xf0] }
  0x1a   : > { %v1337_v61 = vld [vmem:[%s2490_s1 + $0x1a0] sm:$0xf]  ;;  %v1350_v62 = vor.u32 %v1728_v54, %v1347_v55  ;;  %v1727_v63 = vld [vmem:[%s2490_s1 + $0x1a4] sm:$0xf0]  ;;  %v1710_v0 = vld [vmem:[%s2490_s1 + $0x124] sm:$0xf]  ;;  %v1274_v4 = vor.u32 %v1711_v60, %v1273_v59 }
  0x1b   : > { %541 = vmatpush.bf16.msra.mxu0 %v1290_v44  ;;  %v1275_v1 = vld [vmem:[%s2490_s1 + $0x128] sm:$0xf0]  ;;  %v1726_v2 = vld [vmem:[%s2490_s1 + $0x1a4] sm:$0xf]  ;;  %v1338_v5 = vor.u32 %v1727_v63, %v1337_v61  ;;  %v1265_v7 = vld [vmem:[%s2490_s1 + $0x110] sm:$0xf] }
  0x1c   : > { %554 = vmatpush.bf16.msra.mxu1 %v1354_v45  ;;  %567 = vmatpush.bf16.msra.mxu2 %v1294_v46  ;;  %v1339_v3 = vld [vmem:[%s2490_s1 + $0x1a8] sm:$0xf0]  ;;  %v1278_v6 = vor.u32 %v1710_v0, %v1275_v1  ;;  %v1709_v8 = vld [vmem:[%s2490_s1 + $0x114] sm:$0xf0]  ;;  %v1329_v9 = vld [vmem:[%s2490_s1 + $0x190] sm:$0xf] }
  0x1d   : > { %580 = vmatpush.bf16.msra.mxu3 %v1358_v50  ;;  %v1342_v10 = vor.u32 %v1726_v2, %v1339_v3  ;;  %v1725_v11 = vld [vmem:[%s2490_s1 + $0x194] sm:$0xf0]  ;;  %v1708_v12 = vld [vmem:[%s2490_s1 + $0x114] sm:$0xf]  ;;  %v1267_v13 = vld [vmem:[%s2490_s1 + $0x118] sm:$0xf0]  ;;  %v1266_v16 = vor.u32 %v1709_v8, %v1265_v7 }
  0x1e   : > { %v1724_v14 = vld [vmem:[%s2490_s1 + $0x194] sm:$0xf]  ;;  %v1331_v15 = vld [vmem:[%s2490_s1 + $0x198] sm:$0xf0]  ;;  %v1257_v17 = vld [vmem:[%s2490_s1 + $0x100] sm:$0xf]  ;;  %v1330_v19 = vor.u32 %v1725_v11, %v1329_v9  ;;  %v1270_v20 = vor.u32 %v1708_v12, %v1267_v13 }
  0x1f   : > { %542 = vmatpush.bf16.msra.mxu0 %v1282_v56  ;;  %v1707_v18 = vld [vmem:[%s2490_s1 + $0x104] sm:$0xf0]  ;;  %v1321_v21 = vld [vmem:[%s2490_s1 + $0x180] sm:$0xf]  ;;  %v1706_v23 = vld [vmem:[%s2490_s1 + $0x104] sm:$0xf]  ;;  %v1334_v24 = vor.u32 %v1724_v14, %v1331_v15 }
  0x20   : > { %555 = vmatpush.bf16.msra.mxu1 %v1346_v57  ;;  %568 = vmatpush.bf16.msra.mxu2 %v1286_v58  ;;  %v1723_v22 = vld [vmem:[%s2490_s1 + $0x184] sm:$0xf0]  ;;  %v1259_v25 = vld [vmem:[%s2490_s1 + $0x108] sm:$0xf0]  ;;  %v1722_v26 = vld [vmem:[%s2490_s1 + $0x184] sm:$0xf]  ;;  %v1258_v31 = vor.u32 %v1707_v18, %v1257_v17 }
  0x21   : > { %581 = vmatpush.bf16.msra.mxu3 %v1350_v62  ;;  %v1323_v27 = vld [vmem:[%s2490_s1 + $0x188] sm:$0xf0]  ;;  %v1441_v28 = vld [vmem:[%s2490_s1 + $0x70] sm:$0xf]  ;;  %v1689_v29 = vld [vmem:[%s2490_s1 + $0x74] sm:$0xf0]  ;;  %v1322_v35 = vor.u32 %v1723_v22, %v1321_v21  ;;  %v1262_v36 = vor.u32 %v1706_v23, %v1259_v25 }
  0x22   : > { %v1505_v30 = vld [vmem:[%s2490_s1 + $0xf0] sm:$0xf]  ;;  %v1705_v32 = vld [vmem:[%s2490_s1 + $0xf4] sm:$0xf0]  ;;  %v1688_v33 = vld [vmem:[%s2490_s1 + $0x74] sm:$0xf]  ;;  %v1326_v39 = vor.u32 %v1722_v26, %v1323_v27  ;;  %v1442_v40 = vor.u32 %v1689_v29, %v1441_v28 }
  0x23   : > { %543 = vmatpush.bf16.msra.mxu0 %v1274_v4  ;;  %v1443_v34 = vld [vmem:[%s2490_s1 + $0x78] sm:$0xf0]  ;;  %v1704_v37 = vld [vmem:[%s2490_s1 + $0xf4] sm:$0xf]  ;;  %v1506_v41 = vor.u32 %v1705_v32, %v1505_v30  ;;  %v1433_v43 = vld [vmem:[%s2490_s1 + $0x60] sm:$0xf] }
  0x24   : > { %556 = vmatpush.bf16.msra.mxu1 %v1338_v5  ;;  %569 = vmatpush.bf16.msra.mxu2 %v1278_v6  ;;  %v1507_v38 = vld [vmem:[%s2490_s1 + $0xf8] sm:$0xf0]  ;;  %v1446_v42 = vor.u32 %v1688_v33, %v1443_v34  ;;  %v1687_v44 = vld [vmem:[%s2490_s1 + $0x64] sm:$0xf0]  ;;  %v1497_v45 = vld [vmem:[%s2490_s1 + $0xe0] sm:$0xf] }
  0x25   : > { %582 = vmatpush.bf16.msra.mxu3 %v1342_v10  ;;  %v1510_v46 = vor.u32 %v1704_v37, %v1507_v38  ;;  %v1703_v47 = vld [vmem:[%s2490_s1 + $0xe4] sm:$0xf0]  ;;  %v1686_v48 = vld [vmem:[%s2490_s1 + $0x64] sm:$0xf]  ;;  %v1435_v49 = vld [vmem:[%s2490_s1 + $0x68] sm:$0xf0]  ;;  %v1434_v52 = vor.u32 %v1687_v44, %v1433_v43 }
  0x26   : > { %v1702_v50 = vld [vmem:[%s2490_s1 + $0xe4] sm:$0xf]  ;;  %v1499_v51 = vld [vmem:[%s2490_s1 + $0xe8] sm:$0xf0]  ;;  %v1425_v53 = vld [vmem:[%s2490_s1 + $0x50] sm:$0xf]  ;;  %v1498_v54 = vor.u32 %v1703_v47, %v1497_v45  ;;  %v1438_v55 = vor.u32 %v1686_v48, %v1435_v49 }
  0x27   : > { %544 = vmatpush.bf16.msra.mxu0 %v1266_v16  ;;  %v1685_v56 = vld [vmem:[%s2490_s1 + $0x54] sm:$0xf0]  ;;  %v1489_v57 = vld [vmem:[%s2490_s1 + $0xd0] sm:$0xf]  ;;  %s2499_s15 = smov (!%p259_p4, %s1808_s15), 1  ;;  %v1502_v58 = vor.u32 %v1702_v50, %v1499_v51  ;;  %vm1089_vm0 = vcmask 1040384  }
  0x28   : > { %557 = vmatpush.bf16.msra.mxu1 %v1330_v19  ;;  %570 = vmatpush.bf16.msra.mxu2 %v1270_v20  ;;  %v1701_v59 = vld [vmem:[%s2490_s1 + $0xd4] sm:$0xf0]  ;;  %v1684_v60 = vld [vmem:[%s2490_s1 + $0x54] sm:$0xf]  ;;  %v1427_v61 = vld [vmem:[%s2490_s1 + $0x58] sm:$0xf0]  ;;  %v1426_v0 = vor.u32 %v1685_v56, %v1425_v53 }
  0x29   : > { %583 = vmatpush.bf16.msra.mxu3 %v1334_v24  ;;  %v1700_v62 = vld [vmem:[%s2490_s1 + $0xd4] sm:$0xf]  ;;  %v1491_v63 = vld [vmem:[%s2490_s1 + $0xd8] sm:$0xf0]  ;;  %s1673_s19 = sshll.u32 %s2499_s15, 2  ;;  %v1490_v3 = vor.u32 %v1701_v59, %v1489_v57  ;;  %v1430_v4 = vor.u32 %v1684_v60, %v1427_v61  ;;  %s1221_s29 = sshll.u32 %s2499_s15, 1 }
  0x2a   : > { %v1417_v1 = vld [vmem:[%s2490_s1 + $0x40] sm:$0xf]  ;;  %v1683_v2 = vld [vmem:[%s2490_s1 + $0x44] sm:$0xf0]  ;;  %s2141_s26 = scalar_lea.vmem %s2489_s0, %s1673_s19  ;;  %v1494_v8 = vor.u32 %v1700_v62, %v1491_v63  ;;  %v1682_v9 = vld [vmem:[%s2490_s1 + $0x44] sm:$0xf]  ;;  %s282_s14 = scalar_lea.vmem %s2492_s3, %s1221_s29 }
  0x2b   : > { %545 = vmatpush.bf16.msra.mxu0 %v1258_v31  ;;  %v1481_v5 = vld [vmem:[%s2490_s1 + $0xc0] sm:$0xf]  ;;  %v1699_v6 = vld [vmem:[%s2490_s1 + $0xc4] sm:$0xf0]  ;;  %v1419_v10 = vld [vmem:[%s2490_s1 + $0x48] sm:$0xf0]  ;;  %v1418_v13 = vor.u32 %v1683_v2, %v1417_v1  ;;  %s291_s27 = scalar_lea.vmem %s2493_s4, %s1221_s29 }
  0x2c   : > { %558 = vmatpush.bf16.msra.mxu1 %v1322_v35  ;;  %571 = vmatpush.bf16.msra.mxu2 %v1262_v36  ;;  %v326_v7 = vld [vmem:[%s2141_s26] sm:$0xf]  ;;  %v1698_v11 = vld [vmem:[%s2490_s1 + $0xc4] sm:$0xf]  ;;  %v1483_v12 = vld [vmem:[%s2490_s1 + $0xc8] sm:$0xf0]  ;;  %v1482_v16 = vor.u32 %v1699_v6, %v1481_v5  ;;  %v1422_v17 = vor.u32 %v1682_v9, %v1419_v10 }
  0x2d   : > { %584 = vmatpush.bf16.msra.mxu3 %v1326_v39  ;;  %361 = vst [vmem:[#allocation1] ss:$4 sm:$0xff] %v326_v7  ;;  %v1409_v14 = vld [vmem:[%s2490_s1 + $0x30] sm:$0xf]  ;;  %v1681_v15 = vld [vmem:[%s2490_s1 + $0x34] sm:$0xf0]  ;;  %v1486_v21 = vor.u32 %v1698_v11, %v1483_v12 }
  0x2e   : > { %v1473_v18 = vld [vmem:[%s2490_s1 + $0xb0] sm:$0xf]  ;;  %v1697_v19 = vld [vmem:[%s2490_s1 + $0xb4] sm:$0xf0]  ;;  %v1680_v20 = vld [vmem:[%s2490_s1 + $0x34] sm:$0xf]  ;;  %v1410_v26 = vor.u32 %v1681_v15, %v1409_v14 }
  0x2f   : > { %756 = vmatpush.bf16.msrb.mxu0 %v1442_v40  ;;  %v1411_v22 = vld [vmem:[%s2490_s1 + $0x38] sm:$0xf0]  ;;  %v1696_v23 = vld [vmem:[%s2490_s1 + $0xb4] sm:$0xf]  ;;  %v293_v25 = vld [vmem:[%s2141_s26] sm:$0x5]  ;;  %v1474_v30 = vor.u32 %v1697_v19, %v1473_v18 }
  0x30   : > { %769 = vmatpush.bf16.msrb.mxu1 %v1506_v41  ;;  %782 = vmatpush.bf16.msrb.mxu2 %v1446_v42  ;;  %v1475_v24 = vld [vmem:[%s2490_s1 + $0xb8] sm:$0xf0]  ;;  %v1465_v27 = vld [vmem:[%s2490_s1 + $0xa0] sm:$0xf]  ;;  %v1695_v28 = vld [vmem:[%s2490_s1 + $0xa4] sm:$0xf0]  ;;  %v1414_v31 = vor.u32 %v1680_v20, %v1411_v22 }
  0x31   : > { %795 = vmatpush.bf16.msrb.mxu3 %v1510_v46  ;;  %v1478_v32 = vor.u32 %v1696_v23, %v1475_v24  ;;  %v1401_v34 = vld [vmem:[%s2490_s1 + $0x20] sm:$0xf]  ;;  %v1679_v39 = vld [vmem:[%s2490_s1 + $0x24] sm:$0xf0]  ;;  %v1678_v40 = vld [vmem:[%s2490_s1 + $0x24] sm:$0xf]  ;;  %v1466_v46 = vor.u32 %v1695_v28, %v1465_v27 }
  0x32   : > { %v1403_v41 = vld [vmem:[%s2490_s1 + $0x28] sm:$0xf0]  ;;  %v1694_v44 = vld [vmem:[%s2490_s1 + $0xa4] sm:$0xf]  ;;  %v1393_v47 = vld [vmem:[%s2490_s1 + $0x10] sm:$0xf]  ;;  %v1402_v50 = vor.u32 %v1679_v39, %v1401_v34 }
  0x33   : > { %757 = vmatpush.bf16.msrb.mxu0 %v1434_v52  ;;  %v1467_v45 = vld [vmem:[%s2490_s1 + $0xa8] sm:$0xf0]  ;;  %v1406_v51 = vor.u32 %v1678_v40, %v1403_v41  ;;  %v1677_v52 = vld [vmem:[%s2490_s1 + $0x14] sm:$0xf0]  ;;  %v1457_v53 = vld [vmem:[%s2490_s1 + $0x90] sm:$0xf] }
  0x34   : > { %770 = vmatpush.bf16.msrb.mxu1 %v1498_v54  ;;  %783 = vmatpush.bf16.msrb.mxu2 %v1438_v55  ;;  %v362_v29 = vld.sshfl [vmem:[#allocation1] sm:$0xff pattern:$0x73625140]  ;;  %v363_v33 = vld.sshfl [vmem:[#allocation1 + $0x8] sm:$0xff pattern:$0x73625140]  ;;  %v1470_v55 = vor.u32 %v1694_v44, %v1467_v45 }
  0x35   : > { %796 = vmatpush.bf16.msrb.mxu3 %v1502_v58  ;;  %v364_v35 = vshrl.u32 %v362_v29, 16  ;;  %v366_v36 = vshll.u32 %v362_v29, 16  ;;  %v370_v37 = vshrl.u32 %v363_v33, 16  ;;  %v372_v38 = vshll.u32 %v363_v33, 16  ;;  %591 = vst [vmem:[#allocation1] ss:$4 sm:$0xff] %v293_v25 }
  0x36   : > { %v1693_v54 = vld [vmem:[%s2490_s1 + $0x94] sm:$0xf0]  ;;  %v1676_v56 = vld [vmem:[%s2490_s1 + $0x14] sm:$0xf]  ;;  %v1395_v57 = vld [vmem:[%s2490_s1 + $0x18] sm:$0xf0] }
  0x37   : > { %758 = vmatpush.bf16.msrb.mxu0 %v1426_v0  ;;  %v368_v42 = vrot.slane %v366_v36, 1  ;;  %v374_v43 = vrot.slane %v372_v38, 1  ;;  %v808_v58 = vld [vmem:[%s2141_s26] sm:$0xa]  ;;  %v1692_v59 = vld [vmem:[%s2490_s1 + $0x94] sm:$0xf]  ;;  %v1458_v62 = vor.u32 %v1693_v54, %v1457_v53 }
  0x38   : > { %771 = vmatpush.bf16.msrb.mxu1 %v1490_v3  ;;  %784 = vmatpush.bf16.msrb.mxu2 %v1430_v4  ;;  %v1459_v60 = vld [vmem:[%s2490_s1 + $0x98] sm:$0xf0]  ;;  %v1449_v61 = vld [vmem:[%s2490_s1 + $0x80] sm:$0xf]  ;;  %v1675_v0 = vld [vmem:[%s2490_s1 + $0x4] sm:$0xf0]  ;;  %v1394_v3 = vor.u32 %v1677_v52, %v1393_v47  ;;  %v1398_v4 = vor.u32 %v1676_v56, %v1395_v57 }
  0x39   : > { %797 = vmatpush.bf16.msrb.mxu3 %v1494_v8  ;;  %v369_v48 = vor.u32 %v368_v42, %v364_v35  ;;  %v375_v49 = vor.u32 %v374_v43, %v370_v37  ;;  %v1385_v63 = vld [vmem:[%s2490_s1] sm:$0xf]  ;;  %v1691_v5 = vld [vmem:[%s2490_s1 + $0x84] sm:$0xf0]  ;;  %v1674_v6 = vld [vmem:[%s2490_s1 + $0x4] sm:$0xf]  ;;  %v1462_v7 = vor.u32 %v1692_v59, %v1459_v60 }
  0x3a   : > { %v1387_v8 = vld [vmem:[%s2490_s1 + $0x8] sm:$0xf0]  ;;  %v1690_v9 = vld [vmem:[%s2490_s1 + $0x84] sm:$0xf]  ;;  %v1601_v11 = vld [vmem:[%s2490_s1 + $0x270] sm:$0xf]  ;;  %v1450_v14 = vor.u32 %v1691_v5, %v1449_v61  ;;  %v1386_v18 = vor.u32 %v1675_v0, %v1385_v63 }
  0x3b   : > { %759 = vmatpush.bf16.msrb.mxu0 %v1418_v13  ;;  %572 = vmatmul.bf16.vlgmr.msra.gmra.mxu2 %v369_v48  ;;  %v1451_v10 = vld [vmem:[%s2490_s1 + $0x88] sm:$0xf0]  ;;  %v1753_v12 = vld [vmem:[%s2490_s1 + $0x274] sm:$0xf0]  ;;  %v1665_v13 = vld [vmem:[%s2490_s1 + $0x2f0] sm:$0xf]  ;;  %v1390_v19 = vor.u32 %v1674_v6, %v1387_v8 }
  0x3c   : > { %772 = vmatpush.bf16.msrb.mxu1 %v1482_v16  ;;  %785 = vmatpush.bf16.msrb.mxu2 %v1422_v17  ;;  %v2245_v1 = vld.sshfl [vmem:[#allocation1] sm:$0xff pattern:$0x73625140]  ;;  %v2247_v2 = vld.sshfl [vmem:[#allocation1 + $0x8] sm:$0xff pattern:$0x73625140]  ;;  %v1454_v22 = vor.u32 %v1690_v9, %v1451_v10  ;;  %v1602_v23 = vor.u32 %v1753_v12, %v1601_v11 }
  0x3d   : > { %798 = vmatpush.bf16.msrb.mxu3 %v1486_v21  ;;  %546 = vmatmul.bf16.vlgmr.msra.gmra.mxu0 %v369_v48  ;;  %843 = vst [vmem:[#allocation1] ss:$4 sm:$0xff] %v808_v58  ;;  %v1769_v15 = vld [vmem:[%s2490_s1 + $0x2f4] sm:$0xf0]  ;;  %v1752_v16 = vld [vmem:[%s2490_s1 + $0x274] sm:$0xf] }
  0x3e   : > { %585 = vmatmul.bf16.vlgmr.msra.gmra.mxu3 %v375_v49  ;;  %559 = vmatmul.bf16.vlgmr.msra.gmra.mxu1 %v375_v49  ;;  %v1603_v17 = vld [vmem:[%s2490_s1 + $0x278] sm:$0xf0]  ;;  %v1768_v20 = vld [vmem:[%s2490_s1 + $0x2f4] sm:$0xf]  ;;  %v1666_v24 = vor.u32 %v1769_v15, %v1665_v13  ;;  %v1751_v27 = vld [vmem:[%s2490_s1 + $0x264] sm:$0xf0] }
  0x3f   : > { %760 = vmatpush.bf16.msrb.mxu0 %v1410_v26  ;;  %v1667_v21 = vld [vmem:[%s2490_s1 + $0x2f8] sm:$0xf0]  ;;  %v1606_v25 = vor.u32 %v1752_v16, %v1603_v17  ;;  %v1593_v26 = vld [vmem:[%s2490_s1 + $0x260] sm:$0xf]  ;;  %v1766_v34 = vld [vmem:[%s2490_s1 + $0x2e4] sm:$0xf] }
  0x40   : > { %773 = vmatpush.bf16.msrb.mxu1 %v1474_v30  ;;  %786 = vmatpush.bf16.msrb.mxu2 %v1414_v31  ;;  %v1670_v28 = vor.u32 %v1768_v20, %v1667_v21  ;;  %v1657_v29 = vld [vmem:[%s2490_s1 + $0x2e0] sm:$0xf]  ;;  %v1767_v30 = vld [vmem:[%s2490_s1 + $0x2e4] sm:$0xf0]  ;;  %v1750_v31 = vld [vmem:[%s2490_s1 + $0x264] sm:$0xf]  ;;  %v1594_v33 = vor.u32 %v1751_v27, %v1593_v26 }
  0x41   : > { %799 = vmatpush.bf16.msrb.mxu3 %v1478_v32  ;;  %v1595_v32 = vld [vmem:[%s2490_s1 + $0x268] sm:$0xf0]  ;;  %v1074_v36 = vld [vmem:[%s282_s14] sm:$0x3]  ;;  %v1585_v37 = vld [vmem:[%s2490_s1 + $0x250] sm:$0xf]  ;;  %v1658_v39 = vor.u32 %v1767_v30, %v1657_v29 }
  0x42   : > { %v1659_v35 = vld [vmem:[%s2490_s1 + $0x2e8] sm:$0xf0]  ;;  %v1749_v38 = vld [vmem:[%s2490_s1 + $0x254] sm:$0xf0]  ;;  %v1598_v40 = vor.u32 %v1750_v31, %v1595_v32  ;;  %v1649_v41 = vld [vmem:[%s2490_s1 + $0x2d0] sm:$0xf] }
  0x43   : > { %761 = vmatpush.bf16.msrb.mxu0 %v1402_v50  ;;  %v1662_v42 = vor.u32 %v1766_v34, %v1659_v35  ;;  %v1765_v43 = vld [vmem:[%s2490_s1 + $0x2d4] sm:$0xf0]  ;;  %v1748_v44 = vld [vmem:[%s2490_s1 + $0x254] sm:$0xf]  ;;  %v1587_v45 = vld [vmem:[%s2490_s1 + $0x258] sm:$0xf0]  ;;  %v1586_v47 = vor.u32 %v1749_v38, %v1585_v37 }
  0x44   : > { %774 = vmatpush.bf16.msrb.mxu1 %v1466_v46  ;;  %787 = vmatpush.bf16.msrb.mxu2 %v1406_v51  ;;  %v1075_v46 = vunpack.c.l.bf16 %v1074_v36  ;;  %v1764_v48 = vld [vmem:[%s2490_s1 + $0x2d4] sm:$0xf]  ;;  %v1651_v49 = vld [vmem:[%s2490_s1 + $0x2d8] sm:$0xf0]  ;;  %v1577_v50 = vld [vmem:[%s2490_s1 + $0x240] sm:$0xf]  ;;  %v1650_v53 = vor.u32 %v1765_v43, %v1649_v41  ;;  %v1590_v54 = vor.u32 %v1748_v44, %v1587_v45 }
  0x45   : > { %800 = vmatpush.bf16.msrb.mxu3 %v1470_v55  ;;  %v1747_v51 = vld [vmem:[%s2490_s1 + $0x244] sm:$0xf0]  ;;  %v1641_v52 = vld [vmem:[%s2490_s1 + $0x2c0] sm:$0xf]  ;;  %v1746_v56 = vld [vmem:[%s2490_s1 + $0x244] sm:$0xf]  ;;  %v1654_v58 = vor.u32 %v1764_v48, %v1651_v49 }
  0x46   : > { %v1763_v55 = vld [vmem:[%s2490_s1 + $0x2c4] sm:$0xf0]  ;;  %v1579_v57 = vld [vmem:[%s2490_s1 + $0x248] sm:$0xf0]  ;;  %v1578_v61 = vor.u32 %v1747_v51, %v1577_v50  ;;  %v1569_v0 = vld [vmem:[%s2490_s1 + $0x230] sm:$0xf] }
  0x47   : > { %762 = vmatpush.bf16.msrb.mxu0 %v1394_v3  ;;  %v2363_v59 = vld.sshfl [vmem:[#allocation1] sm:$0xff pattern:$0x73625140]  ;;  %v2365_v60 = vld.sshfl [vmem:[#allocation1 + $0x8] sm:$0xff pattern:$0x73625140]  ;;  %v1582_v3 = vor.u32 %v1746_v56, %v1579_v57 }
  0x48   : > { %775 = vmatpush.bf16.msrb.mxu1 %v1458_v62  ;;  %788 = vmatpush.bf16.msrb.mxu2 %v1398_v4  ;;  %v1762_v62 = vld [vmem:[%s2490_s1 + $0x2c4] sm:$0xf]  ;;  %v1643_v63 = vld [vmem:[%s2490_s1 + $0x2c8] sm:$0xf0]  ;;  %1077 = vst [vmem:[#allocation1] ss:$4 sm:$0xff] %v1075_v46 }
  0x49   : > { %801 = vmatpush.bf16.msrb.mxu3 %v1462_v7  ;;  %v1633_v4 = vld [vmem:[%s2490_s1 + $0x2b0] sm:$0xf]  ;;  %v1646_v5 = vor.u32 %v1762_v62, %v1643_v63  ;;  %v1761_v6 = vld [vmem:[%s2490_s1 + $0x2b4] sm:$0xf0]  ;;  %v1744_v7 = vld [vmem:[%s2490_s1 + $0x234] sm:$0xf] }
  0x4a   : > { %v1571_v8 = vld [vmem:[%s2490_s1 + $0x238] sm:$0xf0]  ;;  %v1760_v10 = vld [vmem:[%s2490_s1 + $0x2b4] sm:$0xf]  ;;  %v1561_v12 = vld [vmem:[%s2490_s1 + $0x220] sm:$0xf] }
  0x4b   : > { %763 = vmatpush.bf16.msrb.mxu0 %v1386_v18  ;;  %v1635_v11 = vld [vmem:[%s2490_s1 + $0x2b8] sm:$0xf0]  ;;  %v1743_v13 = vld [vmem:[%s2490_s1 + $0x224] sm:$0xf0]  ;;  %v1574_v15 = vor.u32 %v1744_v7, %v1571_v8  ;;  %v1625_v16 = vld [vmem:[%s2490_s1 + $0x2a0] sm:$0xf] }
  0x4c   : > { %776 = vmatpush.bf16.msrb.mxu1 %v1450_v14  ;;  %789 = vmatpush.bf16.msrb.mxu2 %v1390_v19  ;;  %v1634_v14 = vor.u32 %v1761_v6, %v1633_v4  ;;  %v1638_v17 = vor.u32 %v1760_v10, %v1635_v11  ;;  %v1759_v18 = vld [vmem:[%s2490_s1 + $0x2a4] sm:$0xf0]  ;;  %v1742_v19 = vld [vmem:[%s2490_s1 + $0x224] sm:$0xf]  ;;  %v1563_v20 = vld [vmem:[%s2490_s1 + $0x228] sm:$0xf0]  ;;  %v1562_v21 = vor.u32 %v1743_v13, %v1561_v12 }
  0x4d   : > { %802 = vmatpush.bf16.msrb.mxu3 %v1454_v22  ;;  %v1758_v22 = vld [vmem:[%s2490_s1 + $0x2a4] sm:$0xf]  ;;  %v1626_v26 = vor.u32 %v1759_v18, %v1625_v16  ;;  %v1566_v27 = vor.u32 %v1742_v19, %v1563_v20  ;;  %v1757_v30 = vld [vmem:[%s2490_s1 + $0x294] sm:$0xf0]  ;;  %v1740_v31 = vld [vmem:[%s2490_s1 + $0x214] sm:$0xf] }
  0x4e   : > { %764 = vmatmul.bf16.vlgmr.msrb.gmra.mxu0 %v2245_v1  ;;  %v1555_v32 = vld [vmem:[%s2490_s1 + $0x218] sm:$0xf0]  ;;  %v1756_v34 = vld [vmem:[%s2490_s1 + $0x294] sm:$0xf]  ;;  %v1545_v36 = vld [vmem:[%s2490_s1 + $0x200] sm:$0xf] }
  0x4f   : > { %1012 = vmatpush.bf16.msra.mxu0 %v1602_v23  ;;  %790 = vmatmul.bf16.vlgmr.msrb.gmra.mxu2 %v2245_v1  ;;  %v1745_v1 = vld [vmem:[%s2490_s1 + $0x234] sm:$0xf0]  ;;  %v1627_v23 = vld [vmem:[%s2490_s1 + $0x2a8] sm:$0xf0]  ;;  %v1619_v35 = vld [vmem:[%s2490_s1 + $0x298] sm:$0xf0] }
  0x50   : > { %1025 = vmatpush.bf16.msra.mxu1 %v1666_v24  ;;  %1038 = vmatpush.bf16.msra.mxu2 %v1606_v25  ;;  %v1570_v9 = vor.u32 %v1745_v1, %v1569_v0  ;;  %v1553_v24 = vld [vmem:[%s2490_s1 + $0x210] sm:$0xf]  ;;  %v1741_v25 = vld [vmem:[%s2490_s1 + $0x214] sm:$0xf0]  ;;  %v1630_v29 = vor.u32 %v1758_v22, %v1627_v23  ;;  %v1739_v37 = vld [vmem:[%s2490_s1 + $0x204] sm:$0xf0]  ;;  %v1622_v41 = vor.u32 %v1756_v34, %v1619_v35 }
  0x51   : > { %1051 = vmatpush.bf16.msra.mxu3 %v1670_v28  ;;  %777 = vmatmul.bf16.vlgmr.msrb.gmra.mxu1 %v2247_v2  ;;  %v1617_v28 = vld [vmem:[%s2490_s1 + $0x290] sm:$0xf]  ;;  %v1738_v43 = vld [vmem:[%s2490_s1 + $0x204] sm:$0xf]  ;;  %v1547_v44 = vld [vmem:[%s2490_s1 + $0x208] sm:$0xf0]  ;;  %v1546_v45 = vor.u32 %v1739_v37, %v1545_v36 }
  0x52   : > { %803 = vmatmul.bf16.vlgmr.msrb.gmra.mxu3 %v2247_v2  ;;  %v1642_v2 = vor.u32 %v1763_v55, %v1641_v52  ;;  %v1618_v38 = vor.u32 %v1757_v30, %v1617_v28  ;;  %v1754_v46 = vld [vmem:[%s2490_s1 + $0x284] sm:$0xf]  ;;  %v1550_v49 = vor.u32 %v1738_v43, %v1547_v44  ;;  %v848_v51 = vrot.slane %v2363_v59, 1  ;;  %v1066_v11 = vld [vmem:[%s2491_s2] sm:$0x3] }
  0x53   : > { %1013 = vmatpush.bf16.msra.mxu0 %v1594_v33  ;;  %v1554_v33 = vor.u32 %v1741_v25, %v1553_v24  ;;  %v849_v52 = vrot.slane %v2365_v60, 1  ;;  %v1069_v22 = vperm.slane %v1066_v11, 1  ;;  %v1078_v24 = vld.sshfl [vmem:[#allocation1] sm:$0xff pattern:$0x73625140] }
  0x54   : > { %1026 = vmatpush.bf16.msra.mxu1 %v1658_v39  ;;  %1039 = vmatpush.bf16.msra.mxu2 %v1598_v40  ;;  %v1558_v39 = vor.u32 %v1740_v31, %v1555_v32  ;;  %v1609_v40 = vld [vmem:[%s2490_s1 + $0x280] sm:$0xf] }
  0x55   : > { %1052 = vmatpush.bf16.msra.mxu3 %v1662_v42  ;;  %v1755_v42 = vld [vmem:[%s2490_s1 + $0x284] sm:$0xf0] }
  0x56   : > { %v1610_v48 = vor.u32 %v1755_v42, %v1609_v40 }
  0x57   : > { %1014 = vmatpush.bf16.msra.mxu0 %v1586_v47  ;;  %v1611_v47 = vld [vmem:[%s2490_s1 + $0x288] sm:$0xf0] }
  0x58   : > { %1027 = vmatpush.bf16.msra.mxu1 %v1650_v53  ;;  %1040 = vmatpush.bf16.msra.mxu2 %v1590_v54  ;;  %v1614_v50 = vor.u32 %v1754_v46, %v1611_v47 }
  0x59   : > { %1053 = vmatpush.bf16.msra.mxu3 %v1654_v58 }
  0x5b   : > { %1015 = vmatpush.bf16.msra.mxu0 %v1578_v61 }
  0x5c   : > { %1028 = vmatpush.bf16.msra.mxu1 %v1642_v2  ;;  %1041 = vmatpush.bf16.msra.mxu2 %v1582_v3 }
  0x5d   : > { %1054 = vmatpush.bf16.msra.mxu3 %v1646_v5 }
  0x5f   : > { %1016 = vmatpush.bf16.msra.mxu0 %v1570_v9 }
  0x60   : > { %1029 = vmatpush.bf16.msra.mxu1 %v1634_v14  ;;  %1042 = vmatpush.bf16.msra.mxu2 %v1574_v15  ;;  %v1068_v15 = vperm.slane %v1066_v11, 0 }
  0x61   : > { %1055 = vmatpush.bf16.msra.mxu3 %v1638_v17 }
  0x63   : > { %1017 = vmatpush.bf16.msra.mxu0 %v1562_v21 }
  0x64   : > { %1030 = vmatpush.bf16.msra.mxu1 %v1626_v26  ;;  %1043 = vmatpush.bf16.msra.mxu2 %v1566_v27  ;;  %v1079_v26 = vld.sshfl [vmem:[#allocation1 + $0x8] sm:$0xff pattern:$0x73625140] }
  0x65   : > { %1056 = vmatpush.bf16.msra.mxu3 %v1630_v29 }
  0x67   : > { %1018 = vmatpush.bf16.msra.mxu0 %v1554_v33 }
  0x68   : > { %1031 = vmatpush.bf16.msra.mxu1 %v1618_v38  ;;  %1044 = vmatpush.bf16.msra.mxu2 %v1558_v39 }
  0x69   : > { %1057 = vmatpush.bf16.msra.mxu3 %v1622_v41 }
  0x6b   : > { %1019 = vmatpush.bf16.msra.mxu0 %v1546_v45 }
  0x6c   : > { %1032 = vmatpush.bf16.msra.mxu1 %v1610_v48  ;;  %1045 = vmatpush.bf16.msra.mxu2 %v1550_v49 }
  0x6d   : > { %1058 = vmatpush.bf16.msra.mxu3 %v1614_v50 }
  0x6e   : > { %1020 = vmatmul.bf16.vlgmr.msra.gmra.mxu0 %v848_v51 }
  0x6f   : > { %1033 = vmatmul.bf16.vlgmr.msra.gmra.mxu1 %v849_v52  ;;  %1046 = vmatmul.bf16.vlgmr.msra.gmra.mxu2 %v848_v51 }
  0x70   : > { %1059 = vmatmul.bf16.vlgmr.msra.gmra.mxu3 %v849_v52 }
  0xba   : > { %v547_v53 = vpop.f32.mrf.mxu0 }
  0xbb   : > { %v560_v54 = vpop.f32.mrf.mxu1 }
  0xbc   : > { %v561_v5 = vadd.f32 %v560_v54, %v547_v53 }
  0xbe   : > { %v573_v55 = vpop.f32.mrf.mxu2 }
  0xc1   : > { %v586_v56 = vpop.f32.mrf.mxu3 }
  0xc2   : > { %v549_v57 = vpop.f32.mrf.mxu0  ;;  %v587_v8 = vadd.f32 %v586_v56, %v573_v55 }
  0xc3   : > { %v562_v58 = vpop.f32.mrf.mxu1 }
  0xc6   : > { %v575_v61 = vpop.f32.mrf.mxu2 }
  0xc9   : > { %v588_v62 = vpop.f32.mrf.mxu3 }
  0xcb   : > { %v765_v63 = vpop.f32.mrf.mxu0 }
  0xcc   : > { %v766_v6 = vadd.f32 %v765_v63, %v561_v5 }
  0xce   : > { %v778_v59 = vpop.f32.mrf.mxu1 }
  0xcf   : > { %v779_v12 = vadd.f32 %v778_v59, %v766_v6 }
  0xd2   : > { %v791_v0 = vpop.f32.mrf.mxu2 }
  0xd3   : > { %v767_v60 = vpop.f32.mrf.mxu0  ;;  %v792_v13 = vadd.f32 %v791_v0, %v587_v8 }
  0xd5   : > { %v804_v1 = vpop.f32.mrf.mxu3 }
  0xd6   : > { %v780_v2 = vpop.f32.mrf.mxu1  ;;  %v805_v19 = vadd.f32 %v804_v1, %v792_v13 }
  0xda   : > { %v793_v3 = vpop.f32.mrf.mxu2 }
  0xdd   : > { %v806_v4 = vpop.f32.mrf.mxu3 }
  0xeb   : > { %v1021_v7 = vpop.f32.mrf.mxu0 }
  0xec   : > { %v1034_v9 = vpop.f32.mrf.mxu1 }
  0xed   : > { %v1035_v10 = vadd.f32 %v1034_v9, %v1021_v7 }
  0xef   : > { %v1064_v14 = vadd.f32 %v1035_v10, %v779_v12 }
  0xf1   : > { %v1072_v20 = vadd.f32 %v1068_v15, %v1064_v14 }
  0xf2   : > { %v1047_v16 = vpop.f32.mrf.mxu2 }
  0xf3   : > { %v1023_v17 = vpop.f32.mrf.mxu0  ;;  %v1060_v18 = vpop.f32.mrf.mxu3  ;;  %v1082_v27 = vadd.f32 %v1078_v24, %v1072_v20 }
  0xf4   : > { %v1061_v21 = vadd.f32 %v1060_v18, %v1047_v16  ;;  %v1036_v23 = vpop.f32.mrf.mxu1 }
  0xf5   : > { %v1084_v32 = vmax.f32 %v1082_v27, 0.0 }
  0xf6   : > { %v1065_v25 = vadd.f32 %v1061_v21, %v805_v19 }
  0xf8   : > { %v1073_v28 = vadd.f32 %v1069_v22, %v1065_v25 }
  0xfa   : > { %v1083_v29 = vadd.f32 %v1079_v26, %v1073_v28  ;;  %v1049_v30 = vpop.f32.mrf.mxu2 }
  0xfb   : > { %v1062_v31 = vpop.f32.mrf.mxu3 }
  0xfc   : > { %v1085_v33 = vmax.f32 %v1083_v29, 0.0 }
  0xfe   : > { %v1086_v34 = vpack.c.bf16 %v1085_v33, %v1084_v32 }
 0x100   : > { %v1088_v35 = vrot.slane %v1086_v34, 3 }
 0x102   : > { %v1092_v36 = vsel %vm1089_vm0, %v1086_v34, %v1088_v35 }
 0x103   : > { %1094 = vst [vmem:[%s291_s27] sm:$0x3] %v1092_v36 }
 0x104 PF: > { %s14_s17 = sadd.s32 1, %s1816_s17   ;;  %s2494_s15 = smov %s1812_s16 }
 0x105   : > { %p11_p5 = scmp.ge.s32.totalorder %s14_s17, 4   ;;  %s2495_s16 = smov %s2497_s18 }
 0x107   :  { %13 = sbr.rel (!%p11_p5) target bundleno = 2 (0x2), region = 77 }

// kernel: resnet1d_forward.31
= control target key start
LH: loop header
LB: loop body
LE: loop exit
PB: predicated region body
PF: predicated region fallthrough
CT: control target
= control target key end

     0   :  { %s1752_s12 = smov 0   ;;  %s1754_s13 = smov 0   ;;  %s2385_s0 = inlined_call_operand.vmem [shape: bf16[2,4,256], index: 0, kind: input, shape index: {}]   ;;  %s2386_s1 = inlined_call_operand.vmem [shape: bf16[3,256,256], index: 1, kind: input, shape index: {}]   ;;  %s2387_s2 = inlined_call_operand.vmem [shape: f32[1,256], index: 2, kind: input, shape index: {}]   ;;  %s2388_s3 = inlined_call_operand.vmem [shape: bf16[2,2,256], index: 3, kind: output, shape index: {}]  }
   0x1   :  { %s1756_s14 = smov 0  }
   0x2 LB: > { %s25_s15 = sadd.s32 1, %s1726_s13  ;;  %p1133_p0 = scmp.ge.s32.totalorder %s1730_s14, 1  ;;  %s1730_s14 = sphi %s1756_s14, %s13_s14   ;;  %s1726_s13 = sphi %s1754_s13, %s2390_s13   ;;  %s1722_s12 = sphi %s1752_s12, %s2389_s12  }
   0x3   : > { %p27_p1 = scmp.ge.s32.totalorder %s25_s15, 2  ;;  %p172_p2 = scmp.lt.s32.totalorder %s1730_s14, 3 }
   0x5   : > { %s2392_s15 = smov (%p27_p1, %s25_s15), 0  ;;  %p173_p3 = pnand %p1133_p0, %p172_p2 }
   0x6   : > { %p208_p4 = scmp.lt.s32.totalorder (!%p173_p3), %s1722_s12, 1 }
   0x7   : > { %176 = sbr.rel (%p173_p3) target bundleno = 258 (0x102), region = 32 }
   0xc   : > { %v1227_v0 = vld [vmem:[%s2386_s1 + $0x170] sm:$0xf]  ;;  %v1635_v1 = vld [vmem:[%s2386_s1 + $0x174] sm:$0xf0]  ;;  %v1634_v5 = vld [vmem:[%s2386_s1 + $0x174] sm:$0xf] }
   0xd   : > { %v1291_v2 = vld [vmem:[%s2386_s1 + $0x1f0] sm:$0xf]  ;;  %v1228_v3 = vor.u32 %v1635_v1, %v1227_v0  ;;  %v1651_v4 = vld [vmem:[%s2386_s1 + $0x1f4] sm:$0xf0]  ;;  %v1229_v6 = vld [vmem:[%s2386_s1 + $0x178] sm:$0xf0] }
   0xe   : > { %v1292_v7 = vor.u32 %v1651_v4, %v1291_v2  ;;  %v1232_v8 = vor.u32 %v1634_v5, %v1229_v6  ;;  %v1650_v9 = vld [vmem:[%s2386_s1 + $0x1f4] sm:$0xf]  ;;  %v1293_v10 = vld [vmem:[%s2386_s1 + $0x1f8] sm:$0xf0]  ;;  %v1219_v11 = vld [vmem:[%s2386_s1 + $0x160] sm:$0xf] }
   0xf   : > { %478 = vmatpush.bf16.msra.mxu0 %v1228_v3  ;;  %v1296_v12 = vor.u32 %v1650_v9, %v1293_v10  ;;  %v1633_v13 = vld [vmem:[%s2386_s1 + $0x164] sm:$0xf0]  ;;  %v1283_v14 = vld [vmem:[%s2386_s1 + $0x1e0] sm:$0xf]  ;;  %v1632_v18 = vld [vmem:[%s2386_s1 + $0x164] sm:$0xf] }
  0x10   : > { %v1649_v15 = vld [vmem:[%s2386_s1 + $0x1e4] sm:$0xf0]  ;;  %491 = vmatpush.bf16.msra.mxu1 %v1292_v7  ;;  %504 = vmatpush.bf16.msra.mxu2 %v1232_v8  ;;  %v1220_v16 = vor.u32 %v1633_v13, %v1219_v11  ;;  %v1221_v19 = vld [vmem:[%s2386_s1 + $0x168] sm:$0xf0]  ;;  %v1648_v20 = vld [vmem:[%s2386_s1 + $0x1e4] sm:$0xf] }
  0x11   : > { %v1284_v17 = vor.u32 %v1649_v15, %v1283_v14  ;;  %517 = vmatpush.bf16.msra.mxu3 %v1296_v12  ;;  %v1224_v21 = vor.u32 %v1632_v18, %v1221_v19  ;;  %v1285_v22 = vld [vmem:[%s2386_s1 + $0x1e8] sm:$0xf0]  ;;  %v1211_v23 = vld [vmem:[%s2386_s1 + $0x150] sm:$0xf]  ;;  %v1631_v24 = vld [vmem:[%s2386_s1 + $0x154] sm:$0xf0] }
  0x12   : > { %v1288_v25 = vor.u32 %v1648_v20, %v1285_v22  ;;  %v1275_v26 = vld [vmem:[%s2386_s1 + $0x1d0] sm:$0xf]  ;;  %v1647_v27 = vld [vmem:[%s2386_s1 + $0x1d4] sm:$0xf0]  ;;  %v1630_v28 = vld [vmem:[%s2386_s1 + $0x154] sm:$0xf]  ;;  %v1212_v29 = vor.u32 %v1631_v24, %v1211_v23 }
  0x13   : > { %479 = vmatpush.bf16.msra.mxu0 %v1220_v16  ;;  %v1213_v30 = vld [vmem:[%s2386_s1 + $0x158] sm:$0xf0]  ;;  %v1646_v31 = vld [vmem:[%s2386_s1 + $0x1d4] sm:$0xf]  ;;  %v1276_v33 = vor.u32 %v1647_v27, %v1275_v26  ;;  %v1203_v35 = vld [vmem:[%s2386_s1 + $0x140] sm:$0xf] }
  0x14   : > { %v1277_v32 = vld [vmem:[%s2386_s1 + $0x1d8] sm:$0xf0]  ;;  %492 = vmatpush.bf16.msra.mxu1 %v1284_v17  ;;  %505 = vmatpush.bf16.msra.mxu2 %v1224_v21  ;;  %v1216_v34 = vor.u32 %v1630_v28, %v1213_v30  ;;  %v1629_v36 = vld [vmem:[%s2386_s1 + $0x144] sm:$0xf0]  ;;  %v1267_v37 = vld [vmem:[%s2386_s1 + $0x1c0] sm:$0xf] }
  0x15   : > { %518 = vmatpush.bf16.msra.mxu3 %v1288_v25  ;;  %v1280_v38 = vor.u32 %v1646_v31, %v1277_v32  ;;  %v1645_v39 = vld [vmem:[%s2386_s1 + $0x1c4] sm:$0xf0]  ;;  %v1628_v40 = vld [vmem:[%s2386_s1 + $0x144] sm:$0xf]  ;;  %v1205_v41 = vld [vmem:[%s2386_s1 + $0x148] sm:$0xf0]  ;;  %v1204_v44 = vor.u32 %v1629_v36, %v1203_v35 }
  0x16   : > { %v1644_v42 = vld [vmem:[%s2386_s1 + $0x1c4] sm:$0xf]  ;;  %v1269_v43 = vld [vmem:[%s2386_s1 + $0x1c8] sm:$0xf0]  ;;  %v1268_v45 = vor.u32 %v1645_v39, %v1267_v37  ;;  %v1208_v46 = vor.u32 %v1628_v40, %v1205_v41  ;;  %v1195_v47 = vld [vmem:[%s2386_s1 + $0x130] sm:$0xf] }
  0x17   : > { %480 = vmatpush.bf16.msra.mxu0 %v1212_v29  ;;  %v1627_v48 = vld [vmem:[%s2386_s1 + $0x134] sm:$0xf0]  ;;  %v1259_v49 = vld [vmem:[%s2386_s1 + $0x1b0] sm:$0xf]  ;;  %v1272_v50 = vor.u32 %v1644_v42, %v1269_v43  ;;  %v1626_v52 = vld [vmem:[%s2386_s1 + $0x134] sm:$0xf] }
  0x18   : > { %493 = vmatpush.bf16.msra.mxu1 %v1276_v33  ;;  %506 = vmatpush.bf16.msra.mxu2 %v1216_v34  ;;  %v1643_v51 = vld [vmem:[%s2386_s1 + $0x1b4] sm:$0xf0]  ;;  %v1197_v53 = vld [vmem:[%s2386_s1 + $0x138] sm:$0xf0]  ;;  %v1642_v54 = vld [vmem:[%s2386_s1 + $0x1b4] sm:$0xf]  ;;  %v1196_v56 = vor.u32 %v1627_v48, %v1195_v47 }
  0x19   : > { %519 = vmatpush.bf16.msra.mxu3 %v1280_v38  ;;  %v1261_v55 = vld [vmem:[%s2386_s1 + $0x1b8] sm:$0xf0]  ;;  %v1260_v57 = vor.u32 %v1643_v51, %v1259_v49  ;;  %v1200_v58 = vor.u32 %v1626_v52, %v1197_v53  ;;  %v1187_v59 = vld [vmem:[%s2386_s1 + $0x120] sm:$0xf]  ;;  %v1625_v60 = vld [vmem:[%s2386_s1 + $0x124] sm:$0xf0] }
  0x1a   : > { %v1251_v61 = vld [vmem:[%s2386_s1 + $0x1a0] sm:$0xf]  ;;  %v1264_v62 = vor.u32 %v1642_v54, %v1261_v55  ;;  %v1641_v63 = vld [vmem:[%s2386_s1 + $0x1a4] sm:$0xf0]  ;;  %v1624_v0 = vld [vmem:[%s2386_s1 + $0x124] sm:$0xf]  ;;  %v1188_v4 = vor.u32 %v1625_v60, %v1187_v59 }
  0x1b   : > { %481 = vmatpush.bf16.msra.mxu0 %v1204_v44  ;;  %v1189_v1 = vld [vmem:[%s2386_s1 + $0x128] sm:$0xf0]  ;;  %v1640_v2 = vld [vmem:[%s2386_s1 + $0x1a4] sm:$0xf]  ;;  %v1252_v5 = vor.u32 %v1641_v63, %v1251_v61  ;;  %v1179_v7 = vld [vmem:[%s2386_s1 + $0x110] sm:$0xf] }
  0x1c   : > { %494 = vmatpush.bf16.msra.mxu1 %v1268_v45  ;;  %507 = vmatpush.bf16.msra.mxu2 %v1208_v46  ;;  %v1253_v3 = vld [vmem:[%s2386_s1 + $0x1a8] sm:$0xf0]  ;;  %v1192_v6 = vor.u32 %v1624_v0, %v1189_v1  ;;  %v1623_v8 = vld [vmem:[%s2386_s1 + $0x114] sm:$0xf0]  ;;  %v1243_v9 = vld [vmem:[%s2386_s1 + $0x190] sm:$0xf] }
  0x1d   : > { %520 = vmatpush.bf16.msra.mxu3 %v1272_v50  ;;  %v1256_v10 = vor.u32 %v1640_v2, %v1253_v3  ;;  %v1639_v11 = vld [vmem:[%s2386_s1 + $0x194] sm:$0xf0]  ;;  %v1622_v12 = vld [vmem:[%s2386_s1 + $0x114] sm:$0xf]  ;;  %v1181_v13 = vld [vmem:[%s2386_s1 + $0x118] sm:$0xf0]  ;;  %v1180_v16 = vor.u32 %v1623_v8, %v1179_v7 }
  0x1e   : > { %v1638_v14 = vld [vmem:[%s2386_s1 + $0x194] sm:$0xf]  ;;  %v1245_v15 = vld [vmem:[%s2386_s1 + $0x198] sm:$0xf0]  ;;  %v1171_v17 = vld [vmem:[%s2386_s1 + $0x100] sm:$0xf]  ;;  %v1244_v19 = vor.u32 %v1639_v11, %v1243_v9  ;;  %v1184_v20 = vor.u32 %v1622_v12, %v1181_v13 }
  0x1f   : > { %482 = vmatpush.bf16.msra.mxu0 %v1196_v56  ;;  %v1621_v18 = vld [vmem:[%s2386_s1 + $0x104] sm:$0xf0]  ;;  %v1235_v21 = vld [vmem:[%s2386_s1 + $0x180] sm:$0xf]  ;;  %v1620_v23 = vld [vmem:[%s2386_s1 + $0x104] sm:$0xf]  ;;  %v1248_v24 = vor.u32 %v1638_v14, %v1245_v15 }
  0x20   : > { %495 = vmatpush.bf16.msra.mxu1 %v1260_v57  ;;  %508 = vmatpush.bf16.msra.mxu2 %v1200_v58  ;;  %v1637_v22 = vld [vmem:[%s2386_s1 + $0x184] sm:$0xf0]  ;;  %v1173_v25 = vld [vmem:[%s2386_s1 + $0x108] sm:$0xf0]  ;;  %v1636_v26 = vld [vmem:[%s2386_s1 + $0x184] sm:$0xf]  ;;  %v1172_v31 = vor.u32 %v1621_v18, %v1171_v17 }
  0x21   : > { %521 = vmatpush.bf16.msra.mxu3 %v1264_v62  ;;  %v1237_v27 = vld [vmem:[%s2386_s1 + $0x188] sm:$0xf0]  ;;  %v1355_v28 = vld [vmem:[%s2386_s1 + $0x70] sm:$0xf]  ;;  %v1603_v29 = vld [vmem:[%s2386_s1 + $0x74] sm:$0xf0]  ;;  %v1236_v35 = vor.u32 %v1637_v22, %v1235_v21  ;;  %v1176_v36 = vor.u32 %v1620_v23, %v1173_v25 }
  0x22   : > { %v1419_v30 = vld [vmem:[%s2386_s1 + $0xf0] sm:$0xf]  ;;  %v1619_v32 = vld [vmem:[%s2386_s1 + $0xf4] sm:$0xf0]  ;;  %v1602_v33 = vld [vmem:[%s2386_s1 + $0x74] sm:$0xf]  ;;  %v1240_v39 = vor.u32 %v1636_v26, %v1237_v27  ;;  %v1356_v40 = vor.u32 %v1603_v29, %v1355_v28 }
  0x23   : > { %483 = vmatpush.bf16.msra.mxu0 %v1188_v4  ;;  %v1357_v34 = vld [vmem:[%s2386_s1 + $0x78] sm:$0xf0]  ;;  %v1618_v37 = vld [vmem:[%s2386_s1 + $0xf4] sm:$0xf]  ;;  %v1420_v41 = vor.u32 %v1619_v32, %v1419_v30  ;;  %v1347_v43 = vld [vmem:[%s2386_s1 + $0x60] sm:$0xf] }
  0x24   : > { %496 = vmatpush.bf16.msra.mxu1 %v1252_v5  ;;  %509 = vmatpush.bf16.msra.mxu2 %v1192_v6  ;;  %v1421_v38 = vld [vmem:[%s2386_s1 + $0xf8] sm:$0xf0]  ;;  %v1360_v42 = vor.u32 %v1602_v33, %v1357_v34  ;;  %v1601_v44 = vld [vmem:[%s2386_s1 + $0x64] sm:$0xf0]  ;;  %v1411_v45 = vld [vmem:[%s2386_s1 + $0xe0] sm:$0xf] }
  0x25   : > { %522 = vmatpush.bf16.msra.mxu3 %v1256_v10  ;;  %v1424_v46 = vor.u32 %v1618_v37, %v1421_v38  ;;  %v1617_v47 = vld [vmem:[%s2386_s1 + $0xe4] sm:$0xf0]  ;;  %v1600_v48 = vld [vmem:[%s2386_s1 + $0x64] sm:$0xf]  ;;  %v1349_v49 = vld [vmem:[%s2386_s1 + $0x68] sm:$0xf0]  ;;  %v1348_v52 = vor.u32 %v1601_v44, %v1347_v43 }
  0x26   : > { %v1616_v50 = vld [vmem:[%s2386_s1 + $0xe4] sm:$0xf]  ;;  %v1413_v51 = vld [vmem:[%s2386_s1 + $0xe8] sm:$0xf0]  ;;  %v1339_v53 = vld [vmem:[%s2386_s1 + $0x50] sm:$0xf]  ;;  %v1412_v54 = vor.u32 %v1617_v47, %v1411_v45  ;;  %v1352_v55 = vor.u32 %v1600_v48, %v1349_v49 }
  0x27   : > { %484 = vmatpush.bf16.msra.mxu0 %v1180_v16  ;;  %v1599_v56 = vld [vmem:[%s2386_s1 + $0x54] sm:$0xf0]  ;;  %v1403_v57 = vld [vmem:[%s2386_s1 + $0xd0] sm:$0xf]  ;;  %s2394_s12 = smov (!%p208_p4, %s1722_s12), 1  ;;  %v1416_v58 = vor.u32 %v1616_v50, %v1413_v51  ;;  %vm1019_vm0 = vcmask 1040384  }
  0x28   : > { %497 = vmatpush.bf16.msra.mxu1 %v1244_v19  ;;  %510 = vmatpush.bf16.msra.mxu2 %v1184_v20  ;;  %v1615_v59 = vld [vmem:[%s2386_s1 + $0xd4] sm:$0xf0]  ;;  %v1598_v60 = vld [vmem:[%s2386_s1 + $0x54] sm:$0xf]  ;;  %v1341_v61 = vld [vmem:[%s2386_s1 + $0x58] sm:$0xf0]  ;;  %v1340_v0 = vor.u32 %v1599_v56, %v1339_v53 }
  0x29   : > { %523 = vmatpush.bf16.msra.mxu3 %v1248_v24  ;;  %v1614_v62 = vld [vmem:[%s2386_s1 + $0xd4] sm:$0xf]  ;;  %v1405_v63 = vld [vmem:[%s2386_s1 + $0xd8] sm:$0xf0]  ;;  %s1587_s4 = sshll.u32 %s2394_s12, 2  ;;  %v1404_v3 = vor.u32 %v1615_v59, %v1403_v57  ;;  %v1344_v4 = vor.u32 %v1598_v60, %v1341_v61  ;;  %s1136_s17 = sshll.u32 %s2394_s12, 1 }
  0x2a   : > { %v1331_v1 = vld [vmem:[%s2386_s1 + $0x40] sm:$0xf]  ;;  %v1597_v2 = vld [vmem:[%s2386_s1 + $0x44] sm:$0xf0]  ;;  %s2050_s11 = scalar_lea.vmem %s2385_s0, %s1587_s4  ;;  %v1408_v8 = vor.u32 %v1614_v62, %v1405_v63  ;;  %v1596_v9 = vld [vmem:[%s2386_s1 + $0x44] sm:$0xf]  ;;  %s231_s20 = scalar_lea.vmem %s2388_s3, %s1136_s17 }
  0x2b   : > { %485 = vmatpush.bf16.msra.mxu0 %v1172_v31  ;;  %v1395_v5 = vld [vmem:[%s2386_s1 + $0xc0] sm:$0xf]  ;;  %v1613_v6 = vld [vmem:[%s2386_s1 + $0xc4] sm:$0xf0]  ;;  %v1333_v10 = vld [vmem:[%s2386_s1 + $0x48] sm:$0xf0]  ;;  %v1332_v13 = vor.u32 %v1597_v2, %v1331_v1 }
  0x2c   : > { %498 = vmatpush.bf16.msra.mxu1 %v1236_v35  ;;  %511 = vmatpush.bf16.msra.mxu2 %v1176_v36  ;;  %v266_v7 = vld [vmem:[%s2050_s11] sm:$0xf]  ;;  %v1612_v11 = vld [vmem:[%s2386_s1 + $0xc4] sm:$0xf]  ;;  %v1397_v12 = vld [vmem:[%s2386_s1 + $0xc8] sm:$0xf0]  ;;  %v1396_v16 = vor.u32 %v1613_v6, %v1395_v5  ;;  %v1336_v17 = vor.u32 %v1596_v9, %v1333_v10 }
  0x2d   : > { %524 = vmatpush.bf16.msra.mxu3 %v1240_v39  ;;  %301 = vst [vmem:[#allocation1] ss:$4 sm:$0xff] %v266_v7  ;;  %v1323_v14 = vld [vmem:[%s2386_s1 + $0x30] sm:$0xf]  ;;  %v1595_v15 = vld [vmem:[%s2386_s1 + $0x34] sm:$0xf0]  ;;  %v1400_v21 = vor.u32 %v1612_v11, %v1397_v12 }
  0x2e   : > { %v1387_v18 = vld [vmem:[%s2386_s1 + $0xb0] sm:$0xf]  ;;  %v1611_v19 = vld [vmem:[%s2386_s1 + $0xb4] sm:$0xf0]  ;;  %v1594_v20 = vld [vmem:[%s2386_s1 + $0x34] sm:$0xf]  ;;  %v1324_v26 = vor.u32 %v1595_v15, %v1323_v14 }
  0x2f   : > { %696 = vmatpush.bf16.msrb.mxu0 %v1356_v40  ;;  %v1325_v22 = vld [vmem:[%s2386_s1 + $0x38] sm:$0xf0]  ;;  %v1610_v23 = vld [vmem:[%s2386_s1 + $0xb4] sm:$0xf]  ;;  %v233_v25 = vld [vmem:[%s2050_s11] sm:$0x5]  ;;  %v1388_v30 = vor.u32 %v1611_v19, %v1387_v18 }
  0x30   : > { %709 = vmatpush.bf16.msrb.mxu1 %v1420_v41  ;;  %722 = vmatpush.bf16.msrb.mxu2 %v1360_v42  ;;  %v1389_v24 = vld [vmem:[%s2386_s1 + $0xb8] sm:$0xf0]  ;;  %v1379_v27 = vld [vmem:[%s2386_s1 + $0xa0] sm:$0xf]  ;;  %v1609_v28 = vld [vmem:[%s2386_s1 + $0xa4] sm:$0xf0]  ;;  %v1328_v31 = vor.u32 %v1594_v20, %v1325_v22 }
  0x31   : > { %735 = vmatpush.bf16.msrb.mxu3 %v1424_v46  ;;  %v1392_v32 = vor.u32 %v1610_v23, %v1389_v24  ;;  %v1315_v34 = vld [vmem:[%s2386_s1 + $0x20] sm:$0xf]  ;;  %v1593_v39 = vld [vmem:[%s2386_s1 + $0x24] sm:$0xf0]  ;;  %v1592_v40 = vld [vmem:[%s2386_s1 + $0x24] sm:$0xf]  ;;  %v1380_v46 = vor.u32 %v1609_v28, %v1379_v27 }
  0x32   : > { %v1317_v41 = vld [vmem:[%s2386_s1 + $0x28] sm:$0xf0]  ;;  %v1608_v44 = vld [vmem:[%s2386_s1 + $0xa4] sm:$0xf]  ;;  %v1307_v47 = vld [vmem:[%s2386_s1 + $0x10] sm:$0xf]  ;;  %v1316_v50 = vor.u32 %v1593_v39, %v1315_v34 }
  0x33   : > { %697 = vmatpush.bf16.msrb.mxu0 %v1348_v52  ;;  %v1381_v45 = vld [vmem:[%s2386_s1 + $0xa8] sm:$0xf0]  ;;  %v1320_v51 = vor.u32 %v1592_v40, %v1317_v41  ;;  %v1591_v52 = vld [vmem:[%s2386_s1 + $0x14] sm:$0xf0]  ;;  %v1371_v53 = vld [vmem:[%s2386_s1 + $0x90] sm:$0xf] }
  0x34   : > { %710 = vmatpush.bf16.msrb.mxu1 %v1412_v54  ;;  %723 = vmatpush.bf16.msrb.mxu2 %v1352_v55  ;;  %v302_v29 = vld.sshfl [vmem:[#allocation1] sm:$0xff pattern:$0x73625140]  ;;  %v303_v33 = vld.sshfl [vmem:[#allocation1 + $0x8] sm:$0xff pattern:$0x73625140]  ;;  %v1384_v55 = vor.u32 %v1608_v44, %v1381_v45 }
  0x35   : > { %736 = vmatpush.bf16.msrb.mxu3 %v1416_v58  ;;  %v304_v35 = vshrl.u32 %v302_v29, 16  ;;  %v306_v36 = vshll.u32 %v302_v29, 16  ;;  %v310_v37 = vshrl.u32 %v303_v33, 16  ;;  %v312_v38 = vshll.u32 %v303_v33, 16  ;;  %531 = vst [vmem:[#allocation1] ss:$4 sm:$0xff] %v233_v25 }
  0x36   : > { %v1607_v54 = vld [vmem:[%s2386_s1 + $0x94] sm:$0xf0]  ;;  %v1590_v56 = vld [vmem:[%s2386_s1 + $0x14] sm:$0xf]  ;;  %v1309_v57 = vld [vmem:[%s2386_s1 + $0x18] sm:$0xf0] }
  0x37   : > { %698 = vmatpush.bf16.msrb.mxu0 %v1340_v0  ;;  %v308_v42 = vrot.slane %v306_v36, 1  ;;  %v314_v43 = vrot.slane %v312_v38, 1  ;;  %v748_v58 = vld [vmem:[%s2050_s11] sm:$0xa]  ;;  %v1606_v59 = vld [vmem:[%s2386_s1 + $0x94] sm:$0xf]  ;;  %v1372_v62 = vor.u32 %v1607_v54, %v1371_v53 }
  0x38   : > { %711 = vmatpush.bf16.msrb.mxu1 %v1404_v3  ;;  %724 = vmatpush.bf16.msrb.mxu2 %v1344_v4  ;;  %v1373_v60 = vld [vmem:[%s2386_s1 + $0x98] sm:$0xf0]  ;;  %v1363_v61 = vld [vmem:[%s2386_s1 + $0x80] sm:$0xf]  ;;  %v1589_v0 = vld [vmem:[%s2386_s1 + $0x4] sm:$0xf0]  ;;  %v1308_v3 = vor.u32 %v1591_v52, %v1307_v47  ;;  %v1312_v4 = vor.u32 %v1590_v56, %v1309_v57 }
  0x39   : > { %737 = vmatpush.bf16.msrb.mxu3 %v1408_v8  ;;  %v309_v48 = vor.u32 %v308_v42, %v304_v35  ;;  %v315_v49 = vor.u32 %v314_v43, %v310_v37  ;;  %v1299_v63 = vld [vmem:[%s2386_s1] sm:$0xf]  ;;  %v1605_v5 = vld [vmem:[%s2386_s1 + $0x84] sm:$0xf0]  ;;  %v1588_v6 = vld [vmem:[%s2386_s1 + $0x4] sm:$0xf]  ;;  %v1376_v7 = vor.u32 %v1606_v59, %v1373_v60 }
  0x3a   : > { %v1301_v8 = vld [vmem:[%s2386_s1 + $0x8] sm:$0xf0]  ;;  %v1604_v9 = vld [vmem:[%s2386_s1 + $0x84] sm:$0xf]  ;;  %v1515_v11 = vld [vmem:[%s2386_s1 + $0x270] sm:$0xf]  ;;  %v1364_v14 = vor.u32 %v1605_v5, %v1363_v61  ;;  %v1300_v18 = vor.u32 %v1589_v0, %v1299_v63 }
  0x3b   : > { %699 = vmatpush.bf16.msrb.mxu0 %v1332_v13  ;;  %512 = vmatmul.bf16.vlgmr.msra.gmra.mxu2 %v309_v48  ;;  %v1365_v10 = vld [vmem:[%s2386_s1 + $0x88] sm:$0xf0]  ;;  %v1667_v12 = vld [vmem:[%s2386_s1 + $0x274] sm:$0xf0]  ;;  %v1579_v13 = vld [vmem:[%s2386_s1 + $0x2f0] sm:$0xf]  ;;  %v1304_v19 = vor.u32 %v1588_v6, %v1301_v8 }
  0x3c   : > { %712 = vmatpush.bf16.msrb.mxu1 %v1396_v16  ;;  %725 = vmatpush.bf16.msrb.mxu2 %v1336_v17  ;;  %v2154_v1 = vld.sshfl [vmem:[#allocation1] sm:$0xff pattern:$0x73625140]  ;;  %v2156_v2 = vld.sshfl [vmem:[#allocation1 + $0x8] sm:$0xff pattern:$0x73625140]  ;;  %v1368_v22 = vor.u32 %v1604_v9, %v1365_v10  ;;  %v1516_v23 = vor.u32 %v1667_v12, %v1515_v11 }
  0x3d   : > { %738 = vmatpush.bf16.msrb.mxu3 %v1400_v21  ;;  %486 = vmatmul.bf16.vlgmr.msra.gmra.mxu0 %v309_v48  ;;  %783 = vst [vmem:[#allocation1] ss:$4 sm:$0xff] %v748_v58  ;;  %v1683_v15 = vld [vmem:[%s2386_s1 + $0x2f4] sm:$0xf0]  ;;  %v1666_v16 = vld [vmem:[%s2386_s1 + $0x274] sm:$0xf] }
  0x3e   : > { %525 = vmatmul.bf16.vlgmr.msra.gmra.mxu3 %v315_v49  ;;  %499 = vmatmul.bf16.vlgmr.msra.gmra.mxu1 %v315_v49  ;;  %v1517_v17 = vld [vmem:[%s2386_s1 + $0x278] sm:$0xf0]  ;;  %v1682_v20 = vld [vmem:[%s2386_s1 + $0x2f4] sm:$0xf]  ;;  %v1580_v24 = vor.u32 %v1683_v15, %v1579_v13  ;;  %v1665_v27 = vld [vmem:[%s2386_s1 + $0x264] sm:$0xf0] }
  0x3f   : > { %700 = vmatpush.bf16.msrb.mxu0 %v1324_v26  ;;  %v1581_v21 = vld [vmem:[%s2386_s1 + $0x2f8] sm:$0xf0]  ;;  %v1520_v25 = vor.u32 %v1666_v16, %v1517_v17  ;;  %v1507_v26 = vld [vmem:[%s2386_s1 + $0x260] sm:$0xf]  ;;  %v1680_v34 = vld [vmem:[%s2386_s1 + $0x2e4] sm:$0xf] }
  0x40   : > { %713 = vmatpush.bf16.msrb.mxu1 %v1388_v30  ;;  %726 = vmatpush.bf16.msrb.mxu2 %v1328_v31  ;;  %v1584_v28 = vor.u32 %v1682_v20, %v1581_v21  ;;  %v1571_v29 = vld [vmem:[%s2386_s1 + $0x2e0] sm:$0xf]  ;;  %v1681_v30 = vld [vmem:[%s2386_s1 + $0x2e4] sm:$0xf0]  ;;  %v1664_v31 = vld [vmem:[%s2386_s1 + $0x264] sm:$0xf]  ;;  %v1508_v33 = vor.u32 %v1665_v27, %v1507_v26 }
  0x41   : > { %739 = vmatpush.bf16.msrb.mxu3 %v1392_v32  ;;  %v1509_v32 = vld [vmem:[%s2386_s1 + $0x268] sm:$0xf0]  ;;  %v1499_v36 = vld [vmem:[%s2386_s1 + $0x250] sm:$0xf]  ;;  %v1663_v37 = vld [vmem:[%s2386_s1 + $0x254] sm:$0xf0]  ;;  %v1572_v38 = vor.u32 %v1681_v30, %v1571_v29 }
  0x42   : > { %v1573_v35 = vld [vmem:[%s2386_s1 + $0x2e8] sm:$0xf0]  ;;  %v1512_v39 = vor.u32 %v1664_v31, %v1509_v32  ;;  %v1563_v40 = vld [vmem:[%s2386_s1 + $0x2d0] sm:$0xf]  ;;  %v1679_v42 = vld [vmem:[%s2386_s1 + $0x2d4] sm:$0xf0]  ;;  %v1500_v45 = vor.u32 %v1663_v37, %v1499_v36 }
  0x43   : > { %701 = vmatpush.bf16.msrb.mxu0 %v1316_v50  ;;  %v1576_v41 = vor.u32 %v1680_v34, %v1573_v35  ;;  %v1662_v43 = vld [vmem:[%s2386_s1 + $0x254] sm:$0xf]  ;;  %v1501_v44 = vld [vmem:[%s2386_s1 + $0x258] sm:$0xf0]  ;;  %v1491_v48 = vld [vmem:[%s2386_s1 + $0x240] sm:$0xf]  ;;  %v1564_v50 = vor.u32 %v1679_v42, %v1563_v40 }
  0x44   : > { %714 = vmatpush.bf16.msrb.mxu1 %v1380_v46  ;;  %727 = vmatpush.bf16.msrb.mxu2 %v1320_v51  ;;  %v1678_v46 = vld [vmem:[%s2386_s1 + $0x2d4] sm:$0xf]  ;;  %v1565_v47 = vld [vmem:[%s2386_s1 + $0x2d8] sm:$0xf0]  ;;  %v1661_v49 = vld [vmem:[%s2386_s1 + $0x244] sm:$0xf0]  ;;  %v1504_v51 = vor.u32 %v1662_v43, %v1501_v44 }
  0x45   : > { %740 = vmatpush.bf16.msrb.mxu3 %v1384_v55  ;;  %v1555_v52 = vld [vmem:[%s2386_s1 + $0x2c0] sm:$0xf]  ;;  %v1568_v53 = vor.u32 %v1678_v46, %v1565_v47  ;;  %v1677_v54 = vld [vmem:[%s2386_s1 + $0x2c4] sm:$0xf0]  ;;  %v1660_v55 = vld [vmem:[%s2386_s1 + $0x244] sm:$0xf]  ;;  %v1492_v57 = vor.u32 %v1661_v49, %v1491_v48 }
  0x46   : > { %v1493_v56 = vld [vmem:[%s2386_s1 + $0x248] sm:$0xf0]  ;;  %v1676_v58 = vld [vmem:[%s2386_s1 + $0x2c4] sm:$0xf]  ;;  %v1483_v60 = vld [vmem:[%s2386_s1 + $0x230] sm:$0xf] }
  0x47   : > { %702 = vmatpush.bf16.msrb.mxu0 %v1308_v3  ;;  %v1557_v59 = vld [vmem:[%s2386_s1 + $0x2c8] sm:$0xf0]  ;;  %v1659_v61 = vld [vmem:[%s2386_s1 + $0x234] sm:$0xf0]  ;;  %v1496_v63 = vor.u32 %v1660_v55, %v1493_v56  ;;  %v1547_v0 = vld [vmem:[%s2386_s1 + $0x2b0] sm:$0xf] }
  0x48   : > { %715 = vmatpush.bf16.msrb.mxu1 %v1372_v62  ;;  %728 = vmatpush.bf16.msrb.mxu2 %v1312_v4  ;;  %v1556_v62 = vor.u32 %v1677_v54, %v1555_v52  ;;  %v1658_v3 = vld [vmem:[%s2386_s1 + $0x234] sm:$0xf]  ;;  %v1485_v4 = vld [vmem:[%s2386_s1 + $0x238] sm:$0xf0]  ;;  %v1484_v5 = vor.u32 %v1659_v61, %v1483_v60  ;;  %v1475_v8 = vld [vmem:[%s2386_s1 + $0x220] sm:$0xf] }
  0x49   : > { %741 = vmatpush.bf16.msrb.mxu3 %v1376_v7  ;;  %v1674_v6 = vld [vmem:[%s2386_s1 + $0x2b4] sm:$0xf]  ;;  %v1549_v7 = vld [vmem:[%s2386_s1 + $0x2b8] sm:$0xf0]  ;;  %v1657_v9 = vld [vmem:[%s2386_s1 + $0x224] sm:$0xf0]  ;;  %v1488_v11 = vor.u32 %v1658_v3, %v1485_v4 }
  0x4a   : > { %v1539_v12 = vld [vmem:[%s2386_s1 + $0x2a0] sm:$0xf]  ;;  %v1552_v13 = vor.u32 %v1674_v6, %v1549_v7  ;;  %v1656_v15 = vld [vmem:[%s2386_s1 + $0x224] sm:$0xf]  ;;  %v1477_v16 = vld [vmem:[%s2386_s1 + $0x228] sm:$0xf0]  ;;  %v1476_v17 = vor.u32 %v1657_v9, %v1475_v8 }
  0x4b   : > { %703 = vmatpush.bf16.msrb.mxu0 %v1300_v18  ;;  %v1672_v18 = vld [vmem:[%s2386_s1 + $0x2a4] sm:$0xf]  ;;  %v1467_v20 = vld [vmem:[%s2386_s1 + $0x210] sm:$0xf]  ;;  %v1655_v21 = vld [vmem:[%s2386_s1 + $0x214] sm:$0xf0] }
  0x4c   : > { %716 = vmatpush.bf16.msrb.mxu1 %v1364_v14  ;;  %729 = vmatpush.bf16.msrb.mxu2 %v1304_v19  ;;  %v1673_v14 = vld [vmem:[%s2386_s1 + $0x2a4] sm:$0xf0]  ;;  %v1541_v19 = vld [vmem:[%s2386_s1 + $0x2a8] sm:$0xf0]  ;;  %v1671_v26 = vld [vmem:[%s2386_s1 + $0x294] sm:$0xf0]  ;;  %v1468_v29 = vor.u32 %v1655_v21, %v1467_v20 }
  0x4d   : > { %742 = vmatpush.bf16.msrb.mxu3 %v1368_v22  ;;  %v1540_v22 = vor.u32 %v1673_v14, %v1539_v12  ;;  %v1654_v27 = vld [vmem:[%s2386_s1 + $0x214] sm:$0xf]  ;;  %v1533_v31 = vld [vmem:[%s2386_s1 + $0x298] sm:$0xf0]  ;;  %v1459_v32 = vld [vmem:[%s2386_s1 + $0x200] sm:$0xf] }
  0x4e   : > { %704 = vmatmul.bf16.vlgmr.msrb.gmra.mxu0 %v2154_v1  ;;  %v1670_v30 = vld [vmem:[%s2386_s1 + $0x294] sm:$0xf]  ;;  %v1523_v36 = vld [vmem:[%s2386_s1 + $0x280] sm:$0xf]  ;;  %v1669_v37 = vld [vmem:[%s2386_s1 + $0x284] sm:$0xf0] }
  0x4f   : > { %952 = vmatpush.bf16.msra.mxu0 %v1516_v23  ;;  %730 = vmatmul.bf16.vlgmr.msrb.gmra.mxu2 %v2154_v1  ;;  %v1560_v1 = vor.u32 %v1676_v58, %v1557_v59  ;;  %v1480_v23 = vor.u32 %v1656_v15, %v1477_v16  ;;  %v1461_v40 = vld [vmem:[%s2386_s1 + $0x208] sm:$0xf0]  ;;  %v784_v44 = vld.sshfl [vmem:[#allocation1] sm:$0xff pattern:$0x73625140] }
  0x50   : > { %965 = vmatpush.bf16.msra.mxu1 %v1580_v24  ;;  %978 = vmatpush.bf16.msra.mxu2 %v1520_v25  ;;  %v1531_v24 = vld [vmem:[%s2386_s1 + $0x290] sm:$0xf]  ;;  %v1544_v25 = vor.u32 %v1672_v18, %v1541_v19  ;;  %v1525_v43 = vld [vmem:[%s2386_s1 + $0x288] sm:$0xf0]  ;;  %v788_v49 = vrot.slane %v784_v44, 1 }
  0x51   : > { %991 = vmatpush.bf16.msra.mxu3 %v1584_v28  ;;  %717 = vmatmul.bf16.vlgmr.msrb.gmra.mxu1 %v2156_v2  ;;  %v1469_v28 = vld [vmem:[%s2386_s1 + $0x218] sm:$0xf0]  ;;  %v1532_v34 = vor.u32 %v1671_v26, %v1531_v24  ;;  %v786_v47 = vld.sshfl [vmem:[#allocation1 + $0x8] sm:$0xff pattern:$0x73625140] }
  0x52   : > { %743 = vmatmul.bf16.vlgmr.msrb.gmra.mxu3 %v2156_v2  ;;  %v1675_v2 = vld [vmem:[%s2386_s1 + $0x2b4] sm:$0xf0]  ;;  %v1472_v35 = vor.u32 %v1654_v27, %v1469_v28  ;;  %v1006_v9 = vld [vmem:[%s2387_s2] sm:$0x3] }
  0x53   : > { %953 = vmatpush.bf16.msra.mxu0 %v1508_v33  ;;  %v1548_v10 = vor.u32 %v1675_v2, %v1547_v0  ;;  %v1653_v33 = vld [vmem:[%s2386_s1 + $0x204] sm:$0xf0]  ;;  %v1009_v19 = vperm.slane %v1006_v9, 1 }
  0x54   : > { %966 = vmatpush.bf16.msra.mxu1 %v1572_v38  ;;  %979 = vmatpush.bf16.msra.mxu2 %v1512_v39  ;;  %v1536_v38 = vor.u32 %v1670_v30, %v1533_v31  ;;  %v1652_v39 = vld [vmem:[%s2386_s1 + $0x204] sm:$0xf]  ;;  %v1460_v42 = vor.u32 %v1653_v33, %v1459_v32 }
  0x55   : > { %992 = vmatpush.bf16.msra.mxu3 %v1576_v41  ;;  %v1668_v41 = vld [vmem:[%s2386_s1 + $0x284] sm:$0xf]  ;;  %v1464_v46 = vor.u32 %v1652_v39, %v1461_v40 }
  0x56   : > { %v1528_v48 = vor.u32 %v1668_v41, %v1525_v43 }
  0x57   : > { %954 = vmatpush.bf16.msra.mxu0 %v1500_v45  ;;  %v1524_v45 = vor.u32 %v1669_v37, %v1523_v36 }
  0x58   : > { %967 = vmatpush.bf16.msra.mxu1 %v1564_v50  ;;  %980 = vmatpush.bf16.msra.mxu2 %v1504_v51  ;;  %v789_v50 = vrot.slane %v786_v47, 1 }
  0x59   : > { %993 = vmatpush.bf16.msra.mxu3 %v1568_v53 }
  0x5b   : > { %955 = vmatpush.bf16.msra.mxu0 %v1492_v57 }
  0x5c   : > { %968 = vmatpush.bf16.msra.mxu1 %v1556_v62  ;;  %981 = vmatpush.bf16.msra.mxu2 %v1496_v63 }
  0x5d   : > { %994 = vmatpush.bf16.msra.mxu3 %v1560_v1 }
  0x5f   : > { %956 = vmatpush.bf16.msra.mxu0 %v1484_v5 }
  0x60   : > { %969 = vmatpush.bf16.msra.mxu1 %v1548_v10  ;;  %982 = vmatpush.bf16.msra.mxu2 %v1488_v11 }
  0x61   : > { %995 = vmatpush.bf16.msra.mxu3 %v1552_v13  ;;  %v1008_v13 = vperm.slane %v1006_v9, 0 }
  0x63   : > { %957 = vmatpush.bf16.msra.mxu0 %v1476_v17 }
  0x64   : > { %970 = vmatpush.bf16.msra.mxu1 %v1540_v22  ;;  %983 = vmatpush.bf16.msra.mxu2 %v1480_v23 }
  0x65   : > { %996 = vmatpush.bf16.msra.mxu3 %v1544_v25 }
  0x67   : > { %958 = vmatpush.bf16.msra.mxu0 %v1468_v29 }
  0x68   : > { %971 = vmatpush.bf16.msra.mxu1 %v1532_v34  ;;  %984 = vmatpush.bf16.msra.mxu2 %v1472_v35 }
  0x69   : > { %997 = vmatpush.bf16.msra.mxu3 %v1536_v38 }
  0x6b   : > { %959 = vmatpush.bf16.msra.mxu0 %v1460_v42 }
  0x6c   : > { %972 = vmatpush.bf16.msra.mxu1 %v1524_v45  ;;  %985 = vmatpush.bf16.msra.mxu2 %v1464_v46 }
  0x6d   : > { %998 = vmatpush.bf16.msra.mxu3 %v1528_v48 }
  0x6e   : > { %960 = vmatmul.bf16.vlgmr.msra.gmra.mxu0 %v788_v49 }
  0x6f   : > { %973 = vmatmul.bf16.vlgmr.msra.gmra.mxu1 %v789_v50  ;;  %986 = vmatmul.bf16.vlgmr.msra.gmra.mxu2 %v788_v49 }
  0x70   : > { %999 = vmatmul.bf16.vlgmr.msra.gmra.mxu3 %v789_v50 }
  0xba   : > { %v487_v51 = vpop.f32.mrf.mxu0 }
  0xbb   : > { %v500_v52 = vpop.f32.mrf.mxu1 }
  0xbc   : > { %v501_v3 = vadd.f32 %v500_v52, %v487_v51 }
  0xbe   : > { %v513_v53 = vpop.f32.mrf.mxu2 }
  0xc1   : > { %v526_v54 = vpop.f32.mrf.mxu3 }
  0xc2   : > { %v489_v55 = vpop.f32.mrf.mxu0  ;;  %v527_v5 = vadd.f32 %v526_v54, %v513_v53 }
  0xc3   : > { %v502_v56 = vpop.f32.mrf.mxu1 }
  0xc6   : > { %v515_v57 = vpop.f32.mrf.mxu2 }
  0xc9   : > { %v528_v58 = vpop.f32.mrf.mxu3 }
  0xcb   : > { %v705_v59 = vpop.f32.mrf.mxu0 }
  0xcc   : > { %v706_v6 = vadd.f32 %v705_v59, %v501_v3 }
  0xce   : > { %v718_v60 = vpop.f32.mrf.mxu1 }
  0xcf   : > { %v719_v11 = vadd.f32 %v718_v60, %v706_v6 }
  0xd2   : > { %v731_v61 = vpop.f32.mrf.mxu2 }
  0xd3   : > { %v707_v63 = vpop.f32.mrf.mxu0  ;;  %v732_v10 = vadd.f32 %v731_v61, %v527_v5 }
  0xd5   : > { %v744_v62 = vpop.f32.mrf.mxu3 }
  0xd6   : > { %v720_v0 = vpop.f32.mrf.mxu1  ;;  %v745_v17 = vadd.f32 %v744_v62, %v732_v10 }
  0xda   : > { %v733_v1 = vpop.f32.mrf.mxu2 }
  0xdd   : > { %v746_v2 = vpop.f32.mrf.mxu3 }
  0xeb   : > { %v961_v4 = vpop.f32.mrf.mxu0 }
  0xec   : > { %v974_v7 = vpop.f32.mrf.mxu1 }
  0xed   : > { %v975_v8 = vadd.f32 %v974_v7, %v961_v4 }
  0xef   : > { %v1004_v12 = vadd.f32 %v975_v8, %v719_v11 }
  0xf1   : > { %v1012_v21 = vadd.f32 %v1008_v13, %v1004_v12 }
  0xf2   : > { %v987_v14 = vpop.f32.mrf.mxu2 }
  0xf3   : > { %v963_v15 = vpop.f32.mrf.mxu0  ;;  %v1000_v16 = vpop.f32.mrf.mxu3  ;;  %v1014_v24 = vmax.f32 %v1012_v21, 0.0 }
  0xf4   : > { %v1001_v18 = vadd.f32 %v1000_v16, %v987_v14  ;;  %v976_v20 = vpop.f32.mrf.mxu1 }
  0xf6   : > { %v1005_v22 = vadd.f32 %v1001_v18, %v745_v17 }
  0xf8   : > { %v1013_v23 = vadd.f32 %v1009_v19, %v1005_v22 }
  0xfa   : > { %v1015_v25 = vmax.f32 %v1013_v23, 0.0  ;;  %v989_v26 = vpop.f32.mrf.mxu2 }
  0xfb   : > { %v1002_v27 = vpop.f32.mrf.mxu3 }
  0xfc   : > { %v1016_v28 = vpack.c.bf16 %v1015_v25, %v1014_v24 }
  0xfe   : > { %v1018_v29 = vrot.slane %v1016_v28, 3 }
 0x100   : > { %v1022_v30 = vsel %vm1019_vm0, %v1016_v28, %v1018_v29 }
 0x101   : > { %1024 = vst [vmem:[%s231_s20] sm:$0x3] %v1022_v30 }
 0x102 PF: > { %s13_s14 = sadd.s32 1, %s1730_s14   ;;  %s2389_s12 = smov %s1726_s13 }
 0x103   : > { %p10_p5 = scmp.ge.s32.totalorder %s13_s14, 4   ;;  %s2390_s13 = smov %s2392_s15 }
 0x105   :  { %12 = sbr.rel (!%p10_p5) target bundleno = 2 (0x2), region = 70 }

</bundles_post_ra>
